<compile_context>
chip_gen: v5e
topology: v5e:2x2
jax: 0.10.0
libtpu: 0.0.40
codegen_flags: <defaults>
</compile_context>

<pallas_src>
import functools

import jax
import jax.numpy as jnp
from jax import lax
from jax.experimental import pallas as pl
from jax.experimental.pallas import tpu as pltpu

LANE = 128
BN_EPS = 1e-5


def _round_up(x, m):
    return ((x + m - 1) // m) * m


# ---------------------------------------------------------------------------
# Pallas kernels
# ---------------------------------------------------------------------------
def _conv3x3_kernel(x_ref, w_ref, m_ref, a_ref, o_ref, *, band, W, relu):
    """Fused 3x3 conv + BN-scale/shift + ReLU for one (sample, Cout-tile) block.

    x_ref: (1, band+2, W+2, Cp)  bf16   spatially padded activation rows
    w_ref: (9, Cp, tn)           bf16   packed weights, tap-major (ky*3+kx)
    m_ref: (1, tn)               f32    folded BN scale
    a_ref: (1, tn)               f32    folded (bias*scale + shift)
    o_ref: (1, band, W, tn)      bf16
    """
    tn = o_ref.shape[-1]
    scale = m_ref[...]
    shift = a_ref[...]

    def row_body(h, carry):
        # Three whole padded input rows (aligned bf16 loads, dynamic leading index).
        rows = [x_ref[0, h + k, :, :] for k in range(3)]          # each (W+2, Cp)
        out = jnp.zeros((W, tn), jnp.float32)
        for kx in range(3):
            acc = jnp.zeros((W + 2, tn), jnp.float32)
            for ky in range(3):
                acc = acc + jnp.dot(rows[ky], w_ref[ky * 3 + kx],
                                    preferred_element_type=jnp.float32)
            # kx tap shift realized as a static f32 sublane slice of the result.
            out = out + acc[kx:kx + W, :]
        y = out * scale + shift
        if relu:
            y = jnp.maximum(y, 0.0)
        o_ref[0, h, :, :] = y.astype(o_ref.dtype)
        return carry

    lax.fori_loop(0, band, row_body, 0)


def _maxpool_kernel(x_ref, o_ref, *, cp):
    """2x2 max-pool of one output row; horizontal pair lives in the lane dim."""
    r0 = x_ref[0, 0]                       # (Wo, 2*Cp)
    r1 = x_ref[0, 1]
    m = jnp.maximum(r0, r1)
    o_ref[0, 0] = jnp.maximum(m[:, :cp], m[:, cp:])   # 128-aligned lane slices


def _mlp3_kernel(x_ref, w1_ref, b1_ref, w2_ref, b2_ref, w3_ref, b3_ref, o_ref):
    """Fused classifier: Linear -> ReLU -> Linear -> ReLU -> Linear."""
    h = jnp.dot(x_ref[...], w1_ref[...], preferred_element_type=jnp.float32)
    h = jnp.maximum(h + b1_ref[...], 0.0)
    h = jnp.dot(h.astype(w2_ref.dtype), w2_ref[...],
                preferred_element_type=jnp.float32)
    h = jnp.maximum(h + b2_ref[...], 0.0)
    y = jnp.dot(h.astype(w3_ref.dtype), w3_ref[...],
                preferred_element_type=jnp.float32) + b3_ref[...]
    o_ref[...] = y.astype(o_ref.dtype)


# ---------------------------------------------------------------------------
# Wrappers
# ---------------------------------------------------------------------------
def conv3x3_bn_relu(x, layer, max_band_rows=64):
    """x: (N, H, W, Cp) bf16 NHWC, channel-padded.  Returns (N, H, W, Coutp) bf16."""
    N, H, W, Cp = x.shape
    w, mult, add, relu = layer['w'], layer['mult'], layer['add'], layer['relu']
    Coutp = w.shape[-1]
    tn = 256 if Coutp % 256 == 0 else 128       # lane-dense Cout tiles

    xp = jnp.pad(x, ((0, 0), (1, 1), (1, 1), (0, 0)))

    # Split H into row bands so VMEM blocks stay bounded for large images.
    band = H
    for cand in range(min(H, max_band_rows), 0, -1):
        if H % cand == 0:
            band = cand
            break

    n_j = Coutp // tn
    kernel = functools.partial(_conv3x3_kernel, band=band, W=W, relu=relu)
    cost = pl.CostEstimate(
        flops=int(2 * N * band * (W + 2) * 9 * Cp * Coutp),
        transcendentals=0,
        bytes_accessed=int(N * (band + 2) * (W + 2) * Cp * 2
                           + 9 * Cp * Coutp * 2
                           + N * band * W * Coutp * 2),
    )
    call = pl.pallas_call(
        kernel,
        out_shape=jax.ShapeDtypeStruct((N, band, W, Coutp), jnp.bfloat16),
        grid_spec=pltpu.PrefetchScalarGridSpec(
            num_scalar_prefetch=0,
            grid=(N, n_j),
            in_specs=[
                pl.BlockSpec((1, band + 2, W + 2, Cp), lambda n, j: (n, 0, 0, 0)),
                pl.BlockSpec((9, Cp, tn), lambda n, j: (0, 0, j)),
                pl.BlockSpec((1, tn), lambda n, j: (0, j)),
                pl.BlockSpec((1, tn), lambda n, j: (0, j)),
            ],
            out_specs=pl.BlockSpec((1, band, W, tn), lambda n, j: (n, 0, 0, j)),
        ),
        compiler_params=pltpu.CompilerParams(
            dimension_semantics=("parallel", "parallel")),
        cost_estimate=cost,
    )

    outs = []
    for b in range(H // band):
        x_band = xp[:, b * band: b * band + band + 2]   # static slice (+2 halo rows)
        outs.append(call(x_band, w, mult, add))
    return outs[0] if len(outs) == 1 else jnp.concatenate(outs, axis=1)


def maxpool2x2(x):
    """NHWC 2x2 max-pool, stride 2 (floors odd dims like torch MaxPool2d)."""
    N, H, W, Cp = x.shape
    Ho, Wo = H // 2, W // 2
    x = x[:, : 2 * Ho, : 2 * Wo, :]
    # Free row-major reshape: fold the horizontal 2x1 pair into the lane dim.
    xr = x.reshape(N, 2 * Ho, Wo, 2 * Cp)
    return pl.pallas_call(
        functools.partial(_maxpool_kernel, cp=Cp),
        out_shape=jax.ShapeDtypeStruct((N, Ho, Wo, Cp), x.dtype),
        grid_spec=pltpu.PrefetchScalarGridSpec(
            num_scalar_prefetch=0,
            grid=(N, Ho),
            in_specs=[pl.BlockSpec((1, 2, Wo, 2 * Cp), lambda n, i: (n, i, 0, 0))],
            out_specs=pl.BlockSpec((1, 1, Wo, Cp), lambda n, i: (n, i, 0, 0)),
        ),
        compiler_params=pltpu.CompilerParams(
            dimension_semantics=("parallel", "parallel")),
    )(xr)


def classifier_forward(x2d, fc):
    """Fused Linear->ReLU->(Dropout=id)->Linear->ReLU->(Dropout=id)->Linear."""
    w1, b1, w2, b2, w3, b3, num_classes = fc
    M, K = x2d.shape
    K1p, H1p = w1.shape
    H2p = w2.shape[1]
    NCp = w3.shape[1]
    if M <= 128:
        Mp = _round_up(M, 8)
        tm = Mp
    else:
        Mp = _round_up(M, 128)
        tm = 128
    xpad = jnp.zeros((Mp, K1p), jnp.bfloat16).at[:M, :K].set(
        x2d.astype(jnp.bfloat16))
    # TODO(synk): for full-size 4096-wide FCs the weights exceed comfortable VMEM
    # residency; tile w2/w3 over K/N there instead of whole-array blocks.
    out = pl.pallas_call(
        _mlp3_kernel,
        out_shape=jax.ShapeDtypeStruct((Mp, NCp), jnp.float32),
        grid_spec=pltpu.PrefetchScalarGridSpec(
            num_scalar_prefetch=0,
            grid=(Mp // tm,),
            in_specs=[
                pl.BlockSpec((tm, K1p), lambda i: (i, 0)),
                pl.BlockSpec((K1p, H1p), lambda i: (0, 0)),
                pl.BlockSpec((1, H1p), lambda i: (0, 0)),
                pl.BlockSpec((H1p, H2p), lambda i: (0, 0)),
                pl.BlockSpec((1, H2p), lambda i: (0, 0)),
                pl.BlockSpec((H2p, NCp), lambda i: (0, 0)),
                pl.BlockSpec((1, NCp), lambda i: (0, 0)),
            ],
            out_specs=pl.BlockSpec((tm, NCp), lambda i: (i, 0)),
        ),
        compiler_params=pltpu.CompilerParams(dimension_semantics=("parallel",)),
    )(xpad, w1, b1, w2, b2, w3, b3)
    return out[:M, :num_classes]


# ---------------------------------------------------------------------------
# VGG model: parameters, one-time packing, forward
# ---------------------------------------------------------------------------
CFG_VGG11 = [64, 'BN2d', 'ReLU', 'M', 128, 'BN2d', 'ReLU', 'M',
             256, 'BN2d', 'ReLU', 256, 'BN2d', 'ReLU', 'M',
             512, 'BN2d', 'ReLU', 512, 'BN2d', 'ReLU', 'M',
             512, 'BN2d', 'ReLU', 512, 'BN2d', 'ReLU', 'M']


def init_vgg_params(key, cfg_list, input_shape, num_classes, fc_hidden):
    """Deterministic synthetic parameter init (shapes follow the torch module)."""
    params = {'convs': [], 'bns': [], 'fcs': []}
    in_c, h, w = input_shape
    c = in_c
    for item in cfg_list:
        if item == 'M':
            h //= 2
            w //= 2
        elif isinstance(item, int):
            key, kw, kb = jax.random.split(key, 3)
            fan_in = c * 9
            params['convs'].append((
                jax.random.normal(kw, (item, c, 3, 3), jnp.float32) / jnp.sqrt(fan_in),
                0.01 * jax.random.normal(kb, (item,), jnp.float32),
            ))
            c = item
        elif item in ('BN2d', 'BN2d-NN'):
            key, k1, k2, k3, k4 = jax.random.split(key, 5)
            gamma = 1.0 + 0.1 * jax.random.normal(k1, (c,), jnp.float32)
            beta = 0.1 * jax.random.normal(k2, (c,), jnp.float32)
            mean = 0.1 * jax.random.normal(k3, (c,), jnp.float32)
            var = 1.0 + 0.2 * jax.random.uniform(k4, (c,), jnp.float32)
            params['bns'].append((gamma, beta, mean, var))
    flat_features = c * h * w
    dims = [flat_features, fc_hidden, fc_hidden, num_classes]
    for i in range(3):
        key, kw, kb = jax.random.split(key, 3)
        params['fcs'].append((
            jax.random.normal(kw, (dims[i + 1], dims[i]), jnp.float32) / jnp.sqrt(dims[i]),
            0.01 * jax.random.normal(kb, (dims[i + 1],), jnp.float32),
        ))
    return params


def pack_vgg_params(params, cfg_list, input_shape):
    """One-time packing: fold conv-bias + BN, pad channels to LANE, transpose
    weights into (tap, Cin, Cout) and cast matmul operands to bf16."""
    in_c, h, w = input_shape
    cp = _round_up(in_c, LANE)
    ops = []
    conv_idx = bn_idx = 0
    c_real = in_c
    i, n = 0, len(cfg_list)
    while i < n:
        item = cfg_list[i]
        if item == 'M':
            ops.append(('pool', None))
            h //= 2
            w //= 2
            i += 1
        elif isinstance(item, int):
            wt, b = params['convs'][conv_idx]
            conv_idx += 1
            cout = item
            scale = jnp.ones((cout,), jnp.float32)
            shift = jnp.zeros((cout,), jnp.float32)
            relu = False
            j = i + 1
            if j < n and cfg_list[j] in ('BN2d', 'BN2d-NN'):
                gamma, beta, mean, var = params['bns'][bn_idx]
                bn_idx += 1
                scale = gamma / jnp.sqrt(var + BN_EPS)
                shift = beta - mean * scale
                j += 1
            if j < n and cfg_list[j] == 'ReLU':
                relu = True
                j += 1
            cin = wt.shape[1]
            coutp = _round_up(cout, LANE)
            wm = jnp.transpose(wt, (2, 3, 1, 0)).reshape(9, cin, cout)
            wp = jnp.zeros((9, cp, coutp), jnp.bfloat16)
            wp = wp.at[:, :cin, :cout].set(wm.astype(jnp.bfloat16))
            # y = (conv + b)*scale + shift = conv*mult + add; padded columns stay 0.
            multp = jnp.zeros((1, coutp), jnp.float32).at[0, :cout].set(scale)
            addp = jnp.zeros((1, coutp), jnp.float32).at[0, :cout].set(b * scale + shift)
            ops.append(('conv', dict(w=wp, mult=multp, add=addp, relu=relu)))
            cp = coutp
            c_real = cout
            i = j
        elif item == 'DO':
            i += 1                      # Dropout (eval) == identity
        else:
            # Standalone BN/ReLU never occurs in the provided configs.
            raise NotImplementedError(item)  # TODO(synk): orphan BN/ReLU path

    flat = c_real * h * w
    (w1, b1), (w2, b2), (w3, b3) = params['fcs']     # torch layout: (out, in)

    def pack_fc(wt, bt, kp, np_):
        kk, nn = wt.shape[1], wt.shape[0]
        wpad = jnp.zeros((kp, np_), jnp.bfloat16).at[:kk, :nn].set(
            wt.T.astype(jnp.bfloat16))
        bpad = jnp.zeros((1, np_), jnp.float32).at[0, :nn].set(bt)
        return wpad, bpad

    K1p = _round_up(flat, LANE)
    H1p = _round_up(w1.shape[0], LANE)
    H2p = _round_up(w2.shape[0], LANE)
    NCp = _round_up(w3.shape[0], LANE)
    w1p, b1p = pack_fc(w1, b1, K1p, H1p)
    w2p, b2p = pack_fc(w2, b2, H1p, H2p)
    w3p, b3p = pack_fc(w3, b3, H2p, NCp)
    return {
        'ops': ops,
        'final': (h, w, c_real, cp),
        'fc': (w1p, b1p, w2p, b2p, w3p, b3p, w3.shape[0]),
    }


def vgg_forward(x_nchw, packed):
    # torch NCHW input -> NHWC bf16, channels padded once to LANE.
    x = jnp.transpose(x_nchw, (0, 2, 3, 1)).astype(jnp.bfloat16)
    N, H, W, C = x.shape
    cp0 = _round_up(C, LANE)
    if cp0 != C:
        x = jnp.pad(x, ((0, 0), (0, 0), (0, 0), (0, cp0 - C)))

    for kind, layer in packed['ops']:
        if kind == 'conv':
            x = conv3x3_bn_relu(x, layer)
        else:
            x = maxpool2x2(x)

    Hf, Wf, c_real, _ = packed['final']
    # Flatten exactly like torch: (N, C, H, W) order, real channels only.
    xf = jnp.transpose(x, (0, 3, 1, 2))[:, :c_real, :, :]
    flat = xf.reshape(N, c_real * Hf * Wf)
    return classifier_forward(flat, packed['fc'])


# ---------------------------------------------------------------------------
if __name__ == "__main__":
    # Scaled-down VGG11 (channels / 8, fc hidden 4096 -> 128) to keep the
    # synthetic test small; the layer structure and semantics are unchanged.
    SCALE = 8
    cfg_list = [c // SCALE if isinstance(c, int) else c for c in CFG_VGG11]
    input_shape = (3, 32, 32)          # (C, H, W) -- 5 maxpools: 32 -> 1
    num_classes = 10
    fc_hidden = 4096 // 32             # 128

    key = jax.random.PRNGKey(0)
    key, kp, kx = jax.random.split(key, 3)
    params = init_vgg_params(kp, cfg_list, input_shape, num_classes, fc_hidden)
    packed = pack_vgg_params(params, cfg_list, input_shape)   # one-time packing

    x = jax.random.normal(kx, (2,) + input_shape, jnp.float32)   # NCHW, like torch

    fwd = jax.jit(lambda xx: vgg_forward(xx, packed))
    out = jax.block_until_ready(fwd(x))

    assert out.shape == (2, num_classes), out.shape
    assert bool(jnp.all(jnp.isfinite(out)))
    print("KERNEL_OK")
</pallas_src>

<mosaic_0001>
module attributes {stable_mosaic.version = 11 : i64} {
  func.func @_conv3x3_kernel(%arg0: i32, %arg1: i32, %arg2: memref<1x34x34x128xbf16, #tpu.memory_space<vmem>>, %arg3: memref<9x128x128xbf16, #tpu.memory_space<vmem>>, %arg4: memref<1x128xf32, #tpu.memory_space<vmem>>, %arg5: memref<1x128xf32, #tpu.memory_space<vmem>>, %arg6: memref<1x32x32x128xbf16, #tpu.memory_space<vmem>>) attributes {dimension_semantics = [#tpu.dimension_semantics<parallel>, #tpu.dimension_semantics<parallel>], iteration_bounds = array<i64: 2, 1>, scalar_prefetch = 0 : i64, scratch_operands = 0 : i64, tpu.core_type = #tpu.core_type<tc>, window_params = [{transform_indices = @transform_0, window_bounds = array<i64: 1, 34, 34, 128>}, {transform_indices = @transform_1, window_bounds = array<i64: 9, 128, 128>}, {transform_indices = @transform_2, window_bounds = array<i64: 1, 128>}, {transform_indices = @transform_3, window_bounds = array<i64: 1, 128>}, {transform_indices = @transform_4, window_bounds = array<i64: 1, 32, 32, 128>}]} {
    %c0 = arith.constant 0 : index
    %c0_0 = arith.constant 0 : index
    %0 = vector.load %arg4[%c0, %c0_0] : memref<1x128xf32, #tpu.memory_space<vmem>>, vector<1x128xf32>
    %c0_1 = arith.constant 0 : index
    %c0_2 = arith.constant 0 : index
    %1 = vector.load %arg5[%c0_1, %c0_2] : memref<1x128xf32, #tpu.memory_space<vmem>>, vector<1x128xf32>
    %c0_i32 = arith.constant 0 : i32
    %c32_i32 = arith.constant 32 : i32
    %2 = arith.addi %c0_i32, %c32_i32 : i32
    %c1_i32 = arith.constant 1 : i32
    scf.for %arg7 = %c0_i32 to %2 step %c1_i32  : i32 {
      %c0_i32_4 = arith.constant 0 : i32
      %3 = arith.addi %arg7, %c0_i32_4 : i32
      %c0_5 = arith.constant 0 : index
      %4 = arith.index_cast %3 : i32 to index
      %c0_6 = arith.constant 0 : index
      %c0_7 = arith.constant 0 : index
      %5 = vector.load %arg2[%c0_5, %4, %c0_6, %c0_7] : memref<1x34x34x128xbf16, #tpu.memory_space<vmem>>, vector<1x1x34x128xbf16>
      %6 = vector.shape_cast %5 : vector<1x1x34x128xbf16> to vector<34x128xbf16>
      %c1_i32_8 = arith.constant 1 : i32
      %7 = arith.addi %arg7, %c1_i32_8 : i32
      %c0_9 = arith.constant 0 : index
      %8 = arith.index_cast %7 : i32 to index
      %c0_10 = arith.constant 0 : index
      %c0_11 = arith.constant 0 : index
      %9 = vector.load %arg2[%c0_9, %8, %c0_10, %c0_11] : memref<1x34x34x128xbf16, #tpu.memory_space<vmem>>, vector<1x1x34x128xbf16>
      %10 = vector.shape_cast %9 : vector<1x1x34x128xbf16> to vector<34x128xbf16>
      %c2_i32 = arith.constant 2 : i32
      %11 = arith.addi %arg7, %c2_i32 : i32
      %c0_12 = arith.constant 0 : index
      %12 = arith.index_cast %11 : i32 to index
      %c0_13 = arith.constant 0 : index
      %c0_14 = arith.constant 0 : index
      %13 = vector.load %arg2[%c0_12, %12, %c0_13, %c0_14] : memref<1x34x34x128xbf16, #tpu.memory_space<vmem>>, vector<1x1x34x128xbf16>
      %14 = vector.shape_cast %13 : vector<1x1x34x128xbf16> to vector<34x128xbf16>
      %cst = arith.constant 0.000000e+00 : f32
      %15 = vector.broadcast %cst : f32 to vector<32x128xf32>
      %cst_15 = arith.constant 0.000000e+00 : f32
      %16 = vector.broadcast %cst_15 : f32 to vector<34x128xf32>
      %c0_16 = arith.constant 0 : index
      %c0_17 = arith.constant 0 : index
      %c0_18 = arith.constant 0 : index
      %17 = vector.load %arg3[%c0_16, %c0_17, %c0_18] : memref<9x128x128xbf16, #tpu.memory_space<vmem>>, vector<1x128x128xbf16>
      %18 = vector.shape_cast %17 : vector<1x128x128xbf16> to vector<128x128xbf16>
      %cst_19 = arith.constant dense<0.000000e+00> : vector<34x128xf32>
      %19 = tpu.matmul %6, %18, %cst_19 {dimension_numbers = #tpu.dot_dimension_numbers<[1], [0], [0], [1], [0, 0, 1, 1], [], []>} : vector<34x128xbf16>, vector<128x128xbf16>, vector<34x128xf32> -> vector<34x128xf32>
      %20 = arith.addf %16, %19 : vector<34x128xf32>
      %c3 = arith.constant 3 : index
      %c0_20 = arith.constant 0 : index
      %c0_21 = arith.constant 0 : index
      %21 = vector.load %arg3[%c3, %c0_20, %c0_21] : memref<9x128x128xbf16, #tpu.memory_space<vmem>>, vector<1x128x128xbf16>
      %22 = vector.shape_cast %21 : vector<1x128x128xbf16> to vector<128x128xbf16>
      %cst_22 = arith.constant dense<0.000000e+00> : vector<34x128xf32>
      %23 = tpu.matmul %10, %22, %cst_22 {dimension_numbers = #tpu.dot_dimension_numbers<[1], [0], [0], [1], [0, 0, 1, 1], [], []>} : vector<34x128xbf16>, vector<128x128xbf16>, vector<34x128xf32> -> vector<34x128xf32>
      %24 = arith.addf %20, %23 : vector<34x128xf32>
      %c6 = arith.constant 6 : index
      %c0_23 = arith.constant 0 : index
      %c0_24 = arith.constant 0 : index
      %25 = vector.load %arg3[%c6, %c0_23, %c0_24] : memref<9x128x128xbf16, #tpu.memory_space<vmem>>, vector<1x128x128xbf16>
      %26 = vector.shape_cast %25 : vector<1x128x128xbf16> to vector<128x128xbf16>
      %cst_25 = arith.constant dense<0.000000e+00> : vector<34x128xf32>
      %27 = tpu.matmul %14, %26, %cst_25 {dimension_numbers = #tpu.dot_dimension_numbers<[1], [0], [0], [1], [0, 0, 1, 1], [], []>} : vector<34x128xbf16>, vector<128x128xbf16>, vector<34x128xf32> -> vector<34x128xf32>
      %28 = arith.addf %24, %27 : vector<34x128xf32>
      %29 = vector.extract_strided_slice %28 {offsets = [0, 0], sizes = [32, 128], strides = [1, 1]} : vector<34x128xf32> to vector<32x128xf32>
      %30 = arith.addf %15, %29 : vector<32x128xf32>
      %cst_26 = arith.constant 0.000000e+00 : f32
      %31 = vector.broadcast %cst_26 : f32 to vector<34x128xf32>
      %c1 = arith.constant 1 : index
      %c0_27 = arith.constant 0 : index
      %c0_28 = arith.constant 0 : index
      %32 = vector.load %arg3[%c1, %c0_27, %c0_28] : memref<9x128x128xbf16, #tpu.memory_space<vmem>>, vector<1x128x128xbf16>
      %33 = vector.shape_cast %32 : vector<1x128x128xbf16> to vector<128x128xbf16>
      %cst_29 = arith.constant dense<0.000000e+00> : vector<34x128xf32>
      %34 = tpu.matmul %6, %33, %cst_29 {dimension_numbers = #tpu.dot_dimension_numbers<[1], [0], [0], [1], [0, 0, 1, 1], [], []>} : vector<34x128xbf16>, vector<128x128xbf16>, vector<34x128xf32> -> vector<34x128xf32>
      %35 = arith.addf %31, %34 : vector<34x128xf32>
      %c4 = arith.constant 4 : index
      %c0_30 = arith.constant 0 : index
      %c0_31 = arith.constant 0 : index
      %36 = vector.load %arg3[%c4, %c0_30, %c0_31] : memref<9x128x128xbf16, #tpu.memory_space<vmem>>, vector<1x128x128xbf16>
      %37 = vector.shape_cast %36 : vector<1x128x128xbf16> to vector<128x128xbf16>
      %cst_32 = arith.constant dense<0.000000e+00> : vector<34x128xf32>
      %38 = tpu.matmul %10, %37, %cst_32 {dimension_numbers = #tpu.dot_dimension_numbers<[1], [0], [0], [1], [0, 0, 1, 1], [], []>} : vector<34x128xbf16>, vector<128x128xbf16>, vector<34x128xf32> -> vector<34x128xf32>
      %39 = arith.addf %35, %38 : vector<34x128xf32>
      %c7 = arith.constant 7 : index
      %c0_33 = arith.constant 0 : index
      %c0_34 = arith.constant 0 : index
      %40 = vector.load %arg3[%c7, %c0_33, %c0_34] : memref<9x128x128xbf16, #tpu.memory_space<vmem>>, vector<1x128x128xbf16>
      %41 = vector.shape_cast %40 : vector<1x128x128xbf16> to vector<128x128xbf16>
      %cst_35 = arith.constant dense<0.000000e+00> : vector<34x128xf32>
      %42 = tpu.matmul %14, %41, %cst_35 {dimension_numbers = #tpu.dot_dimension_numbers<[1], [0], [0], [1], [0, 0, 1, 1], [], []>} : vector<34x128xbf16>, vector<128x128xbf16>, vector<34x128xf32> -> vector<34x128xf32>
      %43 = arith.addf %39, %42 : vector<34x128xf32>
      %44 = vector.extract_strided_slice %43 {offsets = [1, 0], sizes = [32, 128], strides = [1, 1]} : vector<34x128xf32> to vector<32x128xf32>
      %45 = arith.addf %30, %44 : vector<32x128xf32>
      %cst_36 = arith.constant 0.000000e+00 : f32
      %46 = vector.broadcast %cst_36 : f32 to vector<34x128xf32>
      %c2 = arith.constant 2 : index
      %c0_37 = arith.constant 0 : index
      %c0_38 = arith.constant 0 : index
      %47 = vector.load %arg3[%c2, %c0_37, %c0_38] : memref<9x128x128xbf16, #tpu.memory_space<vmem>>, vector<1x128x128xbf16>
      %48 = vector.shape_cast %47 : vector<1x128x128xbf16> to vector<128x128xbf16>
      %cst_39 = arith.constant dense<0.000000e+00> : vector<34x128xf32>
      %49 = tpu.matmul %6, %48, %cst_39 {dimension_numbers = #tpu.dot_dimension_numbers<[1], [0], [0], [1], [0, 0, 1, 1], [], []>} : vector<34x128xbf16>, vector<128x128xbf16>, vector<34x128xf32> -> vector<34x128xf32>
      %50 = arith.addf %46, %49 : vector<34x128xf32>
      %c5 = arith.constant 5 : index
      %c0_40 = arith.constant 0 : index
      %c0_41 = arith.constant 0 : index
      %51 = vector.load %arg3[%c5, %c0_40, %c0_41] : memref<9x128x128xbf16, #tpu.memory_space<vmem>>, vector<1x128x128xbf16>
      %52 = vector.shape_cast %51 : vector<1x128x128xbf16> to vector<128x128xbf16>
      %cst_42 = arith.constant dense<0.000000e+00> : vector<34x128xf32>
      %53 = tpu.matmul %10, %52, %cst_42 {dimension_numbers = #tpu.dot_dimension_numbers<[1], [0], [0], [1], [0, 0, 1, 1], [], []>} : vector<34x128xbf16>, vector<128x128xbf16>, vector<34x128xf32> -> vector<34x128xf32>
      %54 = arith.addf %50, %53 : vector<34x128xf32>
      %c8 = arith.constant 8 : index
      %c0_43 = arith.constant 0 : index
      %c0_44 = arith.constant 0 : index
      %55 = vector.load %arg3[%c8, %c0_43, %c0_44] : memref<9x128x128xbf16, #tpu.memory_space<vmem>>, vector<1x128x128xbf16>
      %56 = vector.shape_cast %55 : vector<1x128x128xbf16> to vector<128x128xbf16>
      %cst_45 = arith.constant dense<0.000000e+00> : vector<34x128xf32>
      %57 = tpu.matmul %14, %56, %cst_45 {dimension_numbers = #tpu.dot_dimension_numbers<[1], [0], [0], [1], [0, 0, 1, 1], [], []>} : vector<34x128xbf16>, vector<128x128xbf16>, vector<34x128xf32> -> vector<34x128xf32>
      %58 = arith.addf %54, %57 : vector<34x128xf32>
      %59 = vector.extract_strided_slice %58 {offsets = [2, 0], sizes = [32, 128], strides = [1, 1]} : vector<34x128xf32> to vector<32x128xf32>
      %60 = arith.addf %45, %59 : vector<32x128xf32>
      %61 = vector.broadcast %0 : vector<1x128xf32> to vector<32x128xf32>
      %62 = arith.mulf %60, %61 : vector<32x128xf32>
      %63 = vector.broadcast %1 : vector<1x128xf32> to vector<32x128xf32>
      %64 = arith.addf %62, %63 : vector<32x128xf32>
      %cst_46 = arith.constant 0.000000e+00 : f32
      %65 = vector.broadcast %cst_46 : f32 to vector<32x128xf32>
      %66 = arith.maximumf %64, %65 : vector<32x128xf32>
      %67 = arith.truncf %66 : vector<32x128xf32> to vector<32x128xbf16>
      %c0_47 = arith.constant 0 : index
      %68 = arith.index_cast %arg7 : i32 to index
      %c0_48 = arith.constant 0 : index
      %c0_49 = arith.constant 0 : index
      %69 = vector.load %arg6[%c0_47, %68, %c0_48, %c0_49] : memref<1x32x32x128xbf16, #tpu.memory_space<vmem>>, vector<1x1x32x128xbf16>
      %70 = vector.shape_cast %69 : vector<1x1x32x128xbf16> to vector<32x128xbf16>
      %71 = vector.shape_cast %67 : vector<32x128xbf16> to vector<1x1x32x128xbf16>
      tpu.vector_store %arg6[%c0_47, %68, %c0_48, %c0_49], %71 {strides = array<i32>} : memref<1x32x32x128xbf16, #tpu.memory_space<vmem>>, vector<1x1x32x128xbf16>,
    }
    %c32_i32_3 = arith.constant 32 : i32
    return
  }
  func.func @transform_0(%arg0: i32, %arg1: i32) -> (i32, i32, i32, i32) {
    %c0_i32 = arith.constant 0 : i32
    %c0_i32_0 = arith.constant 0 : i32
    %c0_i32_1 = arith.constant 0 : i32
    %c0_i32_2 = arith.constant 0 : i32
    return %arg0, %c0_i32, %c0_i32_0, %c0_i32_1 : i32, i32, i32, i32
  }
  func.func @transform_1(%arg0: i32, %arg1: i32) -> (i32, i32, i32) {
    %c0_i32 = arith.constant 0 : i32
    %c0_i32_0 = arith.constant 0 : i32
    %c0_i32_1 = arith.constant 0 : i32
    return %c0_i32, %c0_i32_0, %arg1 : i32, i32, i32
  }
  func.func @transform_2(%arg0: i32, %arg1: i32) -> (i32, i32) {
    %c0_i32 = arith.constant 0 : i32
    %c0_i32_0 = arith.constant 0 : i32
    return %c0_i32, %arg1 : i32, i32
  }
  func.func @transform_3(%arg0: i32, %arg1: i32) -> (i32, i32) {
    %c0_i32 = arith.constant 0 : i32
    %c0_i32_0 = arith.constant 0 : i32
    return %c0_i32, %arg1 : i32, i32
  }
  func.func @transform_4(%arg0: i32, %arg1: i32) -> (i32, i32, i32, i32) {
    %c0_i32 = arith.constant 0 : i32
    %c0_i32_0 = arith.constant 0 : i32
    %c0_i32_1 = arith.constant 0 : i32
    return %arg0, %c0_i32, %c0_i32_0, %arg1 : i32, i32, i32, i32
  }
}

module attributes {stable_mosaic.version = 11 : i64} {
  func.func @_maxpool_kernel(%arg0: i32, %arg1: i32, %arg2: memref<1x2x16x256xbf16, #tpu.memory_space<vmem>>, %arg3: memref<1x1x16x128xbf16, #tpu.memory_space<vmem>>) attributes {dimension_semantics = [#tpu.dimension_semantics<parallel>, #tpu.dimension_semantics<parallel>], iteration_bounds = array<i64: 2, 16>, scalar_prefetch = 0 : i64, scratch_operands = 0 : i64, tpu.core_type = #tpu.core_type<tc>, window_params = [{transform_indices = @transform_0, window_bounds = array<i64: 1, 2, 16, 256>}, {transform_indices = @transform_1, window_bounds = array<i64: 1, 1, 16, 128>}]} {
    %c0 = arith.constant 0 : index
    %c0_0 = arith.constant 0 : index
    %c0_1 = arith.constant 0 : index
    %c0_2 = arith.constant 0 : index
    %0 = vector.load %arg2[%c0, %c0_0, %c0_1, %c0_2] : memref<1x2x16x256xbf16, #tpu.memory_space<vmem>>, vector<1x1x16x256xbf16>
    %1 = vector.shape_cast %0 : vector<1x1x16x256xbf16> to vector<16x256xbf16>
    %c0_3 = arith.constant 0 : index
    %c1 = arith.constant 1 : index
    %c0_4 = arith.constant 0 : index
    %c0_5 = arith.constant 0 : index
    %2 = vector.load %arg2[%c0_3, %c1, %c0_4, %c0_5] : memref<1x2x16x256xbf16, #tpu.memory_space<vmem>>, vector<1x1x16x256xbf16>
    %3 = vector.shape_cast %2 : vector<1x1x16x256xbf16> to vector<16x256xbf16>
    %4 = arith.maximumf %1, %3 : vector<16x256xbf16>
    %5 = vector.extract_strided_slice %4 {offsets = [0, 0], sizes = [16, 128], strides = [1, 1]} : vector<16x256xbf16> to vector<16x128xbf16>
    %6 = vector.extract_strided_slice %4 {offsets = [0, 128], sizes = [16, 128], strides = [1, 1]} : vector<16x256xbf16> to vector<16x128xbf16>
    %7 = arith.maximumf %5, %6 : vector<16x128xbf16>
    %c0_6 = arith.constant 0 : index
    %c0_7 = arith.constant 0 : index
    %c0_8 = arith.constant 0 : index
    %c0_9 = arith.constant 0 : index
    %8 = vector.load %arg3[%c0_6, %c0_7, %c0_8, %c0_9] : memref<1x1x16x128xbf16, #tpu.memory_space<vmem>>, vector<1x1x16x128xbf16>
    %9 = vector.shape_cast %8 : vector<1x1x16x128xbf16> to vector<16x128xbf16>
    %10 = vector.shape_cast %7 : vector<16x128xbf16> to vector<1x1x16x128xbf16>
    tpu.vector_store %arg3[%c0_6, %c0_7, %c0_8, %c0_9], %10 {strides = array<i32>} : memref<1x1x16x128xbf16, #tpu.memory_space<vmem>>, vector<1x1x16x128xbf16>,
    return
  }
  func.func @transform_0(%arg0: i32, %arg1: i32) -> (i32, i32, i32, i32) {
    %c0_i32 = arith.constant 0 : i32
    %c0_i32_0 = arith.constant 0 : i32
    %c0_i32_1 = arith.constant 0 : i32
    return %arg0, %arg1, %c0_i32, %c0_i32_0 : i32, i32, i32, i32
  }
  func.func @transform_1(%arg0: i32, %arg1: i32) -> (i32, i32, i32, i32) {
    %c0_i32 = arith.constant 0 : i32
    %c0_i32_0 = arith.constant 0 : i32
    %c0_i32_1 = arith.constant 0 : i32
    return %arg0, %arg1, %c0_i32, %c0_i32_0 : i32, i32, i32, i32
  }
}

module attributes {stable_mosaic.version = 11 : i64} {
  func.func @_conv3x3_kernel(%arg0: i32, %arg1: i32, %arg2: memref<1x18x18x128xbf16, #tpu.memory_space<vmem>>, %arg3: memref<9x128x128xbf16, #tpu.memory_space<vmem>>, %arg4: memref<1x128xf32, #tpu.memory_space<vmem>>, %arg5: memref<1x128xf32, #tpu.memory_space<vmem>>, %arg6: memref<1x16x16x128xbf16, #tpu.memory_space<vmem>>) attributes {dimension_semantics = [#tpu.dimension_semantics<parallel>, #tpu.dimension_semantics<parallel>], iteration_bounds = array<i64: 2, 1>, scalar_prefetch = 0 : i64, scratch_operands = 0 : i64, tpu.core_type = #tpu.core_type<tc>, window_params = [{transform_indices = @transform_0, window_bounds = array<i64: 1, 18, 18, 128>}, {transform_indices = @transform_1, window_bounds = array<i64: 9, 128, 128>}, {transform_indices = @transform_2, window_bounds = array<i64: 1, 128>}, {transform_indices = @transform_3, window_bounds = array<i64: 1, 128>}, {transform_indices = @transform_4, window_bounds = array<i64: 1, 16, 16, 128>}]} {
    %c0 = arith.constant 0 : index
    %c0_0 = arith.constant 0 : index
    %0 = vector.load %arg4[%c0, %c0_0] : memref<1x128xf32, #tpu.memory_space<vmem>>, vector<1x128xf32>
    %c0_1 = arith.constant 0 : index
    %c0_2 = arith.constant 0 : index
    %1 = vector.load %arg5[%c0_1, %c0_2] : memref<1x128xf32, #tpu.memory_space<vmem>>, vector<1x128xf32>
    %c0_i32 = arith.constant 0 : i32
    %c16_i32 = arith.constant 16 : i32
    %2 = arith.addi %c0_i32, %c16_i32 : i32
    %c1_i32 = arith.constant 1 : i32
    scf.for %arg7 = %c0_i32 to %2 step %c1_i32  : i32 {
      %c0_i32_4 = arith.constant 0 : i32
      %3 = arith.addi %arg7, %c0_i32_4 : i32
      %c0_5 = arith.constant 0 : index
      %4 = arith.index_cast %3 : i32 to index
      %c0_6 = arith.constant 0 : index
      %c0_7 = arith.constant 0 : index
      %5 = vector.load %arg2[%c0_5, %4, %c0_6, %c0_7] : memref<1x18x18x128xbf16, #tpu.memory_space<vmem>>, vector<1x1x18x128xbf16>
      %6 = vector.shape_cast %5 : vector<1x1x18x128xbf16> to vector<18x128xbf16>
      %c1_i32_8 = arith.constant 1 : i32
      %7 = arith.addi %arg7, %c1_i32_8 : i32
      %c0_9 = arith.constant 0 : index
      %8 = arith.index_cast %7 : i32 to index
      %c0_10 = arith.constant 0 : index
      %c0_11 = arith.constant 0 : index
      %9 = vector.load %arg2[%c0_9, %8, %c0_10, %c0_11] : memref<1x18x18x128xbf16, #tpu.memory_space<vmem>>, vector<1x1x18x128xbf16>
      %10 = vector.shape_cast %9 : vector<1x1x18x128xbf16> to vector<18x128xbf16>
      %c2_i32 = arith.constant 2 : i32
      %11 = arith.addi %arg7, %c2_i32 : i32
      %c0_12 = arith.constant 0 : index
      %12 = arith.index_cast %11 : i32 to index
      %c0_13 = arith.constant 0 : index
      %c0_14 = arith.constant 0 : index
      %13 = vector.load %arg2[%c0_12, %12, %c0_13, %c0_14] : memref<1x18x18x128xbf16, #tpu.memory_space<vmem>>, vector<1x1x18x128xbf16>
      %14 = vector.shape_cast %13 : vector<1x1x18x128xbf16> to vector<18x128xbf16>
      %cst = arith.constant 0.000000e+00 : f32
      %15 = vector.broadcast %cst : f32 to vector<16x128xf32>
      %cst_15 = arith.constant 0.000000e+00 : f32
      %16 = vector.broadcast %cst_15 : f32 to vector<18x128xf32>
      %c0_16 = arith.constant 0 : index
      %c0_17 = arith.constant 0 : index
      %c0_18 = arith.constant 0 : index
      %17 = vector.load %arg3[%c0_16, %c0_17, %c0_18] : memref<9x128x128xbf16, #tpu.memory_space<vmem>>, vector<1x128x128xbf16>
      %18 = vector.shape_cast %17 : vector<1x128x128xbf16> to vector<128x128xbf16>
      %cst_19 = arith.constant dense<0.000000e+00> : vector<18x128xf32>
      %19 = tpu.matmul %6, %18, %cst_19 {dimension_numbers = #tpu.dot_dimension_numbers<[1], [0], [0], [1], [0, 0, 1, 1], [], []>} : vector<18x128xbf16>, vector<128x128xbf16>, vector<18x128xf32> -> vector<18x128xf32>
      %20 = arith.addf %16, %19 : vector<18x128xf32>
      %c3 = arith.constant 3 : index
      %c0_20 = arith.constant 0 : index
      %c0_21 = arith.constant 0 : index
      %21 = vector.load %arg3[%c3, %c0_20, %c0_21] : memref<9x128x128xbf16, #tpu.memory_space<vmem>>, vector<1x128x128xbf16>
      %22 = vector.shape_cast %21 : vector<1x128x128xbf16> to vector<128x128xbf16>
      %cst_22 = arith.constant dense<0.000000e+00> : vector<18x128xf32>
      %23 = tpu.matmul %10, %22, %cst_22 {dimension_numbers = #tpu.dot_dimension_numbers<[1], [0], [0], [1], [0, 0, 1, 1], [], []>} : vector<18x128xbf16>, vector<128x128xbf16>, vector<18x128xf32> -> vector<18x128xf32>
      %24 = arith.addf %20, %23 : vector<18x128xf32>
      %c6 = arith.constant 6 : index
      %c0_23 = arith.constant 0 : index
      %c0_24 = arith.constant 0 : index
      %25 = vector.load %arg3[%c6, %c0_23, %c0_24] : memref<9x128x128xbf16, #tpu.memory_space<vmem>>, vector<1x128x128xbf16>
      %26 = vector.shape_cast %25 : vector<1x128x128xbf16> to vector<128x128xbf16>
      %cst_25 = arith.constant dense<0.000000e+00> : vector<18x128xf32>
      %27 = tpu.matmul %14, %26, %cst_25 {dimension_numbers = #tpu.dot_dimension_numbers<[1], [0], [0], [1], [0, 0, 1, 1], [], []>} : vector<18x128xbf16>, vector<128x128xbf16>, vector<18x128xf32> -> vector<18x128xf32>
      %28 = arith.addf %24, %27 : vector<18x128xf32>
      %29 = vector.extract_strided_slice %28 {offsets = [0, 0], sizes = [16, 128], strides = [1, 1]} : vector<18x128xf32> to vector<16x128xf32>
      %30 = arith.addf %15, %29 : vector<16x128xf32>
      %cst_26 = arith.constant 0.000000e+00 : f32
      %31 = vector.broadcast %cst_26 : f32 to vector<18x128xf32>
      %c1 = arith.constant 1 : index
      %c0_27 = arith.constant 0 : index
      %c0_28 = arith.constant 0 : index
      %32 = vector.load %arg3[%c1, %c0_27, %c0_28] : memref<9x128x128xbf16, #tpu.memory_space<vmem>>, vector<1x128x128xbf16>
      %33 = vector.shape_cast %32 : vector<1x128x128xbf16> to vector<128x128xbf16>
      %cst_29 = arith.constant dense<0.000000e+00> : vector<18x128xf32>
      %34 = tpu.matmul %6, %33, %cst_29 {dimension_numbers = #tpu.dot_dimension_numbers<[1], [0], [0], [1], [0, 0, 1, 1], [], []>} : vector<18x128xbf16>, vector<128x128xbf16>, vector<18x128xf32> -> vector<18x128xf32>
      %35 = arith.addf %31, %34 : vector<18x128xf32>
      %c4 = arith.constant 4 : index
      %c0_30 = arith.constant 0 : index
      %c0_31 = arith.constant 0 : index
      %36 = vector.load %arg3[%c4, %c0_30, %c0_31] : memref<9x128x128xbf16, #tpu.memory_space<vmem>>, vector<1x128x128xbf16>
      %37 = vector.shape_cast %36 : vector<1x128x128xbf16> to vector<128x128xbf16>
      %cst_32 = arith.constant dense<0.000000e+00> : vector<18x128xf32>
      %38 = tpu.matmul %10, %37, %cst_32 {dimension_numbers = #tpu.dot_dimension_numbers<[1], [0], [0], [1], [0, 0, 1, 1], [], []>} : vector<18x128xbf16>, vector<128x128xbf16>, vector<18x128xf32> -> vector<18x128xf32>
      %39 = arith.addf %35, %38 : vector<18x128xf32>
      %c7 = arith.constant 7 : index
      %c0_33 = arith.constant 0 : index
      %c0_34 = arith.constant 0 : index
      %40 = vector.load %arg3[%c7, %c0_33, %c0_34] : memref<9x128x128xbf16, #tpu.memory_space<vmem>>, vector<1x128x128xbf16>
      %41 = vector.shape_cast %40 : vector<1x128x128xbf16> to vector<128x128xbf16>
      %cst_35 = arith.constant dense<0.000000e+00> : vector<18x128xf32>
      %42 = tpu.matmul %14, %41, %cst_35 {dimension_numbers = #tpu.dot_dimension_numbers<[1], [0], [0], [1], [0, 0, 1, 1], [], []>} : vector<18x128xbf16>, vector<128x128xbf16>, vector<18x128xf32> -> vector<18x128xf32>
      %43 = arith.addf %39, %42 : vector<18x128xf32>
      %44 = vector.extract_strided_slice %43 {offsets = [1, 0], sizes = [16, 128], strides = [1, 1]} : vector<18x128xf32> to vector<16x128xf32>
      %45 = arith.addf %30, %44 : vector<16x128xf32>
      %cst_36 = arith.constant 0.000000e+00 : f32
      %46 = vector.broadcast %cst_36 : f32 to vector<18x128xf32>
      %c2 = arith.constant 2 : index
      %c0_37 = arith.constant 0 : index
      %c0_38 = arith.constant 0 : index
      %47 = vector.load %arg3[%c2, %c0_37, %c0_38] : memref<9x128x128xbf16, #tpu.memory_space<vmem>>, vector<1x128x128xbf16>
      %48 = vector.shape_cast %47 : vector<1x128x128xbf16> to vector<128x128xbf16>
      %cst_39 = arith.constant dense<0.000000e+00> : vector<18x128xf32>
      %49 = tpu.matmul %6, %48, %cst_39 {dimension_numbers = #tpu.dot_dimension_numbers<[1], [0], [0], [1], [0, 0, 1, 1], [], []>} : vector<18x128xbf16>, vector<128x128xbf16>, vector<18x128xf32> -> vector<18x128xf32>
      %50 = arith.addf %46, %49 : vector<18x128xf32>
      %c5 = arith.constant 5 : index
      %c0_40 = arith.constant 0 : index
      %c0_41 = arith.constant 0 : index
      %51 = vector.load %arg3[%c5, %c0_40, %c0_41] : memref<9x128x128xbf16, #tpu.memory_space<vmem>>, vector<1x128x128xbf16>
      %52 = vector.shape_cast %51 : vector<1x128x128xbf16> to vector<128x128xbf16>
      %cst_42 = arith.constant dense<0.000000e+00> : vector<18x128xf32>
      %53 = tpu.matmul %10, %52, %cst_42 {dimension_numbers = #tpu.dot_dimension_numbers<[1], [0], [0], [1], [0, 0, 1, 1], [], []>} : vector<18x128xbf16>, vector<128x128xbf16>, vector<18x128xf32> -> vector<18x128xf32>
      %54 = arith.addf %50, %53 : vector<18x128xf32>
      %c8 = arith.constant 8 : index
      %c0_43 = arith.constant 0 : index
      %c0_44 = arith.constant 0 : index
      %55 = vector.load %arg3[%c8, %c0_43, %c0_44] : memref<9x128x128xbf16, #tpu.memory_space<vmem>>, vector<1x128x128xbf16>
      %56 = vector.shape_cast %55 : vector<1x128x128xbf16> to vector<128x128xbf16>
      %cst_45 = arith.constant dense<0.000000e+00> : vector<18x128xf32>
      %57 = tpu.matmul %14, %56, %cst_45 {dimension_numbers = #tpu.dot_dimension_numbers<[1], [0], [0], [1], [0, 0, 1, 1], [], []>} : vector<18x128xbf16>, vector<128x128xbf16>, vector<18x128xf32> -> vector<18x128xf32>
      %58 = arith.addf %54, %57 : vector<18x128xf32>
      %59 = vector.extract_strided_slice %58 {offsets = [2, 0], sizes = [16, 128], strides = [1, 1]} : vector<18x128xf32> to vector<16x128xf32>
      %60 = arith.addf %45, %59 : vector<16x128xf32>
      %61 = vector.broadcast %0 : vector<1x128xf32> to vector<16x128xf32>
      %62 = arith.mulf %60, %61 : vector<16x128xf32>
      %63 = vector.broadcast %1 : vector<1x128xf32> to vector<16x128xf32>
      %64 = arith.addf %62, %63 : vector<16x128xf32>
      %cst_46 = arith.constant 0.000000e+00 : f32
      %65 = vector.broadcast %cst_46 : f32 to vector<16x128xf32>
      %66 = arith.maximumf %64, %65 : vector<16x128xf32>
      %67 = arith.truncf %66 : vector<16x128xf32> to vector<16x128xbf16>
      %c0_47 = arith.constant 0 : index
      %68 = arith.index_cast %arg7 : i32 to index
      %c0_48 = arith.constant 0 : index
      %c0_49 = arith.constant 0 : index
      %69 = vector.load %arg6[%c0_47, %68, %c0_48, %c0_49] : memref<1x16x16x128xbf16, #tpu.memory_space<vmem>>, vector<1x1x16x128xbf16>
      %70 = vector.shape_cast %69 : vector<1x1x16x128xbf16> to vector<16x128xbf16>
      %71 = vector.shape_cast %67 : vector<16x128xbf16> to vector<1x1x16x128xbf16>
      tpu.vector_store %arg6[%c0_47, %68, %c0_48, %c0_49], %71 {strides = array<i32>} : memref<1x16x16x128xbf16, #tpu.memory_space<vmem>>, vector<1x1x16x128xbf16>,
    }
    %c16_i32_3 = arith.constant 16 : i32
    return
  }
  func.func @transform_0(%arg0: i32, %arg1: i32) -> (i32, i32, i32, i32) {
    %c0_i32 = arith.constant 0 : i32
    %c0_i32_0 = arith.constant 0 : i32
    %c0_i32_1 = arith.constant 0 : i32
    %c0_i32_2 = arith.constant 0 : i32
    return %arg0, %c0_i32, %c0_i32_0, %c0_i32_1 : i32, i32, i32, i32
  }
  func.func @transform_1(%arg0: i32, %arg1: i32) -> (i32, i32, i32) {
    %c0_i32 = arith.constant 0 : i32
    %c0_i32_0 = arith.constant 0 : i32
    %c0_i32_1 = arith.constant 0 : i32
    return %c0_i32, %c0_i32_0, %arg1 : i32, i32, i32
  }
  func.func @transform_2(%arg0: i32, %arg1: i32) -> (i32, i32) {
    %c0_i32 = arith.constant 0 : i32
    %c0_i32_0 = arith.constant 0 : i32
    return %c0_i32, %arg1 : i32, i32
  }
  func.func @transform_3(%arg0: i32, %arg1: i32) -> (i32, i32) {
    %c0_i32 = arith.constant 0 : i32
    %c0_i32_0 = arith.constant 0 : i32
    return %c0_i32, %arg1 : i32, i32
  }
  func.func @transform_4(%arg0: i32, %arg1: i32) -> (i32, i32, i32, i32) {
    %c0_i32 = arith.constant 0 : i32
    %c0_i32_0 = arith.constant 0 : i32
    %c0_i32_1 = arith.constant 0 : i32
    return %arg0, %c0_i32, %c0_i32_0, %arg1 : i32, i32, i32, i32
  }
}

module attributes {stable_mosaic.version = 11 : i64} {
  func.func @_maxpool_kernel(%arg0: i32, %arg1: i32, %arg2: memref<1x2x8x256xbf16, #tpu.memory_space<vmem>>, %arg3: memref<1x1x8x128xbf16, #tpu.memory_space<vmem>>) attributes {dimension_semantics = [#tpu.dimension_semantics<parallel>, #tpu.dimension_semantics<parallel>], iteration_bounds = array<i64: 2, 8>, scalar_prefetch = 0 : i64, scratch_operands = 0 : i64, tpu.core_type = #tpu.core_type<tc>, window_params = [{transform_indices = @transform_0, window_bounds = array<i64: 1, 2, 8, 256>}, {transform_indices = @transform_1, window_bounds = array<i64: 1, 1, 8, 128>}]} {
    %c0 = arith.constant 0 : index
    %c0_0 = arith.constant 0 : index
    %c0_1 = arith.constant 0 : index
    %c0_2 = arith.constant 0 : index
    %0 = vector.load %arg2[%c0, %c0_0, %c0_1, %c0_2] : memref<1x2x8x256xbf16, #tpu.memory_space<vmem>>, vector<1x1x8x256xbf16>
    %1 = vector.shape_cast %0 : vector<1x1x8x256xbf16> to vector<8x256xbf16>
    %c0_3 = arith.constant 0 : index
    %c1 = arith.constant 1 : index
    %c0_4 = arith.constant 0 : index
    %c0_5 = arith.constant 0 : index
    %2 = vector.load %arg2[%c0_3, %c1, %c0_4, %c0_5] : memref<1x2x8x256xbf16, #tpu.memory_space<vmem>>, vector<1x1x8x256xbf16>
    %3 = vector.shape_cast %2 : vector<1x1x8x256xbf16> to vector<8x256xbf16>
    %4 = arith.maximumf %1, %3 : vector<8x256xbf16>
    %5 = vector.extract_strided_slice %4 {offsets = [0, 0], sizes = [8, 128], strides = [1, 1]} : vector<8x256xbf16> to vector<8x128xbf16>
    %6 = vector.extract_strided_slice %4 {offsets = [0, 128], sizes = [8, 128], strides = [1, 1]} : vector<8x256xbf16> to vector<8x128xbf16>
    %7 = arith.maximumf %5, %6 : vector<8x128xbf16>
    %c0_6 = arith.constant 0 : index
    %c0_7 = arith.constant 0 : index
    %c0_8 = arith.constant 0 : index
    %c0_9 = arith.constant 0 : index
    %8 = vector.load %arg3[%c0_6, %c0_7, %c0_8, %c0_9] : memref<1x1x8x128xbf16, #tpu.memory_space<vmem>>, vector<1x1x8x128xbf16>
    %9 = vector.shape_cast %8 : vector<1x1x8x128xbf16> to vector<8x128xbf16>
    %10 = vector.shape_cast %7 : vector<8x128xbf16> to vector<1x1x8x128xbf16>
    tpu.vector_store %arg3[%c0_6, %c0_7, %c0_8, %c0_9], %10 {strides = array<i32>} : memref<1x1x8x128xbf16, #tpu.memory_space<vmem>>, vector<1x1x8x128xbf16>,
    return
  }
  func.func @transform_0(%arg0: i32, %arg1: i32) -> (i32, i32, i32, i32) {
    %c0_i32 = arith.constant 0 : i32
    %c0_i32_0 = arith.constant 0 : i32
    %c0_i32_1 = arith.constant 0 : i32
    return %arg0, %arg1, %c0_i32, %c0_i32_0 : i32, i32, i32, i32
  }
  func.func @transform_1(%arg0: i32, %arg1: i32) -> (i32, i32, i32, i32) {
    %c0_i32 = arith.constant 0 : i32
    %c0_i32_0 = arith.constant 0 : i32
    %c0_i32_1 = arith.constant 0 : i32
    return %arg0, %arg1, %c0_i32, %c0_i32_0 : i32, i32, i32, i32
  }
}

module attributes {stable_mosaic.version = 11 : i64} {
  func.func @_conv3x3_kernel(%arg0: i32, %arg1: i32, %arg2: memref<1x10x10x128xbf16, #tpu.memory_space<vmem>>, %arg3: memref<9x128x128xbf16, #tpu.memory_space<vmem>>, %arg4: memref<1x128xf32, #tpu.memory_space<vmem>>, %arg5: memref<1x128xf32, #tpu.memory_space<vmem>>, %arg6: memref<1x8x8x128xbf16, #tpu.memory_space<vmem>>) attributes {dimension_semantics = [#tpu.dimension_semantics<parallel>, #tpu.dimension_semantics<parallel>], iteration_bounds = array<i64: 2, 1>, scalar_prefetch = 0 : i64, scratch_operands = 0 : i64, tpu.core_type = #tpu.core_type<tc>, window_params = [{transform_indices = @transform_0, window_bounds = array<i64: 1, 10, 10, 128>}, {transform_indices = @transform_1, window_bounds = array<i64: 9, 128, 128>}, {transform_indices = @transform_2, window_bounds = array<i64: 1, 128>}, {transform_indices = @transform_3, window_bounds = array<i64: 1, 128>}, {transform_indices = @transform_4, window_bounds = array<i64: 1, 8, 8, 128>}]} {
    %c0 = arith.constant 0 : index
    %c0_0 = arith.constant 0 : index
    %0 = vector.load %arg4[%c0, %c0_0] : memref<1x128xf32, #tpu.memory_space<vmem>>, vector<1x128xf32>
    %c0_1 = arith.constant 0 : index
    %c0_2 = arith.constant 0 : index
    %1 = vector.load %arg5[%c0_1, %c0_2] : memref<1x128xf32, #tpu.memory_space<vmem>>, vector<1x128xf32>
    %c0_i32 = arith.constant 0 : i32
    %c8_i32 = arith.constant 8 : i32
    %2 = arith.addi %c0_i32, %c8_i32 : i32
    %c1_i32 = arith.constant 1 : i32
    scf.for %arg7 = %c0_i32 to %2 step %c1_i32  : i32 {
      %c0_i32_4 = arith.constant 0 : i32
      %3 = arith.addi %arg7, %c0_i32_4 : i32
      %c0_5 = arith.constant 0 : index
      %4 = arith.index_cast %3 : i32 to index
      %c0_6 = arith.constant 0 : index
      %c0_7 = arith.constant 0 : index
      %5 = vector.load %arg2[%c0_5, %4, %c0_6, %c0_7] : memref<1x10x10x128xbf16, #tpu.memory_space<vmem>>, vector<1x1x10x128xbf16>
      %6 = vector.shape_cast %5 : vector<1x1x10x128xbf16> to vector<10x128xbf16>
      %c1_i32_8 = arith.constant 1 : i32
      %7 = arith.addi %arg7, %c1_i32_8 : i32
      %c0_9 = arith.constant 0 : index
      %8 = arith.index_cast %7 : i32 to index
      %c0_10 = arith.constant 0 : index
      %c0_11 = arith.constant 0 : index
      %9 = vector.load %arg2[%c0_9, %8, %c0_10, %c0_11] : memref<1x10x10x128xbf16, #tpu.memory_space<vmem>>, vector<1x1x10x128xbf16>
      %10 = vector.shape_cast %9 : vector<1x1x10x128xbf16> to vector<10x128xbf16>
      %c2_i32 = arith.constant 2 : i32
      %11 = arith.addi %arg7, %c2_i32 : i32
      %c0_12 = arith.constant 0 : index
      %12 = arith.index_cast %11 : i32 to index
      %c0_13 = arith.constant 0 : index
      %c0_14 = arith.constant 0 : index
      %13 = vector.load %arg2[%c0_12, %12, %c0_13, %c0_14] : memref<1x10x10x128xbf16, #tpu.memory_space<vmem>>, vector<1x1x10x128xbf16>
      %14 = vector.shape_cast %13 : vector<1x1x10x128xbf16> to vector<10x128xbf16>
      %cst = arith.constant 0.000000e+00 : f32
      %15 = vector.broadcast %cst : f32 to vector<8x128xf32>
      %cst_15 = arith.constant 0.000000e+00 : f32
      %16 = vector.broadcast %cst_15 : f32 to vector<10x128xf32>
      %c0_16 = arith.constant 0 : index
      %c0_17 = arith.constant 0 : index
      %c0_18 = arith.constant 0 : index
      %17 = vector.load %arg3[%c0_16, %c0_17, %c0_18] : memref<9x128x128xbf16, #tpu.memory_space<vmem>>, vector<1x128x128xbf16>
      %18 = vector.shape_cast %17 : vector<1x128x128xbf16> to vector<128x128xbf16>
      %cst_19 = arith.constant dense<0.000000e+00> : vector<10x128xf32>
      %19 = tpu.matmul %6, %18, %cst_19 {dimension_numbers = #tpu.dot_dimension_numbers<[1], [0], [0], [1], [0, 0, 1, 1], [], []>} : vector<10x128xbf16>, vector<128x128xbf16>, vector<10x128xf32> -> vector<10x128xf32>
      %20 = arith.addf %16, %19 : vector<10x128xf32>
      %c3 = arith.constant 3 : index
      %c0_20 = arith.constant 0 : index
      %c0_21 = arith.constant 0 : index
      %21 = vector.load %arg3[%c3, %c0_20, %c0_21] : memref<9x128x128xbf16, #tpu.memory_space<vmem>>, vector<1x128x128xbf16>
      %22 = vector.shape_cast %21 : vector<1x128x128xbf16> to vector<128x128xbf16>
      %cst_22 = arith.constant dense<0.000000e+00> : vector<10x128xf32>
      %23 = tpu.matmul %10, %22, %cst_22 {dimension_numbers = #tpu.dot_dimension_numbers<[1], [0], [0], [1], [0, 0, 1, 1], [], []>} : vector<10x128xbf16>, vector<128x128xbf16>, vector<10x128xf32> -> vector<10x128xf32>
      %24 = arith.addf %20, %23 : vector<10x128xf32>
      %c6 = arith.constant 6 : index
      %c0_23 = arith.constant 0 : index
      %c0_24 = arith.constant 0 : index
      %25 = vector.load %arg3[%c6, %c0_23, %c0_24] : memref<9x128x128xbf16, #tpu.memory_space<vmem>>, vector<1x128x128xbf16>
      %26 = vector.shape_cast %25 : vector<1x128x128xbf16> to vector<128x128xbf16>
      %cst_25 = arith.constant dense<0.000000e+00> : vector<10x128xf32>
      %27 = tpu.matmul %14, %26, %cst_25 {dimension_numbers = #tpu.dot_dimension_numbers<[1], [0], [0], [1], [0, 0, 1, 1], [], []>} : vector<10x128xbf16>, vector<128x128xbf16>, vector<10x128xf32> -> vector<10x128xf32>
      %28 = arith.addf %24, %27 : vector<10x128xf32>
      %29 = vector.extract_strided_slice %28 {offsets = [0, 0], sizes = [8, 128], strides = [1, 1]} : vector<10x128xf32> to vector<8x128xf32>
      %30 = arith.addf %15, %29 : vector<8x128xf32>
      %cst_26 = arith.constant 0.000000e+00 : f32
      %31 = vector.broadcast %cst_26 : f32 to vector<10x128xf32>
      %c1 = arith.constant 1 : index
      %c0_27 = arith.constant 0 : index
      %c0_28 = arith.constant 0 : index
      %32 = vector.load %arg3[%c1, %c0_27, %c0_28] : memref<9x128x128xbf16, #tpu.memory_space<vmem>>, vector<1x128x128xbf16>
      %33 = vector.shape_cast %32 : vector<1x128x128xbf16> to vector<128x128xbf16>
      %cst_29 = arith.constant dense<0.000000e+00> : vector<10x128xf32>
      %34 = tpu.matmul %6, %33, %cst_29 {dimension_numbers = #tpu.dot_dimension_numbers<[1], [0], [0], [1], [0, 0, 1, 1], [], []>} : vector<10x128xbf16>, vector<128x128xbf16>, vector<10x128xf32> -> vector<10x128xf32>
      %35 = arith.addf %31, %34 : vector<10x128xf32>
      %c4 = arith.constant 4 : index
      %c0_30 = arith.constant 0 : index
      %c0_31 = arith.constant 0 : index
      %36 = vector.load %arg3[%c4, %c0_30, %c0_31] : memref<9x128x128xbf16, #tpu.memory_space<vmem>>, vector<1x128x128xbf16>
      %37 = vector.shape_cast %36 : vector<1x128x128xbf16> to vector<128x128xbf16>
      %cst_32 = arith.constant dense<0.000000e+00> : vector<10x128xf32>
      %38 = tpu.matmul %10, %37, %cst_32 {dimension_numbers = #tpu.dot_dimension_numbers<[1], [0], [0], [1], [0, 0, 1, 1], [], []>} : vector<10x128xbf16>, vector<128x128xbf16>, vector<10x128xf32> -> vector<10x128xf32>
      %39 = arith.addf %35, %38 : vector<10x128xf32>
      %c7 = arith.constant 7 : index
      %c0_33 = arith.constant 0 : index
      %c0_34 = arith.constant 0 : index
      %40 = vector.load %arg3[%c7, %c0_33, %c0_34] : memref<9x128x128xbf16, #tpu.memory_space<vmem>>, vector<1x128x128xbf16>
      %41 = vector.shape_cast %40 : vector<1x128x128xbf16> to vector<128x128xbf16>
      %cst_35 = arith.constant dense<0.000000e+00> : vector<10x128xf32>
      %42 = tpu.matmul %14, %41, %cst_35 {dimension_numbers = #tpu.dot_dimension_numbers<[1], [0], [0], [1], [0, 0, 1, 1], [], []>} : vector<10x128xbf16>, vector<128x128xbf16>, vector<10x128xf32> -> vector<10x128xf32>
      %43 = arith.addf %39, %42 : vector<10x128xf32>
      %44 = vector.extract_strided_slice %43 {offsets = [1, 0], sizes = [8, 128], strides = [1, 1]} : vector<10x128xf32> to vector<8x128xf32>
      %45 = arith.addf %30, %44 : vector<8x128xf32>
      %cst_36 = arith.constant 0.000000e+00 : f32
      %46 = vector.broadcast %cst_36 : f32 to vector<10x128xf32>
      %c2 = arith.constant 2 : index
      %c0_37 = arith.constant 0 : index
      %c0_38 = arith.constant 0 : index
      %47 = vector.load %arg3[%c2, %c0_37, %c0_38] : memref<9x128x128xbf16, #tpu.memory_space<vmem>>, vector<1x128x128xbf16>
      %48 = vector.shape_cast %47 : vector<1x128x128xbf16> to vector<128x128xbf16>
      %cst_39 = arith.constant dense<0.000000e+00> : vector<10x128xf32>
      %49 = tpu.matmul %6, %48, %cst_39 {dimension_numbers = #tpu.dot_dimension_numbers<[1], [0], [0], [1], [0, 0, 1, 1], [], []>} : vector<10x128xbf16>, vector<128x128xbf16>, vector<10x128xf32> -> vector<10x128xf32>
      %50 = arith.addf %46, %49 : vector<10x128xf32>
      %c5 = arith.constant 5 : index
      %c0_40 = arith.constant 0 : index
      %c0_41 = arith.constant 0 : index
      %51 = vector.load %arg3[%c5, %c0_40, %c0_41] : memref<9x128x128xbf16, #tpu.memory_space<vmem>>, vector<1x128x128xbf16>
      %52 = vector.shape_cast %51 : vector<1x128x128xbf16> to vector<128x128xbf16>
      %cst_42 = arith.constant dense<0.000000e+00> : vector<10x128xf32>
      %53 = tpu.matmul %10, %52, %cst_42 {dimension_numbers = #tpu.dot_dimension_numbers<[1], [0], [0], [1], [0, 0, 1, 1], [], []>} : vector<10x128xbf16>, vector<128x128xbf16>, vector<10x128xf32> -> vector<10x128xf32>
      %54 = arith.addf %50, %53 : vector<10x128xf32>
      %c8 = arith.constant 8 : index
      %c0_43 = arith.constant 0 : index
      %c0_44 = arith.constant 0 : index
      %55 = vector.load %arg3[%c8, %c0_43, %c0_44] : memref<9x128x128xbf16, #tpu.memory_space<vmem>>, vector<1x128x128xbf16>
      %56 = vector.shape_cast %55 : vector<1x128x128xbf16> to vector<128x128xbf16>
      %cst_45 = arith.constant dense<0.000000e+00> : vector<10x128xf32>
      %57 = tpu.matmul %14, %56, %cst_45 {dimension_numbers = #tpu.dot_dimension_numbers<[1], [0], [0], [1], [0, 0, 1, 1], [], []>} : vector<10x128xbf16>, vector<128x128xbf16>, vector<10x128xf32> -> vector<10x128xf32>
      %58 = arith.addf %54, %57 : vector<10x128xf32>
      %59 = vector.extract_strided_slice %58 {offsets = [2, 0], sizes = [8, 128], strides = [1, 1]} : vector<10x128xf32> to vector<8x128xf32>
      %60 = arith.addf %45, %59 : vector<8x128xf32>
      %61 = vector.broadcast %0 : vector<1x128xf32> to vector<8x128xf32>
      %62 = arith.mulf %60, %61 : vector<8x128xf32>
      %63 = vector.broadcast %1 : vector<1x128xf32> to vector<8x128xf32>
      %64 = arith.addf %62, %63 : vector<8x128xf32>
      %cst_46 = arith.constant 0.000000e+00 : f32
      %65 = vector.broadcast %cst_46 : f32 to vector<8x128xf32>
      %66 = arith.maximumf %64, %65 : vector<8x128xf32>
      %67 = arith.truncf %66 : vector<8x128xf32> to vector<8x128xbf16>
      %c0_47 = arith.constant 0 : index
      %68 = arith.index_cast %arg7 : i32 to index
      %c0_48 = arith.constant 0 : index
      %c0_49 = arith.constant 0 : index
      %69 = vector.load %arg6[%c0_47, %68, %c0_48, %c0_49] : memref<1x8x8x128xbf16, #tpu.memory_space<vmem>>, vector<1x1x8x128xbf16>
      %70 = vector.shape_cast %69 : vector<1x1x8x128xbf16> to vector<8x128xbf16>
      %71 = vector.shape_cast %67 : vector<8x128xbf16> to vector<1x1x8x128xbf16>
      tpu.vector_store %arg6[%c0_47, %68, %c0_48, %c0_49], %71 {strides = array<i32>} : memref<1x8x8x128xbf16, #tpu.memory_space<vmem>>, vector<1x1x8x128xbf16>,
    }
    %c8_i32_3 = arith.constant 8 : i32
    return
  }
  func.func @transform_0(%arg0: i32, %arg1: i32) -> (i32, i32, i32, i32) {
    %c0_i32 = arith.constant 0 : i32
    %c0_i32_0 = arith.constant 0 : i32
    %c0_i32_1 = arith.constant 0 : i32
    %c0_i32_2 = arith.constant 0 : i32
    return %arg0, %c0_i32, %c0_i32_0, %c0_i32_1 : i32, i32, i32, i32
  }
  func.func @transform_1(%arg0: i32, %arg1: i32) -> (i32, i32, i32) {
    %c0_i32 = arith.constant 0 : i32
    %c0_i32_0 = arith.constant 0 : i32
    %c0_i32_1 = arith.constant 0 : i32
    return %c0_i32, %c0_i32_0, %arg1 : i32, i32, i32
  }
  func.func @transform_2(%arg0: i32, %arg1: i32) -> (i32, i32) {
    %c0_i32 = arith.constant 0 : i32
    %c0_i32_0 = arith.constant 0 : i32
    return %c0_i32, %arg1 : i32, i32
  }
  func.func @transform_3(%arg0: i32, %arg1: i32) -> (i32, i32) {
    %c0_i32 = arith.constant 0 : i32
    %c0_i32_0 = arith.constant 0 : i32
    return %c0_i32, %arg1 : i32, i32
  }
  func.func @transform_4(%arg0: i32, %arg1: i32) -> (i32, i32, i32, i32) {
    %c0_i32 = arith.constant 0 : i32
    %c0_i32_0 = arith.constant 0 : i32
    %c0_i32_1 = arith.constant 0 : i32
    return %arg0, %c0_i32, %c0_i32_0, %arg1 : i32, i32, i32, i32
  }
}

module attributes {stable_mosaic.version = 11 : i64} {
  func.func @_maxpool_kernel(%arg0: i32, %arg1: i32, %arg2: memref<1x2x4x256xbf16, #tpu.memory_space<vmem>>, %arg3: memref<1x1x4x128xbf16, #tpu.memory_space<vmem>>) attributes {dimension_semantics = [#tpu.dimension_semantics<parallel>, #tpu.dimension_semantics<parallel>], iteration_bounds = array<i64: 2, 4>, scalar_prefetch = 0 : i64, scratch_operands = 0 : i64, tpu.core_type = #tpu.core_type<tc>, window_params = [{transform_indices = @transform_0, window_bounds = array<i64: 1, 2, 4, 256>}, {transform_indices = @transform_1, window_bounds = array<i64: 1, 1, 4, 128>}]} {
    %c0 = arith.constant 0 : index
    %c0_0 = arith.constant 0 : index
    %c0_1 = arith.constant 0 : index
    %c0_2 = arith.constant 0 : index
    %0 = vector.load %arg2[%c0, %c0_0, %c0_1, %c0_2] : memref<1x2x4x256xbf16, #tpu.memory_space<vmem>>, vector<1x1x4x256xbf16>
    %1 = vector.shape_cast %0 : vector<1x1x4x256xbf16> to vector<4x256xbf16>
    %c0_3 = arith.constant 0 : index
    %c1 = arith.constant 1 : index
    %c0_4 = arith.constant 0 : index
    %c0_5 = arith.constant 0 : index
    %2 = vector.load %arg2[%c0_3, %c1, %c0_4, %c0_5] : memref<1x2x4x256xbf16, #tpu.memory_space<vmem>>, vector<1x1x4x256xbf16>
    %3 = vector.shape_cast %2 : vector<1x1x4x256xbf16> to vector<4x256xbf16>
    %4 = arith.maximumf %1, %3 : vector<4x256xbf16>
    %5 = vector.extract_strided_slice %4 {offsets = [0, 0], sizes = [4, 128], strides = [1, 1]} : vector<4x256xbf16> to vector<4x128xbf16>
    %6 = vector.extract_strided_slice %4 {offsets = [0, 128], sizes = [4, 128], strides = [1, 1]} : vector<4x256xbf16> to vector<4x128xbf16>
    %7 = arith.maximumf %5, %6 : vector<4x128xbf16>
    %c0_6 = arith.constant 0 : index
    %c0_7 = arith.constant 0 : index
    %c0_8 = arith.constant 0 : index
    %c0_9 = arith.constant 0 : index
    %8 = vector.load %arg3[%c0_6, %c0_7, %c0_8, %c0_9] : memref<1x1x4x128xbf16, #tpu.memory_space<vmem>>, vector<1x1x4x128xbf16>
    %9 = vector.shape_cast %8 : vector<1x1x4x128xbf16> to vector<4x128xbf16>
    %10 = vector.shape_cast %7 : vector<4x128xbf16> to vector<1x1x4x128xbf16>
    tpu.vector_store %arg3[%c0_6, %c0_7, %c0_8, %c0_9], %10 {strides = array<i32>} : memref<1x1x4x128xbf16, #tpu.memory_space<vmem>>, vector<1x1x4x128xbf16>,
    return
  }
  func.func @transform_0(%arg0: i32, %arg1: i32) -> (i32, i32, i32, i32) {
    %c0_i32 = arith.constant 0 : i32
    %c0_i32_0 = arith.constant 0 : i32
    %c0_i32_1 = arith.constant 0 : i32
    return %arg0, %arg1, %c0_i32, %c0_i32_0 : i32, i32, i32, i32
  }
  func.func @transform_1(%arg0: i32, %arg1: i32) -> (i32, i32, i32, i32) {
    %c0_i32 = arith.constant 0 : i32
    %c0_i32_0 = arith.constant 0 : i32
    %c0_i32_1 = arith.constant 0 : i32
    return %arg0, %arg1, %c0_i32, %c0_i32_0 : i32, i32, i32, i32
  }
}

module attributes {stable_mosaic.version = 11 : i64} {
  func.func @_conv3x3_kernel(%arg0: i32, %arg1: i32, %arg2: memref<1x6x6x128xbf16, #tpu.memory_space<vmem>>, %arg3: memref<9x128x128xbf16, #tpu.memory_space<vmem>>, %arg4: memref<1x128xf32, #tpu.memory_space<vmem>>, %arg5: memref<1x128xf32, #tpu.memory_space<vmem>>, %arg6: memref<1x4x4x128xbf16, #tpu.memory_space<vmem>>) attributes {dimension_semantics = [#tpu.dimension_semantics<parallel>, #tpu.dimension_semantics<parallel>], iteration_bounds = array<i64: 2, 1>, scalar_prefetch = 0 : i64, scratch_operands = 0 : i64, tpu.core_type = #tpu.core_type<tc>, window_params = [{transform_indices = @transform_0, window_bounds = array<i64: 1, 6, 6, 128>}, {transform_indices = @transform_1, window_bounds = array<i64: 9, 128, 128>}, {transform_indices = @transform_2, window_bounds = array<i64: 1, 128>}, {transform_indices = @transform_3, window_bounds = array<i64: 1, 128>}, {transform_indices = @transform_4, window_bounds = array<i64: 1, 4, 4, 128>}]} {
    %c0 = arith.constant 0 : index
    %c0_0 = arith.constant 0 : index
    %0 = vector.load %arg4[%c0, %c0_0] : memref<1x128xf32, #tpu.memory_space<vmem>>, vector<1x128xf32>
    %c0_1 = arith.constant 0 : index
    %c0_2 = arith.constant 0 : index
    %1 = vector.load %arg5[%c0_1, %c0_2] : memref<1x128xf32, #tpu.memory_space<vmem>>, vector<1x128xf32>
    %c0_i32 = arith.constant 0 : i32
    %c4_i32 = arith.constant 4 : i32
    %2 = arith.addi %c0_i32, %c4_i32 : i32
    %c1_i32 = arith.constant 1 : i32
    scf.for %arg7 = %c0_i32 to %2 step %c1_i32  : i32 {
      %c0_i32_4 = arith.constant 0 : i32
      %3 = arith.addi %arg7, %c0_i32_4 : i32
      %c0_5 = arith.constant 0 : index
      %4 = arith.index_cast %3 : i32 to index
      %c0_6 = arith.constant 0 : index
      %c0_7 = arith.constant 0 : index
      %5 = vector.load %arg2[%c0_5, %4, %c0_6, %c0_7] : memref<1x6x6x128xbf16, #tpu.memory_space<vmem>>, vector<1x1x6x128xbf16>
      %6 = vector.shape_cast %5 : vector<1x1x6x128xbf16> to vector<6x128xbf16>
      %c1_i32_8 = arith.constant 1 : i32
      %7 = arith.addi %arg7, %c1_i32_8 : i32
      %c0_9 = arith.constant 0 : index
      %8 = arith.index_cast %7 : i32 to index
      %c0_10 = arith.constant 0 : index
      %c0_11 = arith.constant 0 : index
      %9 = vector.load %arg2[%c0_9, %8, %c0_10, %c0_11] : memref<1x6x6x128xbf16, #tpu.memory_space<vmem>>, vector<1x1x6x128xbf16>
      %10 = vector.shape_cast %9 : vector<1x1x6x128xbf16> to vector<6x128xbf16>
      %c2_i32 = arith.constant 2 : i32
      %11 = arith.addi %arg7, %c2_i32 : i32
      %c0_12 = arith.constant 0 : index
      %12 = arith.index_cast %11 : i32 to index
      %c0_13 = arith.constant 0 : index
      %c0_14 = arith.constant 0 : index
      %13 = vector.load %arg2[%c0_12, %12, %c0_13, %c0_14] : memref<1x6x6x128xbf16, #tpu.memory_space<vmem>>, vector<1x1x6x128xbf16>
      %14 = vector.shape_cast %13 : vector<1x1x6x128xbf16> to vector<6x128xbf16>
      %cst = arith.constant 0.000000e+00 : f32
      %15 = vector.broadcast %cst : f32 to vector<4x128xf32>
      %cst_15 = arith.constant 0.000000e+00 : f32
      %16 = vector.broadcast %cst_15 : f32 to vector<6x128xf32>
      %c0_16 = arith.constant 0 : index
      %c0_17 = arith.constant 0 : index
      %c0_18 = arith.constant 0 : index
      %17 = vector.load %arg3[%c0_16, %c0_17, %c0_18] : memref<9x128x128xbf16, #tpu.memory_space<vmem>>, vector<1x128x128xbf16>
      %18 = vector.shape_cast %17 : vector<1x128x128xbf16> to vector<128x128xbf16>
      %cst_19 = arith.constant dense<0.000000e+00> : vector<6x128xf32>
      %19 = tpu.matmul %6, %18, %cst_19 {dimension_numbers = #tpu.dot_dimension_numbers<[1], [0], [0], [1], [0, 0, 1, 1], [], []>} : vector<6x128xbf16>, vector<128x128xbf16>, vector<6x128xf32> -> vector<6x128xf32>
      %20 = arith.addf %16, %19 : vector<6x128xf32>
      %c3 = arith.constant 3 : index
      %c0_20 = arith.constant 0 : index
      %c0_21 = arith.constant 0 : index
      %21 = vector.load %arg3[%c3, %c0_20, %c0_21] : memref<9x128x128xbf16, #tpu.memory_space<vmem>>, vector<1x128x128xbf16>
      %22 = vector.shape_cast %21 : vector<1x128x128xbf16> to vector<128x128xbf16>
      %cst_22 = arith.constant dense<0.000000e+00> : vector<6x128xf32>
      %23 = tpu.matmul %10, %22, %cst_22 {dimension_numbers = #tpu.dot_dimension_numbers<[1], [0], [0], [1], [0, 0, 1, 1], [], []>} : vector<6x128xbf16>, vector<128x128xbf16>, vector<6x128xf32> -> vector<6x128xf32>
      %24 = arith.addf %20, %23 : vector<6x128xf32>
      %c6 = arith.constant 6 : index
      %c0_23 = arith.constant 0 : index
      %c0_24 = arith.constant 0 : index
      %25 = vector.load %arg3[%c6, %c0_23, %c0_24] : memref<9x128x128xbf16, #tpu.memory_space<vmem>>, vector<1x128x128xbf16>
      %26 = vector.shape_cast %25 : vector<1x128x128xbf16> to vector<128x128xbf16>
      %cst_25 = arith.constant dense<0.000000e+00> : vector<6x128xf32>
      %27 = tpu.matmul %14, %26, %cst_25 {dimension_numbers = #tpu.dot_dimension_numbers<[1], [0], [0], [1], [0, 0, 1, 1], [], []>} : vector<6x128xbf16>, vector<128x128xbf16>, vector<6x128xf32> -> vector<6x128xf32>
      %28 = arith.addf %24, %27 : vector<6x128xf32>
      %29 = vector.extract_strided_slice %28 {offsets = [0, 0], sizes = [4, 128], strides = [1, 1]} : vector<6x128xf32> to vector<4x128xf32>
      %30 = arith.addf %15, %29 : vector<4x128xf32>
      %cst_26 = arith.constant 0.000000e+00 : f32
      %31 = vector.broadcast %cst_26 : f32 to vector<6x128xf32>
      %c1 = arith.constant 1 : index
      %c0_27 = arith.constant 0 : index
      %c0_28 = arith.constant 0 : index
      %32 = vector.load %arg3[%c1, %c0_27, %c0_28] : memref<9x128x128xbf16, #tpu.memory_space<vmem>>, vector<1x128x128xbf16>
      %33 = vector.shape_cast %32 : vector<1x128x128xbf16> to vector<128x128xbf16>
      %cst_29 = arith.constant dense<0.000000e+00> : vector<6x128xf32>
      %34 = tpu.matmul %6, %33, %cst_29 {dimension_numbers = #tpu.dot_dimension_numbers<[1], [0], [0], [1], [0, 0, 1, 1], [], []>} : vector<6x128xbf16>, vector<128x128xbf16>, vector<6x128xf32> -> vector<6x128xf32>
      %35 = arith.addf %31, %34 : vector<6x128xf32>
      %c4 = arith.constant 4 : index
      %c0_30 = arith.constant 0 : index
      %c0_31 = arith.constant 0 : index
      %36 = vector.load %arg3[%c4, %c0_30, %c0_31] : memref<9x128x128xbf16, #tpu.memory_space<vmem>>, vector<1x128x128xbf16>
      %37 = vector.shape_cast %36 : vector<1x128x128xbf16> to vector<128x128xbf16>
      %cst_32 = arith.constant dense<0.000000e+00> : vector<6x128xf32>
      %38 = tpu.matmul %10, %37, %cst_32 {dimension_numbers = #tpu.dot_dimension_numbers<[1], [0], [0], [1], [0, 0, 1, 1], [], []>} : vector<6x128xbf16>, vector<128x128xbf16>, vector<6x128xf32> -> vector<6x128xf32>
      %39 = arith.addf %35, %38 : vector<6x128xf32>
      %c7 = arith.constant 7 : index
      %c0_33 = arith.constant 0 : index
      %c0_34 = arith.constant 0 : index
      %40 = vector.load %arg3[%c7, %c0_33, %c0_34] : memref<9x128x128xbf16, #tpu.memory_space<vmem>>, vector<1x128x128xbf16>
      %41 = vector.shape_cast %40 : vector<1x128x128xbf16> to vector<128x128xbf16>
      %cst_35 = arith.constant dense<0.000000e+00> : vector<6x128xf32>
      %42 = tpu.matmul %14, %41, %cst_35 {dimension_numbers = #tpu.dot_dimension_numbers<[1], [0], [0], [1], [0, 0, 1, 1], [], []>} : vector<6x128xbf16>, vector<128x128xbf16>, vector<6x128xf32> -> vector<6x128xf32>
      %43 = arith.addf %39, %42 : vector<6x128xf32>
      %44 = vector.extract_strided_slice %43 {offsets = [1, 0], sizes = [4, 128], strides = [1, 1]} : vector<6x128xf32> to vector<4x128xf32>
      %45 = arith.addf %30, %44 : vector<4x128xf32>
      %cst_36 = arith.constant 0.000000e+00 : f32
      %46 = vector.broadcast %cst_36 : f32 to vector<6x128xf32>
      %c2 = arith.constant 2 : index
      %c0_37 = arith.constant 0 : index
      %c0_38 = arith.constant 0 : index
      %47 = vector.load %arg3[%c2, %c0_37, %c0_38] : memref<9x128x128xbf16, #tpu.memory_space<vmem>>, vector<1x128x128xbf16>
      %48 = vector.shape_cast %47 : vector<1x128x128xbf16> to vector<128x128xbf16>
      %cst_39 = arith.constant dense<0.000000e+00> : vector<6x128xf32>
      %49 = tpu.matmul %6, %48, %cst_39 {dimension_numbers = #tpu.dot_dimension_numbers<[1], [0], [0], [1], [0, 0, 1, 1], [], []>} : vector<6x128xbf16>, vector<128x128xbf16>, vector<6x128xf32> -> vector<6x128xf32>
      %50 = arith.addf %46, %49 : vector<6x128xf32>
      %c5 = arith.constant 5 : index
      %c0_40 = arith.constant 0 : index
      %c0_41 = arith.constant 0 : index
      %51 = vector.load %arg3[%c5, %c0_40, %c0_41] : memref<9x128x128xbf16, #tpu.memory_space<vmem>>, vector<1x128x128xbf16>
      %52 = vector.shape_cast %51 : vector<1x128x128xbf16> to vector<128x128xbf16>
      %cst_42 = arith.constant dense<0.000000e+00> : vector<6x128xf32>
      %53 = tpu.matmul %10, %52, %cst_42 {dimension_numbers = #tpu.dot_dimension_numbers<[1], [0], [0], [1], [0, 0, 1, 1], [], []>} : vector<6x128xbf16>, vector<128x128xbf16>, vector<6x128xf32> -> vector<6x128xf32>
      %54 = arith.addf %50, %53 : vector<6x128xf32>
      %c8 = arith.constant 8 : index
      %c0_43 = arith.constant 0 : index
      %c0_44 = arith.constant 0 : index
      %55 = vector.load %arg3[%c8, %c0_43, %c0_44] : memref<9x128x128xbf16, #tpu.memory_space<vmem>>, vector<1x128x128xbf16>
      %56 = vector.shape_cast %55 : vector<1x128x128xbf16> to vector<128x128xbf16>
      %cst_45 = arith.constant dense<0.000000e+00> : vector<6x128xf32>
      %57 = tpu.matmul %14, %56, %cst_45 {dimension_numbers = #tpu.dot_dimension_numbers<[1], [0], [0], [1], [0, 0, 1, 1], [], []>} : vector<6x128xbf16>, vector<128x128xbf16>, vector<6x128xf32> -> vector<6x128xf32>
      %58 = arith.addf %54, %57 : vector<6x128xf32>
      %59 = vector.extract_strided_slice %58 {offsets = [2, 0], sizes = [4, 128], strides = [1, 1]} : vector<6x128xf32> to vector<4x128xf32>
      %60 = arith.addf %45, %59 : vector<4x128xf32>
      %61 = vector.broadcast %0 : vector<1x128xf32> to vector<4x128xf32>
      %62 = arith.mulf %60, %61 : vector<4x128xf32>
      %63 = vector.broadcast %1 : vector<1x128xf32> to vector<4x128xf32>
      %64 = arith.addf %62, %63 : vector<4x128xf32>
      %cst_46 = arith.constant 0.000000e+00 : f32
      %65 = vector.broadcast %cst_46 : f32 to vector<4x128xf32>
      %66 = arith.maximumf %64, %65 : vector<4x128xf32>
      %67 = arith.truncf %66 : vector<4x128xf32> to vector<4x128xbf16>
      %c0_47 = arith.constant 0 : index
      %68 = arith.index_cast %arg7 : i32 to index
      %c0_48 = arith.constant 0 : index
      %c0_49 = arith.constant 0 : index
      %69 = vector.load %arg6[%c0_47, %68, %c0_48, %c0_49] : memref<1x4x4x128xbf16, #tpu.memory_space<vmem>>, vector<1x1x4x128xbf16>
      %70 = vector.shape_cast %69 : vector<1x1x4x128xbf16> to vector<4x128xbf16>
      %71 = vector.shape_cast %67 : vector<4x128xbf16> to vector<1x1x4x128xbf16>
      tpu.vector_store %arg6[%c0_47, %68, %c0_48, %c0_49], %71 {strides = array<i32>} : memref<1x4x4x128xbf16, #tpu.memory_space<vmem>>, vector<1x1x4x128xbf16>,
    }
    %c4_i32_3 = arith.constant 4 : i32
    return
  }
  func.func @transform_0(%arg0: i32, %arg1: i32) -> (i32, i32, i32, i32) {
    %c0_i32 = arith.constant 0 : i32
    %c0_i32_0 = arith.constant 0 : i32
    %c0_i32_1 = arith.constant 0 : i32
    %c0_i32_2 = arith.constant 0 : i32
    return %arg0, %c0_i32, %c0_i32_0, %c0_i32_1 : i32, i32, i32, i32
  }
  func.func @transform_1(%arg0: i32, %arg1: i32) -> (i32, i32, i32) {
    %c0_i32 = arith.constant 0 : i32
    %c0_i32_0 = arith.constant 0 : i32
    %c0_i32_1 = arith.constant 0 : i32
    return %c0_i32, %c0_i32_0, %arg1 : i32, i32, i32
  }
  func.func @transform_2(%arg0: i32, %arg1: i32) -> (i32, i32) {
    %c0_i32 = arith.constant 0 : i32
    %c0_i32_0 = arith.constant 0 : i32
    return %c0_i32, %arg1 : i32, i32
  }
  func.func @transform_3(%arg0: i32, %arg1: i32) -> (i32, i32) {
    %c0_i32 = arith.constant 0 : i32
    %c0_i32_0 = arith.constant 0 : i32
    return %c0_i32, %arg1 : i32, i32
  }
  func.func @transform_4(%arg0: i32, %arg1: i32) -> (i32, i32, i32, i32) {
    %c0_i32 = arith.constant 0 : i32
    %c0_i32_0 = arith.constant 0 : i32
    %c0_i32_1 = arith.constant 0 : i32
    return %arg0, %c0_i32, %c0_i32_0, %arg1 : i32, i32, i32, i32
  }
}

module attributes {stable_mosaic.version = 11 : i64} {
  func.func @_maxpool_kernel(%arg0: i32, %arg1: i32, %arg2: memref<1x2x2x256xbf16, #tpu.memory_space<vmem>>, %arg3: memref<1x1x2x128xbf16, #tpu.memory_space<vmem>>) attributes {dimension_semantics = [#tpu.dimension_semantics<parallel>, #tpu.dimension_semantics<parallel>], iteration_bounds = array<i64: 2, 2>, scalar_prefetch = 0 : i64, scratch_operands = 0 : i64, tpu.core_type = #tpu.core_type<tc>, window_params = [{transform_indices = @transform_0, window_bounds = array<i64: 1, 2, 2, 256>}, {transform_indices = @transform_1, window_bounds = array<i64: 1, 1, 2, 128>}]} {
    %c0 = arith.constant 0 : index
    %c0_0 = arith.constant 0 : index
    %c0_1 = arith.constant 0 : index
    %c0_2 = arith.constant 0 : index
    %0 = vector.load %arg2[%c0, %c0_0, %c0_1, %c0_2] : memref<1x2x2x256xbf16, #tpu.memory_space<vmem>>, vector<1x1x2x256xbf16>
    %1 = vector.shape_cast %0 : vector<1x1x2x256xbf16> to vector<2x256xbf16>
    %c0_3 = arith.constant 0 : index
    %c1 = arith.constant 1 : index
    %c0_4 = arith.constant 0 : index
    %c0_5 = arith.constant 0 : index
    %2 = vector.load %arg2[%c0_3, %c1, %c0_4, %c0_5] : memref<1x2x2x256xbf16, #tpu.memory_space<vmem>>, vector<1x1x2x256xbf16>
    %3 = vector.shape_cast %2 : vector<1x1x2x256xbf16> to vector<2x256xbf16>
    %4 = arith.maximumf %1, %3 : vector<2x256xbf16>
    %5 = vector.extract_strided_slice %4 {offsets = [0, 0], sizes = [2, 128], strides = [1, 1]} : vector<2x256xbf16> to vector<2x128xbf16>
    %6 = vector.extract_strided_slice %4 {offsets = [0, 128], sizes = [2, 128], strides = [1, 1]} : vector<2x256xbf16> to vector<2x128xbf16>
    %7 = arith.maximumf %5, %6 : vector<2x128xbf16>
    %c0_6 = arith.constant 0 : index
    %c0_7 = arith.constant 0 : index
    %c0_8 = arith.constant 0 : index
    %c0_9 = arith.constant 0 : index
    %8 = vector.load %arg3[%c0_6, %c0_7, %c0_8, %c0_9] : memref<1x1x2x128xbf16, #tpu.memory_space<vmem>>, vector<1x1x2x128xbf16>
    %9 = vector.shape_cast %8 : vector<1x1x2x128xbf16> to vector<2x128xbf16>
    %10 = vector.shape_cast %7 : vector<2x128xbf16> to vector<1x1x2x128xbf16>
    tpu.vector_store %arg3[%c0_6, %c0_7, %c0_8, %c0_9], %10 {strides = array<i32>} : memref<1x1x2x128xbf16, #tpu.memory_space<vmem>>, vector<1x1x2x128xbf16>,
    return
  }
  func.func @transform_0(%arg0: i32, %arg1: i32) -> (i32, i32, i32, i32) {
    %c0_i32 = arith.constant 0 : i32
    %c0_i32_0 = arith.constant 0 : i32
    %c0_i32_1 = arith.constant 0 : i32
    return %arg0, %arg1, %c0_i32, %c0_i32_0 : i32, i32, i32, i32
  }
  func.func @transform_1(%arg0: i32, %arg1: i32) -> (i32, i32, i32, i32) {
    %c0_i32 = arith.constant 0 : i32
    %c0_i32_0 = arith.constant 0 : i32
    %c0_i32_1 = arith.constant 0 : i32
    return %arg0, %arg1, %c0_i32, %c0_i32_0 : i32, i32, i32, i32
  }
}

module attributes {stable_mosaic.version = 11 : i64} {
  func.func @_conv3x3_kernel(%arg0: i32, %arg1: i32, %arg2: memref<1x4x4x128xbf16, #tpu.memory_space<vmem>>, %arg3: memref<9x128x128xbf16, #tpu.memory_space<vmem>>, %arg4: memref<1x128xf32, #tpu.memory_space<vmem>>, %arg5: memref<1x128xf32, #tpu.memory_space<vmem>>, %arg6: memref<1x2x2x128xbf16, #tpu.memory_space<vmem>>) attributes {dimension_semantics = [#tpu.dimension_semantics<parallel>, #tpu.dimension_semantics<parallel>], iteration_bounds = array<i64: 2, 1>, scalar_prefetch = 0 : i64, scratch_operands = 0 : i64, tpu.core_type = #tpu.core_type<tc>, window_params = [{transform_indices = @transform_0, window_bounds = array<i64: 1, 4, 4, 128>}, {transform_indices = @transform_1, window_bounds = array<i64: 9, 128, 128>}, {transform_indices = @transform_2, window_bounds = array<i64: 1, 128>}, {transform_indices = @transform_3, window_bounds = array<i64: 1, 128>}, {transform_indices = @transform_4, window_bounds = array<i64: 1, 2, 2, 128>}]} {
    %c0 = arith.constant 0 : index
    %c0_0 = arith.constant 0 : index
    %0 = vector.load %arg4[%c0, %c0_0] : memref<1x128xf32, #tpu.memory_space<vmem>>, vector<1x128xf32>
    %c0_1 = arith.constant 0 : index
    %c0_2 = arith.constant 0 : index
    %1 = vector.load %arg5[%c0_1, %c0_2] : memref<1x128xf32, #tpu.memory_space<vmem>>, vector<1x128xf32>
    %c0_i32 = arith.constant 0 : i32
    %c2_i32 = arith.constant 2 : i32
    %2 = arith.addi %c0_i32, %c2_i32 : i32
    %c1_i32 = arith.constant 1 : i32
    scf.for %arg7 = %c0_i32 to %2 step %c1_i32  : i32 {
      %c0_i32_4 = arith.constant 0 : i32
      %3 = arith.addi %arg7, %c0_i32_4 : i32
      %c0_5 = arith.constant 0 : index
      %4 = arith.index_cast %3 : i32 to index
      %c0_6 = arith.constant 0 : index
      %c0_7 = arith.constant 0 : index
      %5 = vector.load %arg2[%c0_5, %4, %c0_6, %c0_7] : memref<1x4x4x128xbf16, #tpu.memory_space<vmem>>, vector<1x1x4x128xbf16>
      %6 = vector.shape_cast %5 : vector<1x1x4x128xbf16> to vector<4x128xbf16>
      %c1_i32_8 = arith.constant 1 : i32
      %7 = arith.addi %arg7, %c1_i32_8 : i32
      %c0_9 = arith.constant 0 : index
      %8 = arith.index_cast %7 : i32 to index
      %c0_10 = arith.constant 0 : index
      %c0_11 = arith.constant 0 : index
      %9 = vector.load %arg2[%c0_9, %8, %c0_10, %c0_11] : memref<1x4x4x128xbf16, #tpu.memory_space<vmem>>, vector<1x1x4x128xbf16>
      %10 = vector.shape_cast %9 : vector<1x1x4x128xbf16> to vector<4x128xbf16>
      %c2_i32_12 = arith.constant 2 : i32
      %11 = arith.addi %arg7, %c2_i32_12 : i32
      %c0_13 = arith.constant 0 : index
      %12 = arith.index_cast %11 : i32 to index
      %c0_14 = arith.constant 0 : index
      %c0_15 = arith.constant 0 : index
      %13 = vector.load %arg2[%c0_13, %12, %c0_14, %c0_15] : memref<1x4x4x128xbf16, #tpu.memory_space<vmem>>, vector<1x1x4x128xbf16>
      %14 = vector.shape_cast %13 : vector<1x1x4x128xbf16> to vector<4x128xbf16>
      %cst = arith.constant 0.000000e+00 : f32
      %15 = vector.broadcast %cst : f32 to vector<2x128xf32>
      %cst_16 = arith.constant 0.000000e+00 : f32
      %16 = vector.broadcast %cst_16 : f32 to vector<4x128xf32>
      %c0_17 = arith.constant 0 : index
      %c0_18 = arith.constant 0 : index
      %c0_19 = arith.constant 0 : index
      %17 = vector.load %arg3[%c0_17, %c0_18, %c0_19] : memref<9x128x128xbf16, #tpu.memory_space<vmem>>, vector<1x128x128xbf16>
      %18 = vector.shape_cast %17 : vector<1x128x128xbf16> to vector<128x128xbf16>
      %cst_20 = arith.constant dense<0.000000e+00> : vector<4x128xf32>
      %19 = tpu.matmul %6, %18, %cst_20 {dimension_numbers = #tpu.dot_dimension_numbers<[1], [0], [0], [1], [0, 0, 1, 1], [], []>} : vector<4x128xbf16>, vector<128x128xbf16>, vector<4x128xf32> -> vector<4x128xf32>
      %20 = arith.addf %16, %19 : vector<4x128xf32>
      %c3 = arith.constant 3 : index
      %c0_21 = arith.constant 0 : index
      %c0_22 = arith.constant 0 : index
      %21 = vector.load %arg3[%c3, %c0_21, %c0_22] : memref<9x128x128xbf16, #tpu.memory_space<vmem>>, vector<1x128x128xbf16>
      %22 = vector.shape_cast %21 : vector<1x128x128xbf16> to vector<128x128xbf16>
      %cst_23 = arith.constant dense<0.000000e+00> : vector<4x128xf32>
      %23 = tpu.matmul %10, %22, %cst_23 {dimension_numbers = #tpu.dot_dimension_numbers<[1], [0], [0], [1], [0, 0, 1, 1], [], []>} : vector<4x128xbf16>, vector<128x128xbf16>, vector<4x128xf32> -> vector<4x128xf32>
      %24 = arith.addf %20, %23 : vector<4x128xf32>
      %c6 = arith.constant 6 : index
      %c0_24 = arith.constant 0 : index
      %c0_25 = arith.constant 0 : index
      %25 = vector.load %arg3[%c6, %c0_24, %c0_25] : memref<9x128x128xbf16, #tpu.memory_space<vmem>>, vector<1x128x128xbf16>
      %26 = vector.shape_cast %25 : vector<1x128x128xbf16> to vector<128x128xbf16>
      %cst_26 = arith.constant dense<0.000000e+00> : vector<4x128xf32>
      %27 = tpu.matmul %14, %26, %cst_26 {dimension_numbers = #tpu.dot_dimension_numbers<[1], [0], [0], [1], [0, 0, 1, 1], [], []>} : vector<4x128xbf16>, vector<128x128xbf16>, vector<4x128xf32> -> vector<4x128xf32>
      %28 = arith.addf %24, %27 : vector<4x128xf32>
      %29 = vector.extract_strided_slice %28 {offsets = [0, 0], sizes = [2, 128], strides = [1, 1]} : vector<4x128xf32> to vector<2x128xf32>
      %30 = arith.addf %15, %29 : vector<2x128xf32>
      %cst_27 = arith.constant 0.000000e+00 : f32
      %31 = vector.broadcast %cst_27 : f32 to vector<4x128xf32>
      %c1 = arith.constant 1 : index
      %c0_28 = arith.constant 0 : index
      %c0_29 = arith.constant 0 : index
      %32 = vector.load %arg3[%c1, %c0_28, %c0_29] : memref<9x128x128xbf16, #tpu.memory_space<vmem>>, vector<1x128x128xbf16>
      %33 = vector.shape_cast %32 : vector<1x128x128xbf16> to vector<128x128xbf16>
      %cst_30 = arith.constant dense<0.000000e+00> : vector<4x128xf32>
      %34 = tpu.matmul %6, %33, %cst_30 {dimension_numbers = #tpu.dot_dimension_numbers<[1], [0], [0], [1], [0, 0, 1, 1], [], []>} : vector<4x128xbf16>, vector<128x128xbf16>, vector<4x128xf32> -> vector<4x128xf32>
      %35 = arith.addf %31, %34 : vector<4x128xf32>
      %c4 = arith.constant 4 : index
      %c0_31 = arith.constant 0 : index
      %c0_32 = arith.constant 0 : index
      %36 = vector.load %arg3[%c4, %c0_31, %c0_32] : memref<9x128x128xbf16, #tpu.memory_space<vmem>>, vector<1x128x128xbf16>
      %37 = vector.shape_cast %36 : vector<1x128x128xbf16> to vector<128x128xbf16>
      %cst_33 = arith.constant dense<0.000000e+00> : vector<4x128xf32>
      %38 = tpu.matmul %10, %37, %cst_33 {dimension_numbers = #tpu.dot_dimension_numbers<[1], [0], [0], [1], [0, 0, 1, 1], [], []>} : vector<4x128xbf16>, vector<128x128xbf16>, vector<4x128xf32> -> vector<4x128xf32>
      %39 = arith.addf %35, %38 : vector<4x128xf32>
      %c7 = arith.constant 7 : index
      %c0_34 = arith.constant 0 : index
      %c0_35 = arith.constant 0 : index
      %40 = vector.load %arg3[%c7, %c0_34, %c0_35] : memref<9x128x128xbf16, #tpu.memory_space<vmem>>, vector<1x128x128xbf16>
      %41 = vector.shape_cast %40 : vector<1x128x128xbf16> to vector<128x128xbf16>
      %cst_36 = arith.constant dense<0.000000e+00> : vector<4x128xf32>
      %42 = tpu.matmul %14, %41, %cst_36 {dimension_numbers = #tpu.dot_dimension_numbers<[1], [0], [0], [1], [0, 0, 1, 1], [], []>} : vector<4x128xbf16>, vector<128x128xbf16>, vector<4x128xf32> -> vector<4x128xf32>
      %43 = arith.addf %39, %42 : vector<4x128xf32>
      %44 = vector.extract_strided_slice %43 {offsets = [1, 0], sizes = [2, 128], strides = [1, 1]} : vector<4x128xf32> to vector<2x128xf32>
      %45 = arith.addf %30, %44 : vector<2x128xf32>
      %cst_37 = arith.constant 0.000000e+00 : f32
      %46 = vector.broadcast %cst_37 : f32 to vector<4x128xf32>
      %c2 = arith.constant 2 : index
      %c0_38 = arith.constant 0 : index
      %c0_39 = arith.constant 0 : index
      %47 = vector.load %arg3[%c2, %c0_38, %c0_39] : memref<9x128x128xbf16, #tpu.memory_space<vmem>>, vector<1x128x128xbf16>
      %48 = vector.shape_cast %47 : vector<1x128x128xbf16> to vector<128x128xbf16>
      %cst_40 = arith.constant dense<0.000000e+00> : vector<4x128xf32>
      %49 = tpu.matmul %6, %48, %cst_40 {dimension_numbers = #tpu.dot_dimension_numbers<[1], [0], [0], [1], [0, 0, 1, 1], [], []>} : vector<4x128xbf16>, vector<128x128xbf16>, vector<4x128xf32> -> vector<4x128xf32>
      %50 = arith.addf %46, %49 : vector<4x128xf32>
      %c5 = arith.constant 5 : index
      %c0_41 = arith.constant 0 : index
      %c0_42 = arith.constant 0 : index
      %51 = vector.load %arg3[%c5, %c0_41, %c0_42] : memref<9x128x128xbf16, #tpu.memory_space<vmem>>, vector<1x128x128xbf16>
      %52 = vector.shape_cast %51 : vector<1x128x128xbf16> to vector<128x128xbf16>
      %cst_43 = arith.constant dense<0.000000e+00> : vector<4x128xf32>
      %53 = tpu.matmul %10, %52, %cst_43 {dimension_numbers = #tpu.dot_dimension_numbers<[1], [0], [0], [1], [0, 0, 1, 1], [], []>} : vector<4x128xbf16>, vector<128x128xbf16>, vector<4x128xf32> -> vector<4x128xf32>
      %54 = arith.addf %50, %53 : vector<4x128xf32>
      %c8 = arith.constant 8 : index
      %c0_44 = arith.constant 0 : index
      %c0_45 = arith.constant 0 : index
      %55 = vector.load %arg3[%c8, %c0_44, %c0_45] : memref<9x128x128xbf16, #tpu.memory_space<vmem>>, vector<1x128x128xbf16>
      %56 = vector.shape_cast %55 : vector<1x128x128xbf16> to vector<128x128xbf16>
      %cst_46 = arith.constant dense<0.000000e+00> : vector<4x128xf32>
      %57 = tpu.matmul %14, %56, %cst_46 {dimension_numbers = #tpu.dot_dimension_numbers<[1], [0], [0], [1], [0, 0, 1, 1], [], []>} : vector<4x128xbf16>, vector<128x128xbf16>, vector<4x128xf32> -> vector<4x128xf32>
      %58 = arith.addf %54, %57 : vector<4x128xf32>
      %59 = vector.extract_strided_slice %58 {offsets = [2, 0], sizes = [2, 128], strides = [1, 1]} : vector<4x128xf32> to vector<2x128xf32>
      %60 = arith.addf %45, %59 : vector<2x128xf32>
      %61 = vector.broadcast %0 : vector<1x128xf32> to vector<2x128xf32>
      %62 = arith.mulf %60, %61 : vector<2x128xf32>
      %63 = vector.broadcast %1 : vector<1x128xf32> to vector<2x128xf32>
      %64 = arith.addf %62, %63 : vector<2x128xf32>
      %cst_47 = arith.constant 0.000000e+00 : f32
      %65 = vector.broadcast %cst_47 : f32 to vector<2x128xf32>
      %66 = arith.maximumf %64, %65 : vector<2x128xf32>
      %67 = arith.truncf %66 : vector<2x128xf32> to vector<2x128xbf16>
      %c0_48 = arith.constant 0 : index
      %68 = arith.index_cast %arg7 : i32 to index
      %c0_49 = arith.constant 0 : index
      %c0_50 = arith.constant 0 : index
      %69 = vector.load %arg6[%c0_48, %68, %c0_49, %c0_50] : memref<1x2x2x128xbf16, #tpu.memory_space<vmem>>, vector<1x1x2x128xbf16>
      %70 = vector.shape_cast %69 : vector<1x1x2x128xbf16> to vector<2x128xbf16>
      %71 = vector.shape_cast %67 : vector<2x128xbf16> to vector<1x1x2x128xbf16>
      tpu.vector_store %arg6[%c0_48, %68, %c0_49, %c0_50], %71 {strides = array<i32>} : memref<1x2x2x128xbf16, #tpu.memory_space<vmem>>, vector<1x1x2x128xbf16>,
    }
    %c2_i32_3 = arith.constant 2 : i32
    return
  }
  func.func @transform_0(%arg0: i32, %arg1: i32) -> (i32, i32, i32, i32) {
    %c0_i32 = arith.constant 0 : i32
    %c0_i32_0 = arith.constant 0 : i32
    %c0_i32_1 = arith.constant 0 : i32
    %c0_i32_2 = arith.constant 0 : i32
    return %arg0, %c0_i32, %c0_i32_0, %c0_i32_1 : i32, i32, i32, i32
  }
  func.func @transform_1(%arg0: i32, %arg1: i32) -> (i32, i32, i32) {
    %c0_i32 = arith.constant 0 : i32
    %c0_i32_0 = arith.constant 0 : i32
    %c0_i32_1 = arith.constant 0 : i32
    return %c0_i32, %c0_i32_0, %arg1 : i32, i32, i32
  }
  func.func @transform_2(%arg0: i32, %arg1: i32) -> (i32, i32) {
    %c0_i32 = arith.constant 0 : i32
    %c0_i32_0 = arith.constant 0 : i32
    return %c0_i32, %arg1 : i32, i32
  }
  func.func @transform_3(%arg0: i32, %arg1: i32) -> (i32, i32) {
    %c0_i32 = arith.constant 0 : i32
    %c0_i32_0 = arith.constant 0 : i32
    return %c0_i32, %arg1 : i32, i32
  }
  func.func @transform_4(%arg0: i32, %arg1: i32) -> (i32, i32, i32, i32) {
    %c0_i32 = arith.constant 0 : i32
    %c0_i32_0 = arith.constant 0 : i32
    %c0_i32_1 = arith.constant 0 : i32
    return %arg0, %c0_i32, %c0_i32_0, %arg1 : i32, i32, i32, i32
  }
}

module attributes {stable_mosaic.version = 11 : i64} {
  func.func @_maxpool_kernel(%arg0: i32, %arg1: i32, %arg2: memref<1x2x1x256xbf16, #tpu.memory_space<vmem>>, %arg3: memref<1x1x1x128xbf16, #tpu.memory_space<vmem>>) attributes {dimension_semantics = [#tpu.dimension_semantics<parallel>, #tpu.dimension_semantics<parallel>], iteration_bounds = array<i64: 2, 1>, scalar_prefetch = 0 : i64, scratch_operands = 0 : i64, tpu.core_type = #tpu.core_type<tc>, window_params = [{transform_indices = @transform_0, window_bounds = array<i64: 1, 2, 1, 256>}, {transform_indices = @transform_1, window_bounds = array<i64: 1, 1, 1, 128>}]} {
    %c0 = arith.constant 0 : index
    %c0_0 = arith.constant 0 : index
    %c0_1 = arith.constant 0 : index
    %c0_2 = arith.constant 0 : index
    %0 = vector.load %arg2[%c0, %c0_0, %c0_1, %c0_2] : memref<1x2x1x256xbf16, #tpu.memory_space<vmem>>, vector<1x1x1x256xbf16>
    %1 = vector.shape_cast %0 : vector<1x1x1x256xbf16> to vector<1x256xbf16>
    %c0_3 = arith.constant 0 : index
    %c1 = arith.constant 1 : index
    %c0_4 = arith.constant 0 : index
    %c0_5 = arith.constant 0 : index
    %2 = vector.load %arg2[%c0_3, %c1, %c0_4, %c0_5] : memref<1x2x1x256xbf16, #tpu.memory_space<vmem>>, vector<1x1x1x256xbf16>
    %3 = vector.shape_cast %2 : vector<1x1x1x256xbf16> to vector<1x256xbf16>
    %4 = arith.maximumf %1, %3 : vector<1x256xbf16>
    %5 = vector.extract_strided_slice %4 {offsets = [0, 0], sizes = [1, 128], strides = [1, 1]} : vector<1x256xbf16> to vector<1x128xbf16>
    %6 = vector.extract_strided_slice %4 {offsets = [0, 128], sizes = [1, 128], strides = [1, 1]} : vector<1x256xbf16> to vector<1x128xbf16>
    %7 = arith.maximumf %5, %6 : vector<1x128xbf16>
    %c0_6 = arith.constant 0 : index
    %c0_7 = arith.constant 0 : index
    %c0_8 = arith.constant 0 : index
    %c0_9 = arith.constant 0 : index
    %8 = vector.load %arg3[%c0_6, %c0_7, %c0_8, %c0_9] : memref<1x1x1x128xbf16, #tpu.memory_space<vmem>>, vector<1x1x1x128xbf16>
    %9 = vector.shape_cast %8 : vector<1x1x1x128xbf16> to vector<1x128xbf16>
    %10 = vector.shape_cast %7 : vector<1x128xbf16> to vector<1x1x1x128xbf16>
    tpu.vector_store %arg3[%c0_6, %c0_7, %c0_8, %c0_9], %10 {strides = array<i32>} : memref<1x1x1x128xbf16, #tpu.memory_space<vmem>>, vector<1x1x1x128xbf16>,
    return
  }
  func.func @transform_0(%arg0: i32, %arg1: i32) -> (i32, i32, i32, i32) {
    %c0_i32 = arith.constant 0 : i32
    %c0_i32_0 = arith.constant 0 : i32
    %c0_i32_1 = arith.constant 0 : i32
    return %arg0, %arg1, %c0_i32, %c0_i32_0 : i32, i32, i32, i32
  }
  func.func @transform_1(%arg0: i32, %arg1: i32) -> (i32, i32, i32, i32) {
    %c0_i32 = arith.constant 0 : i32
    %c0_i32_0 = arith.constant 0 : i32
    %c0_i32_1 = arith.constant 0 : i32
    return %arg0, %arg1, %c0_i32, %c0_i32_0 : i32, i32, i32, i32
  }
}

module attributes {stable_mosaic.version = 11 : i64} {
  func.func @_mlp3_kernel(%arg0: i32, %arg1: memref<8x128xbf16, #tpu.memory_space<vmem>>, %arg2: memref<128x128xbf16, #tpu.memory_space<vmem>>, %arg3: memref<1x128xf32, #tpu.memory_space<vmem>>, %arg4: memref<128x128xbf16, #tpu.memory_space<vmem>>, %arg5: memref<1x128xf32, #tpu.memory_space<vmem>>, %arg6: memref<128x128xbf16, #tpu.memory_space<vmem>>, %arg7: memref<1x128xf32, #tpu.memory_space<vmem>>, %arg8: memref<8x128xf32, #tpu.memory_space<vmem>>) attributes {dimension_semantics = [#tpu.dimension_semantics<parallel>], iteration_bounds = array<i64: 1>, scalar_prefetch = 0 : i64, scratch_operands = 0 : i64, tpu.core_type = #tpu.core_type<tc>, window_params = [{transform_indices = @transform_0, window_bounds = array<i64: 8, 128>}, {pipeline_mode = #tpu.pipeline_mode<synchronous>, transform_indices = @transform_1, window_bounds = array<i64: 128, 128>}, {pipeline_mode = #tpu.pipeline_mode<synchronous>, transform_indices = @transform_2, window_bounds = array<i64: 1, 128>}, {pipeline_mode = #tpu.pipeline_mode<synchronous>, transform_indices = @transform_3, window_bounds = array<i64: 128, 128>}, {pipeline_mode = #tpu.pipeline_mode<synchronous>, transform_indices = @transform_4, window_bounds = array<i64: 1, 128>}, {pipeline_mode = #tpu.pipeline_mode<synchronous>, transform_indices = @transform_5, window_bounds = array<i64: 128, 128>}, {pipeline_mode = #tpu.pipeline_mode<synchronous>, transform_indices = @transform_6, window_bounds = array<i64: 1, 128>}, {transform_indices = @transform_7, window_bounds = array<i64: 8, 128>}]} {
    %c0 = arith.constant 0 : index
    %c0_0 = arith.constant 0 : index
    %0 = vector.load %arg1[%c0, %c0_0] : memref<8x128xbf16, #tpu.memory_space<vmem>>, vector<8x128xbf16>
    %c0_1 = arith.constant 0 : index
    %c0_2 = arith.constant 0 : index
    %1 = vector.load %arg2[%c0_1, %c0_2] : memref<128x128xbf16, #tpu.memory_space<vmem>>, vector<128x128xbf16>
    %cst = arith.constant dense<0.000000e+00> : vector<8x128xf32>
    %2 = tpu.matmul %0, %1, %cst {dimension_numbers = #tpu.dot_dimension_numbers<[1], [0], [0], [1], [0, 0, 1, 1], [], []>} : vector<8x128xbf16>, vector<128x128xbf16>, vector<8x128xf32> -> vector<8x128xf32>
    %c0_3 = arith.constant 0 : index
    %c0_4 = arith.constant 0 : index
    %3 = vector.load %arg3[%c0_3, %c0_4] : memref<1x128xf32, #tpu.memory_space<vmem>>, vector<1x128xf32>
    %4 = vector.broadcast %3 : vector<1x128xf32> to vector<8x128xf32>
    %5 = arith.addf %2, %4 : vector<8x128xf32>
    %cst_5 = arith.constant 0.000000e+00 : f32
    %6 = vector.broadcast %cst_5 : f32 to vector<8x128xf32>
    %7 = arith.maximumf %5, %6 : vector<8x128xf32>
    %8 = arith.truncf %7 : vector<8x128xf32> to vector<8x128xbf16>
    %c0_6 = arith.constant 0 : index
    %c0_7 = arith.constant 0 : index
    %9 = vector.load %arg4[%c0_6, %c0_7] : memref<128x128xbf16, #tpu.memory_space<vmem>>, vector<128x128xbf16>
    %cst_8 = arith.constant dense<0.000000e+00> : vector<8x128xf32>
    %10 = tpu.matmul %8, %9, %cst_8 {dimension_numbers = #tpu.dot_dimension_numbers<[1], [0], [0], [1], [0, 0, 1, 1], [], []>} : vector<8x128xbf16>, vector<128x128xbf16>, vector<8x128xf32> -> vector<8x128xf32>
    %c0_9 = arith.constant 0 : index
    %c0_10 = arith.constant 0 : index
    %11 = vector.load %arg5[%c0_9, %c0_10] : memref<1x128xf32, #tpu.memory_space<vmem>>, vector<1x128xf32>
    %12 = vector.broadcast %11 : vector<1x128xf32> to vector<8x128xf32>
    %13 = arith.addf %10, %12 : vector<8x128xf32>
    %cst_11 = arith.constant 0.000000e+00 : f32
    %14 = vector.broadcast %cst_11 : f32 to vector<8x128xf32>
    %15 = arith.maximumf %13, %14 : vector<8x128xf32>
    %16 = arith.truncf %15 : vector<8x128xf32> to vector<8x128xbf16>
    %c0_12 = arith.constant 0 : index
    %c0_13 = arith.constant 0 : index
    %17 = vector.load %arg6[%c0_12, %c0_13] : memref<128x128xbf16, #tpu.memory_space<vmem>>, vector<128x128xbf16>
    %cst_14 = arith.constant dense<0.000000e+00> : vector<8x128xf32>
    %18 = tpu.matmul %16, %17, %cst_14 {dimension_numbers = #tpu.dot_dimension_numbers<[1], [0], [0], [1], [0, 0, 1, 1], [], []>} : vector<8x128xbf16>, vector<128x128xbf16>, vector<8x128xf32> -> vector<8x128xf32>
    %c0_15 = arith.constant 0 : index
    %c0_16 = arith.constant 0 : index
    %19 = vector.load %arg7[%c0_15, %c0_16] : memref<1x128xf32, #tpu.memory_space<vmem>>, vector<1x128xf32>
    %20 = vector.broadcast %19 : vector<1x128xf32> to vector<8x128xf32>
    %21 = arith.addf %18, %20 : vector<8x128xf32>
    %c0_17 = arith.constant 0 : index
    %c0_18 = arith.constant 0 : index
    %22 = vector.load %arg8[%c0_17, %c0_18] : memref<8x128xf32, #tpu.memory_space<vmem>>, vector<8x128xf32>
    tpu.vector_store %arg8[%c0_17, %c0_18], %21 {strides = array<i32>} : memref<8x128xf32, #tpu.memory_space<vmem>>, vector<8x128xf32>,
    return
  }
  func.func @transform_0(%arg0: i32) -> (i32, i32) {
    %c0_i32 = arith.constant 0 : i32
    %c0_i32_0 = arith.constant 0 : i32
    return %arg0, %c0_i32 : i32, i32
  }
  func.func @transform_1(%arg0: i32) -> (i32, i32) {
    %c0_i32 = arith.constant 0 : i32
    %c0_i32_0 = arith.constant 0 : i32
    %c0_i32_1 = arith.constant 0 : i32
    return %c0_i32, %c0_i32_0 : i32, i32
  }
  func.func @transform_2(%arg0: i32) -> (i32, i32) {
    %c0_i32 = arith.constant 0 : i32
    %c0_i32_0 = arith.constant 0 : i32
    %c0_i32_1 = arith.constant 0 : i32
    return %c0_i32, %c0_i32_0 : i32, i32
  }
  func.func @transform_3(%arg0: i32) -> (i32, i32) {
    %c0_i32 = arith.constant 0 : i32
    %c0_i32_0 = arith.constant 0 : i32
    %c0_i32_1 = arith.constant 0 : i32
    return %c0_i32, %c0_i32_0 : i32, i32
  }
  func.func @transform_4(%arg0: i32) -> (i32, i32) {
    %c0_i32 = arith.constant 0 : i32
    %c0_i32_0 = arith.constant 0 : i32
    %c0_i32_1 = arith.constant 0 : i32
    return %c0_i32, %c0_i32_0 : i32, i32
  }
  func.func @transform_5(%arg0: i32) -> (i32, i32) {
    %c0_i32 = arith.constant 0 : i32
    %c0_i32_0 = arith.constant 0 : i32
    %c0_i32_1 = arith.constant 0 : i32
    return %c0_i32, %c0_i32_0 : i32, i32
  }
  func.func @transform_6(%arg0: i32) -> (i32, i32) {
    %c0_i32 = arith.constant 0 : i32
    %c0_i32_0 = arith.constant 0 : i32
    %c0_i32_1 = arith.constant 0 : i32
    return %c0_i32, %c0_i32_0 : i32, i32
  }
  func.func @transform_7(%arg0: i32) -> (i32, i32) {
    %c0_i32 = arith.constant 0 : i32
    %c0_i32_0 = arith.constant 0 : i32
    return %arg0, %c0_i32 : i32, i32
  }
}

</mosaic_0001>

<bundles_post_ra>
// kernel: _lambda_.14
= control target key start
LH: loop header
LB: loop body
LE: loop exit
PB: predicated region body
PF: predicated region fallthrough
CT: control target
= control target key end

     0   :  { %s2022_s15 = smov 0   ;;  %s2024_s16 = smov 0   ;;  %s2358_s0 = inlined_call_operand.vmem [shape: bf16[2,34,34,128], index: 0, kind: input, shape index: {}]   ;;  %s2359_s1 = inlined_call_operand.vmem [shape: bf16[9,128,128], index: 1, kind: input, shape index: {}]   ;;  %s2360_s2 = inlined_call_operand.vmem [shape: f32[1,128], index: 2, kind: input, shape index: {}]   ;;  %s2361_s3 = inlined_call_operand.vmem [shape: f32[1,128], index: 3, kind: input, shape index: {}]   ;;  %s2362_s4 = inlined_call_operand.vmem [shape: bf16[2,32,32,128], index: 4, kind: output, shape index: {}]  }
   0x1   :  { %s2026_s17 = smov 0  }
   0x2 LB: > { %s26_s18 = sadd.s32 1, %s1987_s16  ;;  %p1365_p0 = scmp.ge.s32.totalorder %s1991_s17, 1  ;;  %s1991_s17 = sphi %s2026_s17, %s14_s17   ;;  %s1987_s16 = sphi %s2024_s16, %s2364_s16   ;;  %s1983_s15 = sphi %s2022_s15, %s2363_s15  }
   0x3   : > { %p28_p1 = scmp.ge.s32.totalorder %s26_s18, 2  ;;  %p201_p2 = scmp.lt.s32.totalorder %s1991_s17, 3 }
   0x5   : > { %s2366_s18 = smov (%p28_p1, %s26_s18), 0  ;;  %p202_p3 = pnand %p1365_p0, %p201_p2 }
   0x6   : > { %p240_p4 = scmp.lt.s32.totalorder (!%p202_p3), %s1983_s15, 1  ;;  %s2060_s5 = smov (!%p202_p3), 0  }
   0x7   : > { %205 = sbr.rel (%p202_p3) target bundleno = 304 (0x130), region = 36 }
   0xc   : > { %v2043_v0 = vld [vmem:[%s2360_s2] sm:$0x1]  ;;  %s2368_s15 = smov (!%p240_p4, %s1983_s15), 1 }
   0xd   : > { %v2048_v1 = vld [vmem:[%s2361_s3] sm:$0x1]  ;;  %s1932_s23 = smul.u32 680, %s2368_s15  ;;  %s1824_s24 = sshll.u32 %s2368_s15, 9 }
   0xe   : > { %s2053_s27 = scalar_lea.vmem %s2362_s4, %s1824_s24 }
   0xf   : > { %s2058_s30 = scalar_lea.vmem %s2358_s0, %s1932_s23 }
  0x10 LB: >> { %v1847_v2 = vld [vmem:[%s2359_s1 + $0xf8] sm:$0xff]  ;;  %v1846_v5 = vld [vmem:[%s2359_s1 + $0xf0] sm:$0xff]  ;;  %v1845_v8 = vld [vmem:[%s2359_s1 + $0xe8] sm:$0xff]  ;;  %s1825_s19 = smul.u32 20, %s1995_s5  ;;  %vm887_vm0 = vcmask 1046528   ;;  %vm1179_vm1 = vcmask 1045504   ;;  %s1995_s5 = sphi %s2060_s5, %s270_s5  }
  0x11   : >> { %v1855_v3 = vld [vmem:[%s2359_s1 + $0x1b8] sm:$0xff]  ;;  %394 = vmatpush.bf16.msra.mxu0 %v1847_v2  ;;  %1916 = vmatpush.bf16.msra.mxu1 %v1847_v2  ;;  %v1854_v6 = vld [vmem:[%s2359_s1 + $0x1b0] sm:$0xff]  ;;  %v1853_v9 = vld [vmem:[%s2359_s1 + $0x1a8] sm:$0xff] }
  0x12   : >> { %v1871_v4 = vld [vmem:[%s2359_s1 + $0x138] sm:$0xff]  ;;  %583 = vmatpush.bf16.msra.mxu2 %v1855_v3  ;;  %v1870_v7 = vld [vmem:[%s2359_s1 + $0x130] sm:$0xff]  ;;  %v1869_v10 = vld [vmem:[%s2359_s1 + $0x128] sm:$0xff]  ;;  %s2121_s26 = scalar_lea.vmem %s2058_s30, %s1825_s19 }
  0x13   : >> { %695 = vmatpush.bf16.msra.mxu3 %v1871_v4  ;;  %v1844_v11 = vld [vmem:[%s2359_s1 + $0xe0] sm:$0xff]  ;;  %v1843_v14 = vld [vmem:[%s2359_s1 + $0xd8] sm:$0xff]  ;;  %v1842_v17 = vld [vmem:[%s2359_s1 + $0xd0] sm:$0xff] }
  0x14   : >> { %v1852_v12 = vld [vmem:[%s2359_s1 + $0x1a0] sm:$0xff]  ;;  %v1851_v15 = vld [vmem:[%s2359_s1 + $0x198] sm:$0xff]  ;;  %v1850_v18 = vld [vmem:[%s2359_s1 + $0x190] sm:$0xff] }
  0x15   : >> { %395 = vmatpush.bf16.msra.mxu0 %v1846_v5  ;;  %1917 = vmatpush.bf16.msra.mxu1 %v1846_v5  ;;  %v1868_v13 = vld [vmem:[%s2359_s1 + $0x120] sm:$0xff]  ;;  %v1867_v16 = vld [vmem:[%s2359_s1 + $0x118] sm:$0xff]  ;;  %v1866_v19 = vld [vmem:[%s2359_s1 + $0x110] sm:$0xff] }
  0x16   : >> { %584 = vmatpush.bf16.msra.mxu2 %v1854_v6  ;;  %v1841_v20 = vld [vmem:[%s2359_s1 + $0xc8] sm:$0xff]  ;;  %v1374_v21 = vld [vmem:[%s2121_s26 + $0x24] sm:$0x1]  ;;  %v1839_v27 = vld [vmem:[%s2359_s1 + $0x38] sm:$0xff] }
  0x17   : >> { %696 = vmatpush.bf16.msra.mxu3 %v1870_v7  ;;  %v1849_v22 = vld [vmem:[%s2359_s1 + $0x188] sm:$0xff]  ;;  %v339_v24 = vunpack.c.l.b16 %v1374_v21  ;;  %v1840_v25 = vld [vmem:[%s2359_s1 + $0xc0] sm:$0xff]  ;;  %v1863_v29 = vld [vmem:[%s2359_s1 + $0x78] sm:$0xff] }
  0x18   : >> { %v1865_v23 = vld [vmem:[%s2359_s1 + $0x108] sm:$0xff]  ;;  %v1848_v26 = vld [vmem:[%s2359_s1 + $0x180] sm:$0xff]  ;;  %v2149_v30 = vld [vmem:[%s2121_s26 + $0x14] sm:$0xff] }
  0x19   : >> { %396 = vmatpush.bf16.msra.mxu0 %v1845_v8  ;;  %1918 = vmatpush.bf16.msra.mxu1 %v1845_v8  ;;  %v1864_v28 = vld [vmem:[%s2359_s1 + $0x100] sm:$0xff]  ;;  %v2151_v31 = vpack.c.b16 %v339_v24, %v339_v24  ;;  %v2154_v32 = vld [vmem:[%s2121_s26 + $0x28] sm:$0xff]  ;;  %v1887_v33 = vld [vmem:[%s2359_s1 + $0xb8] sm:$0xff] }
  0x1a   : >> { %585 = vmatpush.bf16.msra.mxu2 %v1853_v9  ;;  %v1838_v34 = vld [vmem:[%s2359_s1 + $0x30] sm:$0xff]  ;;  %v1895_v36 = vld [vmem:[%s2359_s1 + $0x178] sm:$0xff]  ;;  %v1837_v38 = vld [vmem:[%s2359_s1 + $0x28] sm:$0xff] }
  0x1b   : >> { %697 = vmatpush.bf16.msra.mxu3 %v1869_v10  ;;  %v1862_v35 = vld [vmem:[%s2359_s1 + $0x70] sm:$0xff]  ;;  %v1861_v39 = vld [vmem:[%s2359_s1 + $0x68] sm:$0xff]  ;;  %v1836_v42 = vld [vmem:[%s2359_s1 + $0x20] sm:$0xff] }
  0x1c   : >> { %v1886_v37 = vld [vmem:[%s2359_s1 + $0xb0] sm:$0xff]  ;;  %v1885_v41 = vld [vmem:[%s2359_s1 + $0xa8] sm:$0xff]  ;;  %v1860_v43 = vld [vmem:[%s2359_s1 + $0x60] sm:$0xff] }
  0x1d   : >> { %397 = vmatpush.bf16.msra.mxu0 %v1844_v11  ;;  %1919 = vmatpush.bf16.msra.mxu1 %v1844_v11  ;;  %v1894_v40 = vld [vmem:[%s2359_s1 + $0x170] sm:$0xff]  ;;  %v1893_v44 = vld [vmem:[%s2359_s1 + $0x168] sm:$0xff]  ;;  %v1884_v45 = vld [vmem:[%s2359_s1 + $0xa0] sm:$0xff] }
  0x1e   : >> { %586 = vmatpush.bf16.msra.mxu2 %v1852_v12  ;;  %v1835_v46 = vld [vmem:[%s2359_s1 + $0x18] sm:$0xff]  ;;  %v1892_v48 = vld [vmem:[%s2359_s1 + $0x160] sm:$0xff]  ;;  %v2212_v50 = vld [vmem:[%s2121_s26 + $0x30] sm:$0xff] }
  0x1f   : >> { %698 = vmatpush.bf16.msra.mxu3 %v1868_v13  ;;  %v1859_v47 = vld [vmem:[%s2359_s1 + $0x58] sm:$0xff]  ;;  %v1834_v52 = vld [vmem:[%s2359_s1 + $0x10] sm:$0xff]  ;;  %v1833_v56 = vld [vmem:[%s2359_s1 + $0x8] sm:$0xff] }
  0x20   : >> { %v2209_v49 = vld [vmem:[%s2121_s26 + $0x1c] sm:$0xff]  ;;  %v1858_v53 = vld [vmem:[%s2359_s1 + $0x50] sm:$0xff]  ;;  %v1857_v57 = vld [vmem:[%s2359_s1 + $0x48] sm:$0xff] }
  0x21   : >> { %398 = vmatpush.bf16.msra.mxu0 %v1843_v14  ;;  %1920 = vmatpush.bf16.msra.mxu1 %v1843_v14  ;;  %v1883_v51 = vld [vmem:[%s2359_s1 + $0x98] sm:$0xff]  ;;  %v1882_v55 = vld [vmem:[%s2359_s1 + $0x90] sm:$0xff]  ;;  %v1881_v59 = vld [vmem:[%s2359_s1 + $0x88] sm:$0xff] }
  0x22   : >> { %587 = vmatpush.bf16.msra.mxu2 %v1851_v15  ;;  %v1891_v54 = vld [vmem:[%s2359_s1 + $0x158] sm:$0xff]  ;;  %v1890_v58 = vld [vmem:[%s2359_s1 + $0x150] sm:$0xff]  ;;  %v1832_v60 = vld [vmem:[%s2359_s1] sm:$0xff] }
  0x23   : >> { %699 = vmatpush.bf16.msra.mxu3 %v1867_v16  ;;  %v1379_v61 = vld [vmem:[%s2121_s26 + $0x38] sm:$0x1]  ;;  %v1856_v62 = vld [vmem:[%s2359_s1 + $0x40] sm:$0xff]  ;;  %v1889_v3 = vld [vmem:[%s2359_s1 + $0x148] sm:$0xff] }
  0x24   : >> { %v1879_v63 = vld [vmem:[%s2359_s1 + $0x1f8] sm:$0xff]  ;;  %v1826_v4 = vld [vmem:[%s2121_s26] sm:$0xff]  ;;  %v528_v5 = vunpack.c.l.b16 %v1379_v61  ;;  %v1878_v7 = vld [vmem:[%s2359_s1 + $0x1f0] sm:$0xff] }
  0x25   : >> { %399 = vmatpush.bf16.msra.mxu0 %v1842_v17  ;;  %1921 = vmatpush.bf16.msra.mxu1 %v1842_v17  ;;  %v1903_v2 = vld [vmem:[%s2359_s1 + $0x238] sm:$0xff]  ;;  %v1880_v6 = vld [vmem:[%s2359_s1 + $0x80] sm:$0xff]  ;;  %v1902_v10 = vld [vmem:[%s2359_s1 + $0x230] sm:$0xff] }
  0x26   : >> { %588 = vmatpush.bf16.msra.mxu2 %v1850_v18  ;;  %v1888_v8 = vld [vmem:[%s2359_s1 + $0x140] sm:$0xff]  ;;  %v531_v9 = vpack.c.b16 %v528_v5, %v528_v5  ;;  %v1877_v11 = vld [vmem:[%s2359_s1 + $0x1e8] sm:$0xff]  ;;  %v1875_v15 = vld [vmem:[%s2359_s1 + $0x1d8] sm:$0xff] }
  0x27   : >> { %700 = vmatpush.bf16.msra.mxu3 %v1866_v19  ;;  %v1901_v12 = vld [vmem:[%s2359_s1 + $0x228] sm:$0xff]  ;;  %v1876_v13 = vld [vmem:[%s2359_s1 + $0x1e0] sm:$0xff]  ;;  %v1899_v17 = vld [vmem:[%s2359_s1 + $0x218] sm:$0xff] }
  0x28   : >> { %v1900_v14 = vld [vmem:[%s2359_s1 + $0x220] sm:$0xff]  ;;  %v1827_v16 = vld [vmem:[%s2121_s26 + $0x8] sm:$0xff]  ;;  %v1874_v18 = vld [vmem:[%s2359_s1 + $0x1d0] sm:$0xff] }
  0x29   : >> { %400 = vmatpush.bf16.msra.mxu0 %v1841_v20  ;;  %1922 = vmatpush.bf16.msra.mxu1 %v1841_v20  ;;  %v1898_v19 = vld [vmem:[%s2359_s1 + $0x210] sm:$0xff]  ;;  %v1873_v20 = vld [vmem:[%s2359_s1 + $0x1c8] sm:$0xff] }
  0x2a   : >> { %589 = vmatpush.bf16.msra.mxu2 %v1849_v22  ;;  %v1897_v21 = vld [vmem:[%s2359_s1 + $0x208] sm:$0xff]  ;;  %v278_v22 = vld [vmem:[%s2121_s26 + $0x10] sm:$0x1]  ;;  %s1904_s26 = sshll.u32 %s1995_s5, 4  ;;  %s270_s5 = sadd.s32 1, %s1995_s5  }
  0x2b   : >> { %701 = vmatpush.bf16.msra.mxu3 %v1865_v23  ;;  %v1872_v23 = vld [vmem:[%s2359_s1 + $0x1c0] sm:$0xff]  ;;  %v425_v24 = vunpack.c.l.b16 %v278_v22  ;;  %s1221_s20 = scalar_lea.vmem %s2053_s27, %s1904_s26  ;;  %p267_p5 = scmp.ge.s32.totalorder %s270_s5, 32  }
  0x2d   : >> { %401 = vmatpush.bf16.msra.mxu0 %v1840_v25  ;;  %1923 = vmatpush.bf16.msra.mxu1 %v1840_v25  ;;  %v1896_v25 = vld [vmem:[%s2359_s1 + $0x200] sm:$0xff] }
  0x2e   : >> { %590 = vmatpush.bf16.msra.mxu2 %v1848_v26  ;;  %v428_v26 = vpack.c.b16 %v425_v24, %v425_v24 }
  0x2f   : >> { %702 = vmatpush.bf16.msra.mxu3 %v1864_v28 }
  0x30   : >> { %402 = vmatmul.bf16.vlgmr.msra.gmra.mxu0 %v2149_v30  ;;  %412 = vmatmul.bf16.vlgmr.msra.gmra.mxu1 %v2151_v31 }
  0x31   : >> { %480 = vmatpush.bf16.msrb.mxu1 %v1839_v27  ;;  %766 = vmatpush.bf16.msrb.mxu0 %v1863_v29 }
  0x32   : >> { %591 = vmatmul.bf16.vlgmr.msra.gmra.mxu2 %v2154_v32  ;;  %703 = vmatmul.bf16.vlgmr.msra.gmra.mxu3 %v2149_v30 }
  0x33   : >> { %1058 = vmatpush.bf16.msrb.mxu3 %v1887_v33  ;;  %987 = vmatpush.bf16.msrb.mxu2 %v1895_v36 }
  0x35   : >> { %481 = vmatpush.bf16.msrb.mxu1 %v1838_v34  ;;  %767 = vmatpush.bf16.msrb.mxu0 %v1862_v35 }
  0x37   : >> { %1059 = vmatpush.bf16.msrb.mxu3 %v1886_v37  ;;  %988 = vmatpush.bf16.msrb.mxu2 %v1894_v40 }
  0x39   : >> { %482 = vmatpush.bf16.msrb.mxu1 %v1837_v38  ;;  %768 = vmatpush.bf16.msrb.mxu0 %v1861_v39 }
  0x3b   : >> { %1060 = vmatpush.bf16.msrb.mxu3 %v1885_v41  ;;  %989 = vmatpush.bf16.msrb.mxu2 %v1893_v44 }
  0x3d   : >> { %483 = vmatpush.bf16.msrb.mxu1 %v1836_v42  ;;  %769 = vmatpush.bf16.msrb.mxu0 %v1860_v43 }
  0x3f   : >> { %1061 = vmatpush.bf16.msrb.mxu3 %v1884_v45  ;;  %990 = vmatpush.bf16.msrb.mxu2 %v1892_v48 }
  0x40   : >> { %407 = vmatmul.bf16.gmra.mxu0 %v2209_v49 }
  0x41   : >> { %484 = vmatpush.bf16.msrb.mxu1 %v1835_v46  ;;  %770 = vmatpush.bf16.msrb.mxu0 %v1859_v47 }
  0x42   : >> { %596 = vmatmul.bf16.gmra.mxu2 %v2212_v50  ;;  %708 = vmatmul.bf16.gmra.mxu3 %v2209_v49 }
  0x43   : >> { %1062 = vmatpush.bf16.msrb.mxu3 %v1883_v51  ;;  %991 = vmatpush.bf16.msrb.mxu2 %v1891_v54 }
  0x45   : >> { %485 = vmatpush.bf16.msrb.mxu1 %v1834_v52  ;;  %771 = vmatpush.bf16.msrb.mxu0 %v1858_v53 }
  0x47   : >> { %1063 = vmatpush.bf16.msrb.mxu3 %v1882_v55  ;;  %992 = vmatpush.bf16.msrb.mxu2 %v1890_v58 }
  0x49   : >> { %486 = vmatpush.bf16.msrb.mxu1 %v1833_v56  ;;  %772 = vmatpush.bf16.msrb.mxu0 %v1857_v57 }
  0x4b   : >> { %1064 = vmatpush.bf16.msrb.mxu3 %v1881_v59  ;;  %993 = vmatpush.bf16.msrb.mxu2 %v1889_v3 }
  0x4d   : >> { %487 = vmatpush.bf16.msrb.mxu1 %v1832_v60  ;;  %773 = vmatpush.bf16.msrb.mxu0 %v1856_v62 }
  0x4f   : >> { %1065 = vmatpush.bf16.msrb.mxu3 %v1880_v6  ;;  %994 = vmatpush.bf16.msrb.mxu2 %v1888_v8 }
  0x50   : >> { %488 = vmatmul.bf16.vlgmr.msrb.gmra.mxu1 %v1826_v4  ;;  %774 = vmatmul.bf16.vlgmr.msrb.gmra.mxu0 %v1826_v4 }
  0x51   : >> { %854 = vmatpush.bf16.msra.mxu1 %v1879_v63  ;;  %1146 = vmatpush.bf16.msra.mxu0 %v1903_v2 }
  0x52   : >> { %601 = vmatmul.bf16.gmra.mxu2 %v531_v9  ;;  %713 = vmatmul.bf16.gmra.mxu3 %v2151_v31 }
  0x53   : >> { %1924 = vmatpush.bf16.msra.mxu2 %v1903_v2 }
  0x55   : >> { %855 = vmatpush.bf16.msra.mxu1 %v1878_v7  ;;  %1147 = vmatpush.bf16.msra.mxu0 %v1902_v10 }
  0x57   : >> { %1925 = vmatpush.bf16.msra.mxu2 %v1902_v10 }
  0x59   : >> { %856 = vmatpush.bf16.msra.mxu1 %v1877_v11  ;;  %1148 = vmatpush.bf16.msra.mxu0 %v1901_v12 }
  0x5b   : >> { %1926 = vmatpush.bf16.msra.mxu2 %v1901_v12 }
  0x5d   : >> { %857 = vmatpush.bf16.msra.mxu1 %v1876_v13  ;;  %1149 = vmatpush.bf16.msra.mxu0 %v1900_v14 }
  0x5f   : >> { %1927 = vmatpush.bf16.msra.mxu2 %v1900_v14 }
  0x60   : >> { %493 = vmatmul.bf16.gmra.mxu1 %v1827_v16  ;;  %779 = vmatmul.bf16.gmra.mxu0 %v1827_v16 }
  0x61   : >> { %858 = vmatpush.bf16.msra.mxu1 %v1875_v15  ;;  %1150 = vmatpush.bf16.msra.mxu0 %v1899_v17 }
  0x62   : >> { %995 = vmatmul.bf16.vlgmr.msrb.gmra.mxu2 %v2149_v30  ;;  %1066 = vmatmul.bf16.vlgmr.msrb.gmra.mxu3 %v1826_v4 }
  0x63   : >> { %1928 = vmatpush.bf16.msra.mxu2 %v1899_v17 }
  0x65   : >> { %859 = vmatpush.bf16.msra.mxu1 %v1874_v18  ;;  %1151 = vmatpush.bf16.msra.mxu0 %v1898_v19 }
  0x67   : >> { %1929 = vmatpush.bf16.msra.mxu2 %v1898_v19 }
  0x69   : >> { %860 = vmatpush.bf16.msra.mxu1 %v1873_v20  ;;  %1152 = vmatpush.bf16.msra.mxu0 %v1897_v21 }
  0x6b   : >> { %1930 = vmatpush.bf16.msra.mxu2 %v1897_v21 }
  0x6d   : >> { %861 = vmatpush.bf16.msra.mxu1 %v1872_v23  ;;  %1153 = vmatpush.bf16.msra.mxu0 %v1896_v25 }
  0x6f   : >> { %1931 = vmatpush.bf16.msra.mxu2 %v1896_v25 }
  0x70   : >> { %498 = vmatmul.bf16.gmra.mxu1 %v428_v26  ;;  %784 = vmatmul.bf16.gmra.mxu0 %v428_v26 }
  0x72   : >> { %1000 = vmatmul.bf16.gmra.mxu2 %v2209_v49  ;;  %1071 = vmatmul.bf16.gmra.mxu3 %v1827_v16 }
  0x80   : >> { %862 = vmatmul.bf16.vlgmr.msra.gmra.mxu1 %v2154_v32  ;;  %1154 = vmatmul.bf16.vlgmr.msra.gmra.mxu0 %v2154_v32 }
  0x82   : >> { %1005 = vmatmul.bf16.gmra.mxu2 %v2151_v31  ;;  %1076 = vmatmul.bf16.gmra.mxu3 %v428_v26 }
  0x90   : >> { %867 = vmatmul.bf16.gmra.mxu1 %v2212_v50  ;;  %1159 = vmatmul.bf16.gmra.mxu0 %v2212_v50 }
  0x92   : >> { %1164 = vmatmul.bf16.vlgmr.msra.gmra.mxu2 %v531_v9 }
  0xa0   : >> { %872 = vmatmul.bf16.gmra.mxu1 %v531_v9 }
  0xad   : >> { %v403_v27 = vpop.f32.mrf.mxu0  ;;  %v413_v28 = vpop.f32.mrf.mxu1 }
  0xb5   : >> { %v592_v29 = vpop.f32.mrf.mxu2  ;;  %v704_v30 = vpop.f32.mrf.mxu3 }
  0xb6   : >> { %v405_v33 = vpop.f32.mrf.mxu0  ;;  %v414_v34 = vpop.f32.mrf.mxu1 }
  0xbd   : >> { %v594_v35 = vpop.f32.mrf.mxu2  ;;  %v706_v36 = vpop.f32.mrf.mxu3 }
  0xbe   : >> { %v408_v37 = vpop.f32.mrf.mxu0 }
  0xc5   : >> { %v597_v38 = vpop.f32.mrf.mxu2  ;;  %v709_v32 = vpop.f32.mrf.mxu3 }
  0xc6   : >> { %v410_v39 = vpop.f32.mrf.mxu0 }
  0xcd   : >> { %v489_v31 = vpop.f32.mrf.mxu1  ;;  %v599_v41 = vpop.f32.mrf.mxu2 }
  0xce   : >> { %v490_v40 = vadd.f32 %v489_v31, %v403_v27  ;;  %v2319_v43 = vpop.f32.mrf.mxu3  ;;  %v775_v44 = vpop.f32.mrf.mxu0  ;;  %v1198_v31 = vperm.slane %v2043_v0, 0 }
  0xcf   : >> { %v776_v13 = vadd.f32 %v775_v44, %v704_v30 }
  0xd0   : >> { %v605_v42 = vadd.f32 %v592_v29, %v490_v40 }
  0xd5   : >> { %v491_v45 = vpop.f32.mrf.mxu1  ;;  %v602_v47 = vpop.f32.mrf.mxu2 }
  0xd6   : >> { %v492_v46 = vadd.f32 %v491_v45, %v405_v33  ;;  %v2321_v49 = vpop.f32.mrf.mxu3  ;;  %v777_v50 = vpop.f32.mrf.mxu0 }
  0xd7   : >> { %v778_v14 = vadd.f32 %v777_v50, %v706_v36 }
  0xd8   : >> { %v606_v48 = vadd.f32 %v594_v35, %v492_v46 }
  0xdd   : >> { %v494_v51 = vpop.f32.mrf.mxu1  ;;  %v603_v53 = vpop.f32.mrf.mxu2 }
  0xde   : >> { %v495_v52 = vadd.f32 %v494_v51, %v408_v37  ;;  %v716_v55 = vpop.f32.mrf.mxu3  ;;  %v780_v56 = vpop.f32.mrf.mxu0  ;;  %v1205_v51 = vperm.slane %v2048_v1, 0 }
  0xdf   : >> { %v781_v33 = vadd.f32 %v780_v56, %v709_v32 }
  0xe0   : >> { %v2323_v54 = vadd.f32 %v597_v38, %v495_v52 }
  0xe5   : >> { %v496_v57 = vpop.f32.mrf.mxu1  ;;  %v996_v59 = vpop.f32.mrf.mxu2 }
  0xe6   : >> { %v497_v58 = vadd.f32 %v496_v57, %v410_v39  ;;  %v1067_v61 = vpop.f32.mrf.mxu3  ;;  %v782_v62 = vpop.f32.mrf.mxu0 }
  0xe7   : >> { %v1068_v16 = vadd.f32 %v1067_v61, %v996_v59  ;;  %v783_v32 = vadd.f32 %v782_v62, %v2319_v43 }
  0xe8   : >> { %v2325_v60 = vadd.f32 %v599_v41, %v497_v58 }
  0xed   : >> { %v499_v63 = vpop.f32.mrf.mxu1  ;;  %v998_v2 = vpop.f32.mrf.mxu2 }
  0xee   : >> { %v1069_v3 = vpop.f32.mrf.mxu3  ;;  %v2327_v4 = vpop.f32.mrf.mxu0 }
  0xef   : >> { %v1070_v19 = vadd.f32 %v1069_v3, %v998_v2 }
  0xf5   : >> { %v500_v5 = vpop.f32.mrf.mxu1  ;;  %v1001_v6 = vpop.f32.mrf.mxu2 }
  0xf6   : >> { %v1072_v7 = vpop.f32.mrf.mxu3  ;;  %v787_v8 = vpop.f32.mrf.mxu0 }
  0xf7   : >> { %v1073_v37 = vadd.f32 %v1072_v7, %v1001_v6  ;;  %v786_v6 = vadd.f32 %v2327_v4, %v2321_v49 }
  0xfd   : >> { %v863_v9 = vpop.f32.mrf.mxu1  ;;  %v1003_v10 = vpop.f32.mrf.mxu2 }
  0xfe   : >> { %v1074_v11 = vpop.f32.mrf.mxu3  ;;  %v1155_v12 = vpop.f32.mrf.mxu0  ;;  %v877_v15 = vadd.f32 %v863_v9, %v776_v13 }
  0xff   : >> { %v1169_v20 = vadd.f32 %v1155_v12, %v1068_v16  ;;  %v1075_v57 = vadd.f32 %v1074_v11, %v1003_v10 }
 0x100   : >> { %v888_v22 = vrot.slane %v877_v15, 1 }
 0x101   : >> { %v1180_v28 = vrot.slane %v1169_v20, 2 }
 0x105   : >> { %v865_v17 = vpop.f32.mrf.mxu1  ;;  %v1006_v21 = vpop.f32.mrf.mxu2 }
 0x106   : >> { %v878_v18 = vadd.f32 %v865_v17, %v778_v14  ;;  %v1157_v24 = vpop.f32.mrf.mxu0  ;;  %v1077_v25 = vpop.f32.mrf.mxu3 }
 0x107   : >> { %v1170_v26 = vadd.f32 %v1157_v24, %v1070_v19  ;;  %v1078_v8 = vadd.f32 %v1077_v25, %v1006_v21 }
 0x108   : >> { %v889_v23 = vrot.slane %v878_v18, 1 }
 0x109   : >> { %v1181_v30 = vrot.slane %v1170_v26, 2 }
 0x10a   : >> { %v890_v27 = vsel %vm887_vm0, %v888_v22, %v889_v23 }
 0x10b   : >> { %v901_v29 = vadd.f32 %v890_v27, %v605_v42  ;;  %v1182_v34 = vsel %vm1179_vm1, %v1180_v28, %v1181_v30 }
 0x10d   : >> { %v868_v35 = vpop.f32.mrf.mxu1  ;;  %v1008_v38 = vpop.f32.mrf.mxu2  ;;  %v1193_v39 = vadd.f32 %v1182_v34, %v901_v29 }
 0x10e   : >> { %v879_v36 = vadd.f32 %v868_v35, %v781_v33  ;;  %v1160_v41 = vpop.f32.mrf.mxu0  ;;  %v1079_v44 = vpop.f32.mrf.mxu3 }
 0x10f   : >> { %v1171_v45 = vadd.f32 %v1160_v41, %v1073_v37  ;;  %v1200_v42 = vmul.f32 %v1198_v31, %v1193_v39 }
 0x110   : >> { %v891_v40 = vrot.slane %v879_v36, 1 }
 0x111   : >> { %v1183_v50 = vrot.slane %v1171_v45, 2  ;;  %v1207_v59 = vadd.f32 %v1205_v51, %v1200_v42 }
 0x112   : >> { %v892_v46 = vsel %vm887_vm0, %v889_v23, %v891_v40 }
 0x113   : >> { %v902_v47 = vadd.f32 %v892_v46, %v606_v48  ;;  %v1184_v52 = vsel %vm1179_vm1, %v1181_v30, %v1183_v50  ;;  %v1211_v7 = vmax.f32 %v1207_v59, 0.0 }
 0x115   : >> { %v870_v53 = vpop.f32.mrf.mxu1  ;;  %v1194_v55 = vadd.f32 %v1184_v52, %v902_v47  ;;  %v1165_v58 = vpop.f32.mrf.mxu2 }
 0x116   : >> { %v880_v56 = vadd.f32 %v870_v53, %v783_v32  ;;  %v1162_v2 = vpop.f32.mrf.mxu0  ;;  %v1173_v13 = vadd.f32 %v1165_v58, %v1078_v8 }
 0x117   : >> { %v1201_v61 = vmul.f32 %v1198_v31, %v1194_v55  ;;  %v1172_v48 = vadd.f32 %v1162_v2, %v1075_v57 }
 0x118   : >> { %v893_v63 = vrot.slane %v880_v56, 1  ;;  %v1187_v18 = vrot.slane %v1173_v13, 2 }
 0x119   : >> { %v1208_v3 = vadd.f32 %v1205_v51, %v1201_v61  ;;  %v1185_v5 = vrot.slane %v1172_v48, 2 }
 0x11a   : >> { %v894_v43 = vsel %vm887_vm0, %v891_v40, %v893_v63 }
 0x11b   : >> { %v903_v62 = vadd.f32 %v894_v43, %v2323_v54  ;;  %v1212_v9 = vmax.f32 %v1208_v3, 0.0  ;;  %v1186_v10 = vsel %vm1179_vm1, %v1183_v50, %v1185_v5  ;;  %v1188_v4 = vsel %vm1179_vm1, %v1185_v5, %v1187_v18 }
 0x11d   : >> { %v873_v11 = vpop.f32.mrf.mxu1  ;;  %v1908_v12 = vpack.c.bf16 %v1212_v9, %v1211_v7  ;;  %v1195_v15 = vadd.f32 %v1186_v10, %v903_v62  ;;  %v1167_v16 = vpop.f32.mrf.mxu2 }
 0x11e   : >> { %v881_v14 = vadd.f32 %v873_v11, %v786_v6 }
 0x11f   : >> { %1909 = vst [vmem:[%s1221_s20] sm:$0xff] %v1908_v12   ;;  %v1202_v19 = vmul.f32 %v1198_v31, %v1195_v15 }
 0x120   : >> { %v895_v17 = vrot.slane %v881_v14, 1 }
 0x121   : >> { %v1209_v22 = vadd.f32 %v1205_v51, %v1202_v19 }
 0x122   : >> { %v896_v54 = vsel %vm887_vm0, %v893_v63, %v895_v17 }
 0x123   : >> { %v904_v49 = vadd.f32 %v896_v54, %v2325_v60  ;;  %v1213_v25 = vmax.f32 %v1209_v22, 0.0 }
 0x125   : >> { %v1196_v20 = vadd.f32 %v1188_v4, %v904_v49  ;;  %v875_v21 = vpop.f32.mrf.mxu1 }
 0x127   : >> { %v1203_v23 = vmul.f32 %v1198_v31, %v1196_v20 }
 0x129   : >> { %v1210_v24 = vadd.f32 %v1205_v51, %v1203_v23 }
 0x12b   : >> { %v1214_v26 = vmax.f32 %v1210_v24, 0.0  ;;  %269 = sbr.rel (!%p267_p5) target bundleno = 16 (0x10), region = 94 }
 0x12d   : >> { %v1913_v27 = vpack.c.bf16 %v1214_v26, %v1213_v25 }
 0x12f   : >> { %1915 = vst [vmem:[%s1221_s20 + $0x8] sm:$0xff] %v1913_v27  }
 0x130 PF: > { %s14_s17 = sadd.s32 1, %s1991_s17   ;;  %s2363_s15 = smov %s1987_s16 }
 0x131   : > { %p11_p6 = scmp.ge.s32.totalorder %s14_s17, 4   ;;  %s2364_s16 = smov %s2366_s18 }
 0x133   :  { %13 = sbr.rel (!%p11_p6) target bundleno = 2 (0x2), region = 105 }

// kernel: _lambda_.15
= control target key start
LH: loop header
LB: loop body
LE: loop exit
PB: predicated region body
PF: predicated region fallthrough
CT: control target
= control target key end

     0   :  { %s399_s6 = smov 0   ;;  %s401_s7 = smov 0   ;;  %s454_s0 = inlined_call_operand.vmem [shape: bf16[2,32,16,256], index: 0, kind: input, shape index: {}]   ;;  %s455_s1 = inlined_call_operand.vmem [shape: bf16[2,16,16,128], index: 1, kind: output, shape index: {}]  }
   0x1   :  { %s403_s8 = smov 0   ;;  %s405_s9 = smov 0  }
   0x2   :  { %s407_s10 = smov 0  }
   0x3 LB: > { %s20_s11 = sadd.s32 1, %s379_s8  ;;  %s23_s12 = sadd.s32 1, %s383_s9  ;;  %s387_s10 = sphi %s407_s10, %s11_s10   ;;  %s383_s9 = sphi %s405_s9, %s459_s9   ;;  %s379_s8 = sphi %s403_s8, %s458_s8   ;;  %s375_s7 = sphi %s401_s7, %s457_s7   ;;  %s371_s6 = sphi %s399_s6, %s456_s6  }
   0x4   : > { %p21_p0 = scmp.ge.s32.totalorder %s20_s11, 16  ;;  %p292_p1 = scmp.ge.s32.totalorder %s387_s10, 1 }
   0x5   : > { %p109_p2 = scmp.lt.s32.totalorder %s387_s10, 33 }
   0x6   : > { %s461_s11 = smov (%p21_p0, %s20_s11), 0  ;;  %s463_s12 = smov (!%p21_p0, %s23_s12), %s383_s9 }
   0x7   : > { %p110_p3 = pnand %p292_p1, %p109_p2  ;;  %p25_p4 = scmp.ge.s32.totalorder %s463_s12, 2 }
   0x8   : > { %s293_s13 = sshll.u32 (!%p110_p3), %s371_s6, 1  ;;  %p139_p5 = scmp.lt.s32.totalorder (!%p110_p3), %s375_s7, 1 }
   0x9   : > { %s465_s12 = smov (%p25_p4, %s463_s12), 0  ;;  %113 = sbr.rel (%p110_p3) target bundleno = 36 (0x24), region = 24 }
   0xa   : > { %p141_p6 = scmp.lt.s32.totalorder (!%p110_p3), %s293_s13, 31  ;;  %p151_p7 = scmp.lt.s32.totalorder (!%p110_p3), %s371_s6, 15 }
   0xe   : > { %s467_s7 = smov (!%p139_p5, %s375_s7), 1  ;;  %s469_s13 = smov (!%p141_p6, %s293_s13), 31 }
   0xf   : > { %s295_s14 = sshll.u32 %s467_s7, 7  ;;  %s294_s15 = sshll.u32 %s469_s13, 2 }
  0x10   : > { %s145_s16 = sadd.s32 %s295_s14, %s294_s15  ;;  %s471_s6 = smov (!%p151_p7, %s371_s6), 15 }
  0x11   : > { %s296_s17 = sshll.u32 %s145_s16, 2  ;;  %s297_s21 = sshll.u32 %s471_s6, 1 }
  0x12   : > { %s147_s20 = scalar_lea.vmem %s454_s0, %s296_s17  ;;  %s298_s22 = sshll.u32 %s467_s7, 5 }
  0x13   : > { %v158_v0 = vld [vmem:[%s147_s20] sm:$0xff]  ;;  %v159_v1 = vld [vmem:[%s147_s20 + $0x8] sm:$0xff]  ;;  %v300_v2 = vld [vmem:[%s147_s20 + $0x10] sm:$0xff]  ;;  %s155_s23 = sadd.s32 %s298_s22, %s297_s21 }
  0x14   : > { %v301_v3 = vld [vmem:[%s147_s20 + $0x18] sm:$0xff]  ;;  %v163_v4 = vunpack.c.l.bf16 %v158_v0  ;;  %v164_v5 = vunpack.c.h.bf16 %v158_v0  ;;  %v165_v6 = vunpack.c.l.bf16 %v159_v1  ;;  %v166_v7 = vunpack.c.h.bf16 %v159_v1  ;;  %s299_s24 = sshll.u32 %s155_s23, 2 }
  0x15   : > { %v167_v8 = vunpack.c.l.bf16 %v300_v2  ;;  %v168_v9 = vunpack.c.h.bf16 %v300_v2  ;;  %v169_v10 = vunpack.c.l.bf16 %v301_v3  ;;  %v170_v11 = vunpack.c.h.bf16 %v301_v3  ;;  %s157_s27 = scalar_lea.vmem %s455_s1, %s299_s24 }
  0x17   : > { %v171_v12 = vmax.f32 %v163_v4, %v167_v8  ;;  %v172_v13 = vmax.f32 %v164_v5, %v168_v9  ;;  %v173_v14 = vmax.f32 %v165_v6, %v169_v10  ;;  %v174_v15 = vmax.f32 %v166_v7, %v170_v11 }
  0x19   : > { %v175_v16 = vpack.c.bf16 %v172_v13, %v171_v12  ;;  %v176_v17 = vpack.c.bf16 %v174_v15, %v173_v14 }
  0x1b   : > { %v181_v18 = vrot.slane %v175_v16, 4  ;;  %v182_v19 = vrot.slane %v176_v17, 4 }
  0x1d   : > { %v185_v20 = vunpack.c.l.bf16 %v181_v18  ;;  %v186_v21 = vunpack.c.l.bf16 %v182_v19 }
  0x1f   : > { %v187_v22 = vmax.f32 %v171_v12, %v185_v20  ;;  %v188_v23 = vmax.f32 %v173_v14, %v186_v21 }
  0x21   : > { %v307_v24 = vpack.c.bf16 %v188_v23, %v187_v22 }
  0x23   : > { %308 = vst [vmem:[%s157_s27] sm:$0xff] %v307_v24  }
  0x24 PF: > { %s11_s10 = sadd.s32 1, %s387_s10   ;;  %s456_s6 = smov %s379_s8 }
  0x25   : > { %p8_p8 = scmp.ge.s32.totalorder %s11_s10, 34   ;;  %s457_s7 = smov %s383_s9 }
  0x26   : > { %s458_s8 = smov %s461_s11  ;;  %s459_s9 = smov %s465_s12 }
  0x27   :  { %10 = sbr.rel (!%p8_p8) target bundleno = 3 (0x3), region = 55 }

// kernel: _lambda_.17
= control target key start
LH: loop header
LB: loop body
LE: loop exit
PB: predicated region body
PF: predicated region fallthrough
CT: control target
= control target key end

     0   :  { %s367_s6 = smov 0   ;;  %s369_s7 = smov 0   ;;  %s423_s0 = inlined_call_operand.vmem [shape: bf16[2,16,8,256], index: 0, kind: input, shape index: {}]   ;;  %s424_s1 = inlined_call_operand.vmem [shape: bf16[2,8,8,128], index: 1, kind: output, shape index: {}]  }
   0x1   :  { %s371_s8 = smov 0   ;;  %s373_s9 = smov 0  }
   0x2   :  { %s375_s10 = smov 0  }
   0x3 LB: > { %s20_s11 = sadd.s32 1, %s347_s8  ;;  %s23_s12 = sadd.s32 1, %s351_s9  ;;  %s355_s10 = sphi %s375_s10, %s11_s10   ;;  %s351_s9 = sphi %s373_s9, %s428_s9   ;;  %s347_s8 = sphi %s371_s8, %s427_s8   ;;  %s343_s7 = sphi %s369_s7, %s426_s7   ;;  %s339_s6 = sphi %s367_s6, %s425_s6  }
   0x4   : > { %p21_p0 = scmp.ge.s32.totalorder %s20_s11, 8  ;;  %p267_p1 = scmp.ge.s32.totalorder %s355_s10, 1 }
   0x5   : > { %p109_p2 = scmp.lt.s32.totalorder %s355_s10, 17 }
   0x6   : > { %s430_s11 = smov (%p21_p0, %s20_s11), 0  ;;  %s432_s12 = smov (!%p21_p0, %s23_s12), %s351_s9 }
   0x7   : > { %p110_p3 = pnand %p267_p1, %p109_p2  ;;  %p25_p4 = scmp.ge.s32.totalorder %s432_s12, 2 }
   0x8   : > { %s268_s13 = sshll.u32 (!%p110_p3), %s339_s6, 1  ;;  %p138_p5 = scmp.lt.s32.totalorder (!%p110_p3), %s343_s7, 1 }
   0x9   : > { %s434_s12 = smov (%p25_p4, %s432_s12), 0  ;;  %113 = sbr.rel (%p110_p3) target bundleno = 35 (0x23), region = 24 }
   0xa   : > { %p140_p6 = scmp.lt.s32.totalorder (!%p110_p3), %s268_s13, 15  ;;  %p150_p7 = scmp.lt.s32.totalorder (!%p110_p3), %s339_s6, 7 }
   0xe   : > { %s436_s7 = smov (!%p138_p5, %s343_s7), 1  ;;  %s438_s13 = smov (!%p140_p6, %s268_s13), 15 }
   0xf   : > { %s270_s14 = sshll.u32 %s436_s7, 5  ;;  %s269_s15 = sshll.u32 %s438_s13, 1 }
  0x10   : > { %s144_s16 = sadd.s32 %s270_s14, %s269_s15  ;;  %s440_s6 = smov (!%p150_p7, %s339_s6), 7 }
  0x11   : > { %s271_s17 = sshll.u32 %s144_s16, 2  ;;  %s272_s21 = sshll.u32 %s436_s7, 3 }
  0x12   : > { %s146_s20 = scalar_lea.vmem %s423_s0, %s271_s17  ;;  %s153_s22 = sadd.s32 %s272_s21, %s440_s6 }
  0x13   : > { %v156_v0 = vld [vmem:[%s146_s20] sm:$0xff]  ;;  %v274_v1 = vld [vmem:[%s146_s20 + $0x8] sm:$0xff]  ;;  %s273_s23 = sshll.u32 %s153_s22, 2 }
  0x14   : > { %v159_v2 = vunpack.c.l.bf16 %v156_v0  ;;  %v160_v3 = vunpack.c.h.bf16 %v156_v0  ;;  %v161_v4 = vunpack.c.l.bf16 %v274_v1  ;;  %v162_v5 = vunpack.c.h.bf16 %v274_v1  ;;  %s155_s26 = scalar_lea.vmem %s424_s1, %s273_s23 }
  0x16   : > { %v163_v6 = vmax.f32 %v159_v2, %v161_v4  ;;  %v164_v7 = vmax.f32 %v160_v3, %v162_v5 }
  0x18   : > { %v165_v8 = vpack.c.bf16 %v164_v7, %v163_v6 }
  0x1a   : > { %v168_v9 = vrot.slane %v165_v8, 4 }
  0x1c   : > { %v170_v10 = vunpack.c.l.bf16 %v168_v9 }
  0x1e   : > { %v171_v11 = vmax.f32 %v163_v6, %v170_v10 }
  0x20   : > { %v172_v12 = vpack.c.bf16 %v171_v11, %v171_v11 }
  0x22   : > { %173 = vst [vmem:[%s155_s26] sm:$0xf] %v172_v12 }
  0x23 PF: > { %s11_s10 = sadd.s32 1, %s355_s10   ;;  %s425_s6 = smov %s347_s8 }
  0x24   : > { %p8_p8 = scmp.ge.s32.totalorder %s11_s10, 18   ;;  %s426_s7 = smov %s351_s9 }
  0x25   : > { %s427_s8 = smov %s430_s11  ;;  %s428_s9 = smov %s434_s12 }
  0x26   :  { %10 = sbr.rel (!%p8_p8) target bundleno = 3 (0x3), region = 55 }

// kernel: _lambda_.16
= control target key start
LH: loop header
LB: loop body
LE: loop exit
PB: predicated region body
PF: predicated region fallthrough
CT: control target
= control target key end

     0   :  { %s1882_s15 = smov 0   ;;  %s1884_s16 = smov 0   ;;  %s2192_s0 = inlined_call_operand.vmem [shape: bf16[2,18,18,128], index: 0, kind: input, shape index: {}]   ;;  %s2193_s1 = inlined_call_operand.vmem [shape: bf16[9,128,128], index: 1, kind: input, shape index: {}]   ;;  %s2194_s2 = inlined_call_operand.vmem [shape: f32[1,128], index: 2, kind: input, shape index: {}]   ;;  %s2195_s3 = inlined_call_operand.vmem [shape: f32[1,128], index: 3, kind: input, shape index: {}]   ;;  %s2196_s4 = inlined_call_operand.vmem [shape: bf16[2,16,16,128], index: 4, kind: output, shape index: {}]  }
   0x1   :  { %s1886_s17 = smov 0  }
   0x2 LB: > { %s26_s18 = sadd.s32 1, %s1847_s16  ;;  %p1258_p0 = scmp.ge.s32.totalorder %s1851_s17, 1  ;;  %s1851_s17 = sphi %s1886_s17, %s14_s17   ;;  %s1847_s16 = sphi %s1884_s16, %s2198_s16   ;;  %s1843_s15 = sphi %s1882_s15, %s2197_s15  }
   0x3   : > { %p28_p1 = scmp.ge.s32.totalorder %s26_s18, 2  ;;  %p201_p2 = scmp.lt.s32.totalorder %s1851_s17, 3 }
   0x5   : > { %s2200_s18 = smov (%p28_p1, %s26_s18), 0  ;;  %p202_p3 = pnand %p1258_p0, %p201_p2 }
   0x6   : > { %p240_p4 = scmp.lt.s32.totalorder (!%p202_p3), %s1843_s15, 1  ;;  %s1920_s5 = smov (!%p202_p3), 0  }
   0x7   : > { %205 = sbr.rel (%p202_p3) target bundleno = 262 (0x106), region = 36 }
   0xc   : > { %v1903_v0 = vld [vmem:[%s2194_s2] sm:$0x1]  ;;  %s2202_s15 = smov (!%p240_p4, %s1843_s15), 1 }
   0xd   : > { %v1908_v1 = vld [vmem:[%s2195_s3] sm:$0x1]  ;;  %s1792_s23 = smul.u32 216, %s2202_s15  ;;  %s1701_s24 = sshll.u32 %s2202_s15, 7 }
   0xe   : > { %s1913_s27 = scalar_lea.vmem %s2196_s4, %s1701_s24 }
   0xf   : > { %s1918_s30 = scalar_lea.vmem %s2192_s0, %s1792_s23 }
  0x10 LB: >> { %v1721_v2 = vld [vmem:[%s2193_s1 + $0xf8] sm:$0xff]  ;;  %v1720_v5 = vld [vmem:[%s2193_s1 + $0xf0] sm:$0xff]  ;;  %v1719_v10 = vld [vmem:[%s2193_s1 + $0xe8] sm:$0xff]  ;;  %s1702_s21 = smul.u32 12, %s1855_s5  ;;  %vm825_vm0 = vcmask 1046528   ;;  %vm1090_vm1 = vcmask 1045504   ;;  %s1855_s5 = sphi %s1920_s5, %s270_s5  }
  0x11   : >> { %v1713_v3 = vld [vmem:[%s2193_s1 + $0x38] sm:$0xff]  ;;  %382 = vmatpush.bf16.msra.mxu0 %v1721_v2  ;;  %v1712_v6 = vld [vmem:[%s2193_s1 + $0x30] sm:$0xff]  ;;  %v1711_v11 = vld [vmem:[%s2193_s1 + $0x28] sm:$0xff]  ;;  %s1778_s13 = sshll.u32 %s1855_s5, 3  ;;  %s270_s5 = sadd.s32 1, %s1855_s5  }
  0x12   : >> { %v1729_v4 = vld [vmem:[%s2193_s1 + $0x1b8] sm:$0xff]  ;;  %457 = vmatpush.bf16.msra.mxu1 %v1713_v3  ;;  %v1728_v7 = vld [vmem:[%s2193_s1 + $0x1b0] sm:$0xff]  ;;  %v1727_v12 = vld [vmem:[%s2193_s1 + $0x1a8] sm:$0xff]  ;;  %s2017_s7 = scalar_lea.vmem %s1918_s30, %s1702_s21  ;;  %s1116_s14 = scalar_lea.vmem %s1913_s27, %s1778_s13 }
  0x13   : >> { %549 = vmatpush.bf16.msra.mxu2 %v1729_v4  ;;  %v1745_v8 = vld [vmem:[%s2193_s1 + $0x138] sm:$0xff]  ;;  %v1744_v9 = vld [vmem:[%s2193_s1 + $0x130] sm:$0xff]  ;;  %v1743_v13 = vld [vmem:[%s2193_s1 + $0x128] sm:$0xff]  ;;  %p267_p5 = scmp.ge.s32.totalorder %s270_s5, 16  }
  0x14   : >> { %652 = vmatpush.bf16.msra.mxu3 %v1745_v8  ;;  %v1718_v14 = vld [vmem:[%s2193_s1 + $0xe0] sm:$0xff]  ;;  %v1717_v18 = vld [vmem:[%s2193_s1 + $0xd8] sm:$0xff]  ;;  %v1716_v22 = vld [vmem:[%s2193_s1 + $0xd0] sm:$0xff] }
  0x15   : >> { %383 = vmatpush.bf16.msra.mxu0 %v1720_v5  ;;  %v1710_v15 = vld [vmem:[%s2193_s1 + $0x20] sm:$0xff]  ;;  %v1709_v19 = vld [vmem:[%s2193_s1 + $0x18] sm:$0xff]  ;;  %v1708_v23 = vld [vmem:[%s2193_s1 + $0x10] sm:$0xff] }
  0x16   : >> { %458 = vmatpush.bf16.msra.mxu1 %v1712_v6  ;;  %v1726_v16 = vld [vmem:[%s2193_s1 + $0x1a0] sm:$0xff]  ;;  %v1725_v20 = vld [vmem:[%s2193_s1 + $0x198] sm:$0xff]  ;;  %v1724_v24 = vld [vmem:[%s2193_s1 + $0x190] sm:$0xff] }
  0x17   : >> { %550 = vmatpush.bf16.msra.mxu2 %v1728_v7  ;;  %v1742_v17 = vld [vmem:[%s2193_s1 + $0x120] sm:$0xff]  ;;  %v1741_v21 = vld [vmem:[%s2193_s1 + $0x118] sm:$0xff]  ;;  %v1740_v25 = vld [vmem:[%s2193_s1 + $0x110] sm:$0xff] }
  0x18   : >> { %653 = vmatpush.bf16.msra.mxu3 %v1744_v9  ;;  %v1715_v26 = vld [vmem:[%s2193_s1 + $0xc8] sm:$0xff]  ;;  %v1714_v30 = vld [vmem:[%s2193_s1 + $0xc0] sm:$0xff]  ;;  %v1737_v33 = vld [vmem:[%s2193_s1 + $0x78] sm:$0xff] }
  0x19   : >> { %384 = vmatpush.bf16.msra.mxu0 %v1719_v10  ;;  %v1707_v27 = vld [vmem:[%s2193_s1 + $0x8] sm:$0xff]  ;;  %v1706_v31 = vld [vmem:[%s2193_s1] sm:$0xff]  ;;  %v1753_v34 = vld [vmem:[%s2193_s1 + $0x1f8] sm:$0xff] }
  0x1a   : >> { %459 = vmatpush.bf16.msra.mxu1 %v1711_v11  ;;  %v1723_v28 = vld [vmem:[%s2193_s1 + $0x188] sm:$0xff]  ;;  %v1722_v32 = vld [vmem:[%s2193_s1 + $0x180] sm:$0xff]  ;;  %v1769_v35 = vld [vmem:[%s2193_s1 + $0x178] sm:$0xff] }
  0x1b   : >> { %551 = vmatpush.bf16.msra.mxu2 %v1727_v12  ;;  %v1739_v29 = vld [vmem:[%s2193_s1 + $0x108] sm:$0xff]  ;;  %v2035_v37 = vld [vmem:[%s2017_s7] sm:$0xff]  ;;  %v2038_v38 = vld [vmem:[%s2017_s7 + $0x18] sm:$0xff] }
  0x1c   : >> { %654 = vmatpush.bf16.msra.mxu3 %v1743_v13  ;;  %v2032_v36 = vld [vmem:[%s2017_s7 + $0xc] sm:$0xff]  ;;  %v1738_v39 = vld [vmem:[%s2193_s1 + $0x100] sm:$0xff]  ;;  %v1761_v41 = vld [vmem:[%s2193_s1 + $0xb8] sm:$0xff] }
  0x1d   : >> { %385 = vmatpush.bf16.msra.mxu0 %v1718_v14  ;;  %v1736_v40 = vld [vmem:[%s2193_s1 + $0x70] sm:$0xff]  ;;  %v1735_v44 = vld [vmem:[%s2193_s1 + $0x68] sm:$0xff]  ;;  %v1734_v50 = vld [vmem:[%s2193_s1 + $0x60] sm:$0xff] }
  0x1e   : >> { %460 = vmatpush.bf16.msra.mxu1 %v1710_v15  ;;  %v1752_v42 = vld [vmem:[%s2193_s1 + $0x1f0] sm:$0xff]  ;;  %v1751_v46 = vld [vmem:[%s2193_s1 + $0x1e8] sm:$0xff]  ;;  %v1268_v52 = vld [vmem:[%s2017_s7 + $0x20] sm:$0x1] }
  0x1f   : >> { %552 = vmatpush.bf16.msra.mxu2 %v1726_v16  ;;  %v1768_v43 = vld [vmem:[%s2193_s1 + $0x170] sm:$0xff]  ;;  %v1767_v47 = vld [vmem:[%s2193_s1 + $0x168] sm:$0xff]  ;;  %v1750_v53 = vld [vmem:[%s2193_s1 + $0x1e0] sm:$0xff]  ;;  %v496_v57 = vunpack.c.l.b16 %v1268_v52 }
  0x20   : >> { %655 = vmatpush.bf16.msra.mxu3 %v1742_v17  ;;  %v1760_v45 = vld [vmem:[%s2193_s1 + $0xb0] sm:$0xff]  ;;  %v276_v49 = vld [vmem:[%s2017_s7 + $0x8] sm:$0x1]  ;;  %v1766_v54 = vld [vmem:[%s2193_s1 + $0x160] sm:$0xff] }
  0x21   : >> { %386 = vmatpush.bf16.msra.mxu0 %v1717_v18  ;;  %v1265_v48 = vld [vmem:[%s2017_s7 + $0x14] sm:$0x1]  ;;  %v1759_v51 = vld [vmem:[%s2193_s1 + $0xa8] sm:$0xff]  ;;  %v404_v56 = vunpack.c.l.b16 %v276_v49  ;;  %v1733_v58 = vld [vmem:[%s2193_s1 + $0x58] sm:$0xff]  ;;  %v2100_v2 = vpack.c.b16 %v496_v57, %v496_v57 }
  0x22   : >> { %461 = vmatpush.bf16.msra.mxu1 %v1709_v19  ;;  %v329_v55 = vunpack.c.l.b16 %v1265_v48  ;;  %v1758_v59 = vld [vmem:[%s2193_s1 + $0xa0] sm:$0xff]  ;;  %v1749_v60 = vld [vmem:[%s2193_s1 + $0x1d8] sm:$0xff]  ;;  %v1732_v3 = vld [vmem:[%s2193_s1 + $0x50] sm:$0xff] }
  0x23   : >> { %553 = vmatpush.bf16.msra.mxu2 %v1725_v20  ;;  %v1765_v61 = vld [vmem:[%s2193_s1 + $0x158] sm:$0xff]  ;;  %v2098_v63 = vpack.c.b16 %v404_v56, %v404_v56  ;;  %v1748_v5 = vld [vmem:[%s2193_s1 + $0x1d0] sm:$0xff]  ;;  %v1731_v7 = vld [vmem:[%s2193_s1 + $0x48] sm:$0xff] }
  0x24   : >> { %656 = vmatpush.bf16.msra.mxu3 %v1741_v21  ;;  %v331_v62 = vpack.c.b16 %v329_v55, %v329_v55  ;;  %v1757_v4 = vld [vmem:[%s2193_s1 + $0x98] sm:$0xff]  ;;  %v1764_v6 = vld [vmem:[%s2193_s1 + $0x150] sm:$0xff]  ;;  %v1747_v9 = vld [vmem:[%s2193_s1 + $0x1c8] sm:$0xff] }
  0x25   : >> { %387 = vmatpush.bf16.msra.mxu0 %v1716_v22  ;;  %v1756_v8 = vld [vmem:[%s2193_s1 + $0x90] sm:$0xff]  ;;  %v1763_v10 = vld [vmem:[%s2193_s1 + $0x148] sm:$0xff]  ;;  %v1730_v11 = vld [vmem:[%s2193_s1 + $0x40] sm:$0xff] }
  0x26   : >> { %462 = vmatpush.bf16.msra.mxu1 %v1708_v23  ;;  %v1755_v12 = vld [vmem:[%s2193_s1 + $0x88] sm:$0xff]  ;;  %v1746_v13 = vld [vmem:[%s2193_s1 + $0x1c0] sm:$0xff]  ;;  %v1777_v14 = vld [vmem:[%s2193_s1 + $0x238] sm:$0xff] }
  0x27   : >> { %554 = vmatpush.bf16.msra.mxu2 %v1724_v24  ;;  %v1762_v15 = vld [vmem:[%s2193_s1 + $0x140] sm:$0xff]  ;;  %v1776_v17 = vld [vmem:[%s2193_s1 + $0x230] sm:$0xff]  ;;  %v1775_v18 = vld [vmem:[%s2193_s1 + $0x228] sm:$0xff] }
  0x28   : >> { %657 = vmatpush.bf16.msra.mxu3 %v1740_v25  ;;  %v1754_v16 = vld [vmem:[%s2193_s1 + $0x80] sm:$0xff]  ;;  %v1773_v20 = vld [vmem:[%s2193_s1 + $0x218] sm:$0xff]  ;;  %v1772_v21 = vld [vmem:[%s2193_s1 + $0x210] sm:$0xff] }
  0x29   : >> { %388 = vmatpush.bf16.msra.mxu0 %v1715_v26  ;;  %v1774_v19 = vld [vmem:[%s2193_s1 + $0x220] sm:$0xff]  ;;  %v1771_v22 = vld [vmem:[%s2193_s1 + $0x208] sm:$0xff] }
  0x2a   : >> { %463 = vmatpush.bf16.msra.mxu1 %v1707_v27  ;;  %v1770_v23 = vld [vmem:[%s2193_s1 + $0x200] sm:$0xff] }
  0x2b   : >> { %555 = vmatpush.bf16.msra.mxu2 %v1723_v28 }
  0x2c   : >> { %658 = vmatpush.bf16.msra.mxu3 %v1739_v29 }
  0x2d   : >> { %389 = vmatpush.bf16.msra.mxu0 %v1714_v30 }
  0x2e   : >> { %464 = vmatpush.bf16.msra.mxu1 %v1706_v31 }
  0x2f   : >> { %556 = vmatpush.bf16.msra.mxu2 %v1722_v32 }
  0x30   : >> { %390 = vmatmul.bf16.vlgmr.msra.gmra.mxu0 %v2032_v36  ;;  %659 = vmatpush.bf16.msra.mxu3 %v1738_v39 }
  0x31   : >> { %718 = vmatpush.bf16.msrb.mxu0 %v1737_v33  ;;  %465 = vmatmul.bf16.vlgmr.msra.gmra.mxu1 %v2035_v37 }
  0x32   : >> { %801 = vmatpush.bf16.msrb.mxu1 %v1753_v34  ;;  %557 = vmatmul.bf16.vlgmr.msra.gmra.mxu2 %v2038_v38 }
  0x33   : >> { %917 = vmatpush.bf16.msrb.mxu2 %v1769_v35  ;;  %660 = vmatmul.bf16.vlgmr.msra.gmra.mxu3 %v2032_v36 }
  0x34   : >> { %983 = vmatpush.bf16.msrb.mxu3 %v1761_v41 }
  0x35   : >> { %719 = vmatpush.bf16.msrb.mxu0 %v1736_v40 }
  0x36   : >> { %802 = vmatpush.bf16.msrb.mxu1 %v1752_v42 }
  0x37   : >> { %918 = vmatpush.bf16.msrb.mxu2 %v1768_v43 }
  0x38   : >> { %984 = vmatpush.bf16.msrb.mxu3 %v1760_v45 }
  0x39   : >> { %720 = vmatpush.bf16.msrb.mxu0 %v1735_v44 }
  0x3a   : >> { %803 = vmatpush.bf16.msrb.mxu1 %v1751_v46 }
  0x3b   : >> { %919 = vmatpush.bf16.msrb.mxu2 %v1767_v47 }
  0x3c   : >> { %985 = vmatpush.bf16.msrb.mxu3 %v1759_v51 }
  0x3d   : >> { %721 = vmatpush.bf16.msrb.mxu0 %v1734_v50 }
  0x3e   : >> { %804 = vmatpush.bf16.msrb.mxu1 %v1750_v53 }
  0x3f   : >> { %920 = vmatpush.bf16.msrb.mxu2 %v1766_v54 }
  0x40   : >> { %986 = vmatpush.bf16.msrb.mxu3 %v1758_v59  ;;  %395 = vmatmul.bf16.gmra.mxu0 %v331_v62 }
  0x41   : >> { %722 = vmatpush.bf16.msrb.mxu0 %v1733_v58  ;;  %470 = vmatmul.bf16.gmra.mxu1 %v2098_v63 }
  0x42   : >> { %805 = vmatpush.bf16.msrb.mxu1 %v1749_v60  ;;  %562 = vmatmul.bf16.gmra.mxu2 %v2100_v2 }
  0x43   : >> { %921 = vmatpush.bf16.msrb.mxu2 %v1765_v61  ;;  %665 = vmatmul.bf16.gmra.mxu3 %v331_v62 }
  0x44   : >> { %987 = vmatpush.bf16.msrb.mxu3 %v1757_v4 }
  0x45   : >> { %723 = vmatpush.bf16.msrb.mxu0 %v1732_v3 }
  0x46   : >> { %806 = vmatpush.bf16.msrb.mxu1 %v1748_v5 }
  0x47   : >> { %922 = vmatpush.bf16.msrb.mxu2 %v1764_v6 }
  0x48   : >> { %988 = vmatpush.bf16.msrb.mxu3 %v1756_v8 }
  0x49   : >> { %724 = vmatpush.bf16.msrb.mxu0 %v1731_v7 }
  0x4a   : >> { %807 = vmatpush.bf16.msrb.mxu1 %v1747_v9 }
  0x4b   : >> { %923 = vmatpush.bf16.msrb.mxu2 %v1763_v10 }
  0x4c   : >> { %989 = vmatpush.bf16.msrb.mxu3 %v1755_v12 }
  0x4d   : >> { %725 = vmatpush.bf16.msrb.mxu0 %v1730_v11 }
  0x4e   : >> { %808 = vmatpush.bf16.msrb.mxu1 %v1746_v13 }
  0x4f   : >> { %924 = vmatpush.bf16.msrb.mxu2 %v1762_v15 }
  0x50   : >> { %990 = vmatpush.bf16.msrb.mxu3 %v1754_v16  ;;  %726 = vmatmul.bf16.vlgmr.msrb.gmra.mxu0 %v2035_v37 }
  0x51   : >> { %1066 = vmatpush.bf16.msra.mxu0 %v1777_v14  ;;  %809 = vmatmul.bf16.vlgmr.msrb.gmra.mxu1 %v2038_v38 }
  0x52   : >> { %1784 = vmatpush.bf16.msra.mxu1 %v1777_v14  ;;  %925 = vmatmul.bf16.vlgmr.msrb.gmra.mxu2 %v2032_v36 }
  0x53   : >> { %991 = vmatmul.bf16.vlgmr.msrb.gmra.mxu3 %v2035_v37 }
  0x55   : >> { %1067 = vmatpush.bf16.msra.mxu0 %v1776_v17 }
  0x56   : >> { %1785 = vmatpush.bf16.msra.mxu1 %v1776_v17 }
  0x59   : >> { %1068 = vmatpush.bf16.msra.mxu0 %v1775_v18 }
  0x5a   : >> { %1786 = vmatpush.bf16.msra.mxu1 %v1775_v18 }
  0x5d   : >> { %1069 = vmatpush.bf16.msra.mxu0 %v1774_v19 }
  0x5e   : >> { %1787 = vmatpush.bf16.msra.mxu1 %v1774_v19 }
  0x60   : >> { %731 = vmatmul.bf16.gmra.mxu0 %v2098_v63 }
  0x61   : >> { %1070 = vmatpush.bf16.msra.mxu0 %v1773_v20  ;;  %814 = vmatmul.bf16.gmra.mxu1 %v2100_v2 }
  0x62   : >> { %1788 = vmatpush.bf16.msra.mxu1 %v1773_v20  ;;  %930 = vmatmul.bf16.gmra.mxu2 %v331_v62 }
  0x63   : >> { %996 = vmatmul.bf16.gmra.mxu3 %v2098_v63 }
  0x65   : >> { %1071 = vmatpush.bf16.msra.mxu0 %v1772_v21 }
  0x66   : >> { %1789 = vmatpush.bf16.msra.mxu1 %v1772_v21 }
  0x69   : >> { %1072 = vmatpush.bf16.msra.mxu0 %v1771_v22 }
  0x6a   : >> { %1790 = vmatpush.bf16.msra.mxu1 %v1771_v22 }
  0x6d   : >> { %1073 = vmatpush.bf16.msra.mxu0 %v1770_v23 }
  0x6e   : >> { %1791 = vmatpush.bf16.msra.mxu1 %v1770_v23 }
  0x70   : >> { %1074 = vmatmul.bf16.vlgmr.msra.gmra.mxu0 %v2038_v38 }
  0x71   : >> { %1079 = vmatmul.bf16.vlgmr.msra.gmra.mxu1 %v2100_v2 }
  0xad   : >> { %v391_v24 = vpop.f32.mrf.mxu0 }
  0xae   : >> { %v466_v25 = vpop.f32.mrf.mxu1 }
  0xaf   : >> { %v467_v26 = vadd.f32 %v466_v25, %v391_v24  ;;  %v1101_v24 = vperm.slane %v1903_v0, 0 }
  0xb5   : >> { %v558_v27 = vpop.f32.mrf.mxu2  ;;  %v393_v29 = vpop.f32.mrf.mxu0 }
  0xb6   : >> { %v566_v28 = vadd.f32 %v558_v27, %v467_v26  ;;  %v468_v30 = vpop.f32.mrf.mxu1  ;;  %v661_v31 = vpop.f32.mrf.mxu3 }
  0xb7   : >> { %v469_v12 = vadd.f32 %v468_v30, %v393_v29  ;;  %v1106_v30 = vperm.slane %v1908_v1, 0 }
  0xbd   : >> { %v560_v32 = vpop.f32.mrf.mxu2  ;;  %v396_v33 = vpop.f32.mrf.mxu0 }
  0xbe   : >> { %v471_v34 = vpop.f32.mrf.mxu1  ;;  %v663_v35 = vpop.f32.mrf.mxu3  ;;  %v567_v19 = vadd.f32 %v560_v32, %v469_v12 }
  0xc5   : >> { %v563_v36 = vpop.f32.mrf.mxu2  ;;  %v397_v37 = vpop.f32.mrf.mxu0 }
  0xc6   : >> { %v472_v39 = vpop.f32.mrf.mxu1  ;;  %v666_v40 = vpop.f32.mrf.mxu3 }
  0xcd   : >> { %v564_v41 = vpop.f32.mrf.mxu2  ;;  %v727_v38 = vpop.f32.mrf.mxu0 }
  0xce   : >> { %v810_v42 = vpop.f32.mrf.mxu1  ;;  %v668_v43 = vpop.f32.mrf.mxu3  ;;  %v728_v58 = vadd.f32 %v727_v38, %v661_v31 }
  0xd0   : >> { %v819_v4 = vadd.f32 %v810_v42, %v728_v58 }
  0xd2   : >> { %v826_v9 = vrot.slane %v819_v4, 1 }
  0xd5   : >> { %v926_v44 = vpop.f32.mrf.mxu2  ;;  %v729_v45 = vpop.f32.mrf.mxu0 }
  0xd6   : >> { %v812_v46 = vpop.f32.mrf.mxu1  ;;  %v992_v47 = vpop.f32.mrf.mxu3  ;;  %v730_v56 = vadd.f32 %v729_v45, %v663_v35 }
  0xd7   : >> { %v993_v6 = vadd.f32 %v992_v47, %v926_v44 }
  0xd8   : >> { %v820_v62 = vadd.f32 %v812_v46, %v730_v56 }
  0xda   : >> { %v827_v5 = vrot.slane %v820_v62, 1 }
  0xdc   : >> { %v828_v15 = vsel %vm825_vm0, %v826_v9, %v827_v5 }
  0xdd   : >> { %v928_v48 = vpop.f32.mrf.mxu2  ;;  %v732_v49 = vpop.f32.mrf.mxu0  ;;  %v833_v22 = vadd.f32 %v828_v15, %v566_v28 }
  0xde   : >> { %v815_v50 = vpop.f32.mrf.mxu1  ;;  %v994_v51 = vpop.f32.mrf.mxu3  ;;  %v733_v57 = vadd.f32 %v732_v49, %v666_v40 }
  0xdf   : >> { %v995_v10 = vadd.f32 %v994_v51, %v928_v48 }
  0xe0   : >> { %v821_v63 = vadd.f32 %v815_v50, %v733_v57 }
  0xe2   : >> { %v829_v7 = vrot.slane %v821_v63, 1 }
  0xe4   : >> { %v830_v16 = vsel %vm825_vm0, %v827_v5, %v829_v7 }
  0xe5   : >> { %v931_v52 = vpop.f32.mrf.mxu2  ;;  %v734_v53 = vpop.f32.mrf.mxu0  ;;  %v834_v23 = vadd.f32 %v830_v16, %v567_v19 }
  0xe6   : >> { %v817_v54 = vpop.f32.mrf.mxu1  ;;  %v997_v55 = vpop.f32.mrf.mxu3 }
  0xe7   : >> { %v998_v2 = vadd.f32 %v997_v55, %v931_v52 }
  0xed   : >> { %v933_v59 = vpop.f32.mrf.mxu2  ;;  %v1075_v60 = vpop.f32.mrf.mxu0 }
  0xee   : >> { %v1080_v61 = vpop.f32.mrf.mxu1  ;;  %v999_v3 = vpop.f32.mrf.mxu3  ;;  %v1084_v11 = vadd.f32 %v1075_v60, %v993_v6 }
  0xef   : >> { %v1086_v8 = vadd.f32 %v1080_v61, %v998_v2 }
  0xf0   : >> { %v1091_v20 = vrot.slane %v1084_v11, 2 }
  0xf1   : >> { %v1094_v17 = vrot.slane %v1086_v8, 2 }
  0xf5   : >> { %v1077_v13 = vpop.f32.mrf.mxu0 }
  0xf6   : >> { %v1082_v14 = vpop.f32.mrf.mxu1  ;;  %v1085_v18 = vadd.f32 %v1077_v13, %v995_v10 }
  0xf8   : >> { %v1092_v21 = vrot.slane %v1085_v18, 2 }
  0xfa   : >> { %v1093_v25 = vsel %vm1090_vm1, %v1091_v20, %v1092_v21  ;;  %v1095_v26 = vsel %vm1090_vm1, %v1092_v21, %v1094_v17 }
  0xfb   : >> { %v1098_v27 = vadd.f32 %v1093_v25, %v833_v22  ;;  %v1099_v29 = vadd.f32 %v1095_v26, %v834_v23 }
  0xfd   : >> { %v1103_v31 = vmul.f32 %v1101_v24, %v1098_v27  ;;  %v1104_v33 = vmul.f32 %v1101_v24, %v1099_v29 }
  0xff   : >> { %v1108_v34 = vadd.f32 %v1106_v30, %v1103_v31  ;;  %v1109_v35 = vadd.f32 %v1106_v30, %v1104_v33 }
 0x101   : >> { %v1110_v32 = vmax.f32 %v1108_v34, 0.0  ;;  %v1111_v36 = vmax.f32 %v1109_v35, 0.0  ;;  %269 = sbr.rel (!%p267_p5) target bundleno = 16 (0x10), region = 94 }
 0x103   : >> { %v1782_v37 = vpack.c.bf16 %v1111_v36, %v1110_v32 }
 0x105   : >> { %1783 = vst [vmem:[%s1116_s14] sm:$0xff] %v1782_v37  }
 0x106 PF: > { %s14_s17 = sadd.s32 1, %s1851_s17   ;;  %s2197_s15 = smov %s1847_s16 }
 0x107   : > { %p11_p6 = scmp.ge.s32.totalorder %s14_s17, 4   ;;  %s2198_s16 = smov %s2200_s18 }
 0x109   :  { %13 = sbr.rel (!%p11_p6) target bundleno = 2 (0x2), region = 105 }

// kernel: _lambda_.20
= control target key start
LH: loop header
LB: loop body
LE: loop exit
PB: predicated region body
PF: predicated region fallthrough
CT: control target
= control target key end

     0   :  { %s374_s6 = smov 0   ;;  %s376_s7 = smov 0   ;;  %s430_s0 = inlined_call_operand.vmem [shape: bf16[2,8,4,256], index: 0, kind: input, shape index: {}]   ;;  %s431_s1 = inlined_call_operand.vmem [shape: bf16[2,4,4,128], index: 1, kind: output, shape index: {}]  }
   0x1   :  { %s378_s8 = smov 0   ;;  %s380_s9 = smov 0  }
   0x2   :  { %s382_s10 = smov 0  }
   0x3 LB: > { %s20_s11 = sadd.s32 1, %s354_s8  ;;  %s23_s12 = sadd.s32 1, %s358_s9  ;;  %s362_s10 = sphi %s382_s10, %s11_s10   ;;  %s358_s9 = sphi %s380_s9, %s435_s9   ;;  %s354_s8 = sphi %s378_s8, %s434_s8   ;;  %s350_s7 = sphi %s376_s7, %s433_s7   ;;  %s346_s6 = sphi %s374_s6, %s432_s6  }
   0x4   : > { %p21_p0 = scmp.ge.s32.totalorder %s20_s11, 4  ;;  %p270_p1 = scmp.ge.s32.totalorder %s362_s10, 1 }
   0x5   : > { %p109_p2 = scmp.lt.s32.totalorder %s362_s10, 9 }
   0x6   : > { %s437_s11 = smov (%p21_p0, %s20_s11), 0  ;;  %s439_s12 = smov (!%p21_p0, %s23_s12), %s358_s9 }
   0x7   : > { %p110_p3 = pnand %p270_p1, %p109_p2  ;;  %p25_p4 = scmp.ge.s32.totalorder %s439_s12, 2 }
   0x8   : > { %s271_s13 = sshll.u32 (!%p110_p3), %s346_s6, 1  ;;  %p138_p5 = scmp.lt.s32.totalorder (!%p110_p3), %s350_s7, 1 }
   0x9   : > { %s441_s12 = smov (%p25_p4, %s439_s12), 0  ;;  %113 = sbr.rel (%p110_p3) target bundleno = 43 (0x2b), region = 24 }
   0xa   : > { %p140_p6 = scmp.lt.s32.totalorder (!%p110_p3), %s271_s13, 7  ;;  %p150_p7 = scmp.lt.s32.totalorder (!%p110_p3), %s346_s6, 3 }
   0xe   : > { %s443_s7 = smov (!%p138_p5, %s350_s7), 1  ;;  %s445_s13 = smov (!%p140_p6, %s271_s13), 7 }
   0xf   : > { %s273_s14 = sshll.u32 %s443_s7, 4  ;;  %s272_s15 = sshll.u32 %s445_s13, 1 }
  0x10   : > { %s144_s16 = sadd.s32 %s273_s14, %s272_s15  ;;  %s447_s6 = smov (!%p150_p7, %s346_s6), 3 }
  0x11   : > { %s274_s17 = sshll.u32 %s144_s16, 1  ;;  %s275_s21 = sshll.u32 %s443_s7, 2 }
  0x12   : > { %s146_s20 = scalar_lea.vmem %s430_s0, %s274_s17  ;;  %s153_s22 = sadd.s32 %s275_s21, %s447_s6 }
  0x13   : > { %v281_v0 = vld [vmem:[%s146_s20] sm:$0xff]   ;;  %s276_s23 = sshll.u32 %s153_s22, 1 }
  0x14   : > { %v282_v1 = vunpack.c.l.bf16 %v281_v0  ;;  %v283_v2 = vunpack.c.h.bf16 %v281_v0  ;;  %s155_s26 = scalar_lea.vmem %s431_s1, %s276_s23 }
  0x16   : > { %v161_v3 = vmax.f32 %v282_v1, %v283_v2 }
  0x18   : > { %163 = vst [vmem:[#allocation1] ss:$2 sm:$0xff] %v161_v3 }
  0x1f   : > { %v164_v4 = vld.sshfl [vmem:[#allocation1] sm:$0xff pattern:$0x75316420]  ;;  %v165_v5 = vld.sshfl [vmem:[#allocation1 + $0x8] sm:$0xff pattern:$0x75316420] }
  0x20   : > { %v168_v6 = vpack.c.bf16 %v165_v5, %v164_v4 }
  0x22   : > { %v171_v7 = vrot.slane %v168_v6, 4 }
  0x24   : > { %v173_v8 = vunpack.c.l.bf16 %v171_v7 }
  0x26   : > { %v174_v9 = vmax.f32 %v164_v4, %v173_v8 }
  0x28   : > { %v175_v10 = vpack.c.bf16 %v174_v9, %v174_v9 }
  0x2a   : > { %176 = vst [vmem:[%s155_s26] sm:$0x3] %v175_v10 }
  0x2b PF: > { %s11_s10 = sadd.s32 1, %s362_s10   ;;  %s432_s6 = smov %s354_s8 }
  0x2c   : > { %p8_p8 = scmp.ge.s32.totalorder %s11_s10, 10   ;;  %s433_s7 = smov %s358_s9 }
  0x2d   : > { %s434_s8 = smov %s437_s11  ;;  %s435_s9 = smov %s441_s12 }
  0x2e   :  { %10 = sbr.rel (!%p8_p8) target bundleno = 3 (0x3), region = 55 }

// kernel: _lambda_.18
= control target key start
LH: loop header
LB: loop body
LE: loop exit
PB: predicated region body
PF: predicated region fallthrough
CT: control target
= control target key end

     0   :  { %s1797_s15 = smov 0   ;;  %s1799_s16 = smov 0   ;;  %s2089_s0 = inlined_call_operand.vmem [shape: bf16[2,10,10,128], index: 0, kind: input, shape index: {}]   ;;  %s2090_s1 = inlined_call_operand.vmem [shape: bf16[9,128,128], index: 1, kind: input, shape index: {}]   ;;  %s2091_s2 = inlined_call_operand.vmem [shape: f32[1,128], index: 2, kind: input, shape index: {}]   ;;  %s2092_s3 = inlined_call_operand.vmem [shape: f32[1,128], index: 3, kind: input, shape index: {}]   ;;  %s2093_s4 = inlined_call_operand.vmem [shape: bf16[2,8,8,128], index: 4, kind: output, shape index: {}]  }
   0x1   :  { %s1801_s17 = smov 0  }
   0x2 LB: > { %s26_s18 = sadd.s32 1, %s1762_s16  ;;  %p1187_p0 = scmp.ge.s32.totalorder %s1766_s17, 1  ;;  %s1766_s17 = sphi %s1801_s17, %s14_s17   ;;  %s1762_s16 = sphi %s1799_s16, %s2095_s16   ;;  %s1758_s15 = sphi %s1797_s15, %s2094_s15  }
   0x3   : > { %p28_p1 = scmp.ge.s32.totalorder %s26_s18, 2  ;;  %p201_p2 = scmp.lt.s32.totalorder %s1766_s17, 3 }
   0x5   : > { %s2097_s18 = smov (%p28_p1, %s26_s18), 0  ;;  %p202_p3 = pnand %p1187_p0, %p201_p2 }
   0x6   : > { %p240_p4 = scmp.lt.s32.totalorder (!%p202_p3), %s1758_s15, 1  ;;  %s1835_s5 = smov (!%p202_p3), 0  }
   0x7   : > { %205 = sbr.rel (%p202_p3) target bundleno = 262 (0x106), region = 36 }
   0xc   : > { %v1818_v0 = vld [vmem:[%s2091_s2] sm:$0x1]  ;;  %s2099_s15 = smov (!%p240_p4, %s1758_s15), 1 }
   0xd   : > { %v1823_v1 = vld [vmem:[%s2092_s3] sm:$0x1]  ;;  %s1707_s23 = smul.u32 80, %s2099_s15  ;;  %s1630_s24 = sshll.u32 %s2099_s15, 5 }
   0xe   : > { %s1828_s27 = scalar_lea.vmem %s2093_s4, %s1630_s24 }
   0xf   : > { %s1833_s30 = scalar_lea.vmem %s2089_s0, %s1707_s23 }
  0x10 LB: >> { %v1650_v2 = vld [vmem:[%s2090_s1 + $0xf8] sm:$0xff]  ;;  %v1649_v4 = vld [vmem:[%s2090_s1 + $0xf0] sm:$0xff]  ;;  %v1648_v10 = vld [vmem:[%s2090_s1 + $0xe8] sm:$0xff]  ;;  %s1631_s14 = sshll.u32 %s1770_s5, 3  ;;  %vm782_vm0 = vcmask 1046528   ;;  %vm1029_vm1 = vcmask 1045504   ;;  %s1770_s5 = sphi %s1835_s5, %s270_s5  }
  0x11   : >> { %v1642_v3 = vld [vmem:[%s2090_s1 + $0x38] sm:$0xff]  ;;  %375 = vmatpush.bf16.msra.mxu0 %v1650_v2  ;;  %v1641_v5 = vld [vmem:[%s2090_s1 + $0x30] sm:$0xff]  ;;  %v1640_v11 = vld [vmem:[%s2090_s1 + $0x28] sm:$0xff]  ;;  %s273_s22 = scalar_lea.vmem %s1833_s30, %s1631_s14  ;;  %s1627_s12 = sshll.u32 %s1770_s5, 2 }
  0x12   : >> { %442 = vmatpush.bf16.msra.mxu1 %v1642_v3  ;;  %v1658_v6 = vld [vmem:[%s2090_s1 + $0x1b8] sm:$0xff]  ;;  %v1657_v8 = vld [vmem:[%s2090_s1 + $0x1b0] sm:$0xff]  ;;  %v1656_v12 = vld [vmem:[%s2090_s1 + $0x1a8] sm:$0xff]  ;;  %s1046_s13 = scalar_lea.vmem %s1828_s27, %s1627_s12  ;;  %s270_s5 = sadd.s32 1, %s1770_s5  }
  0x13   : >> { %v1674_v7 = vld [vmem:[%s2090_s1 + $0x138] sm:$0xff]  ;;  %526 = vmatpush.bf16.msra.mxu2 %v1658_v6  ;;  %v1673_v9 = vld [vmem:[%s2090_s1 + $0x130] sm:$0xff]  ;;  %v1672_v13 = vld [vmem:[%s2090_s1 + $0x128] sm:$0xff]  ;;  %p267_p5 = scmp.ge.s32.totalorder %s270_s5, 8  }
  0x14   : >> { %623 = vmatpush.bf16.msra.mxu3 %v1674_v7  ;;  %v1647_v14 = vld [vmem:[%s2090_s1 + $0xe0] sm:$0xff]  ;;  %v1646_v18 = vld [vmem:[%s2090_s1 + $0xd8] sm:$0xff]  ;;  %v1645_v22 = vld [vmem:[%s2090_s1 + $0xd0] sm:$0xff] }
  0x15   : >> { %376 = vmatpush.bf16.msra.mxu0 %v1649_v4  ;;  %v1639_v15 = vld [vmem:[%s2090_s1 + $0x20] sm:$0xff]  ;;  %v1638_v19 = vld [vmem:[%s2090_s1 + $0x18] sm:$0xff]  ;;  %v1637_v23 = vld [vmem:[%s2090_s1 + $0x10] sm:$0xff] }
  0x16   : >> { %443 = vmatpush.bf16.msra.mxu1 %v1641_v5  ;;  %v1655_v16 = vld [vmem:[%s2090_s1 + $0x1a0] sm:$0xff]  ;;  %v1654_v20 = vld [vmem:[%s2090_s1 + $0x198] sm:$0xff]  ;;  %v1653_v24 = vld [vmem:[%s2090_s1 + $0x190] sm:$0xff] }
  0x17   : >> { %527 = vmatpush.bf16.msra.mxu2 %v1657_v8  ;;  %v1671_v17 = vld [vmem:[%s2090_s1 + $0x120] sm:$0xff]  ;;  %v1670_v21 = vld [vmem:[%s2090_s1 + $0x118] sm:$0xff]  ;;  %v1669_v25 = vld [vmem:[%s2090_s1 + $0x110] sm:$0xff] }
  0x18   : >> { %624 = vmatpush.bf16.msra.mxu3 %v1673_v9  ;;  %v1644_v26 = vld [vmem:[%s2090_s1 + $0xc8] sm:$0xff]  ;;  %v1643_v30 = vld [vmem:[%s2090_s1 + $0xc0] sm:$0xff]  ;;  %v1666_v31 = vld [vmem:[%s2090_s1 + $0x78] sm:$0xff] }
  0x19   : >> { %377 = vmatpush.bf16.msra.mxu0 %v1648_v10  ;;  %v1636_v27 = vld [vmem:[%s2090_s1 + $0x8] sm:$0xff]  ;;  %v1635_v32 = vld [vmem:[%s2090_s1] sm:$0xff]  ;;  %v1682_v33 = vld [vmem:[%s2090_s1 + $0x1f8] sm:$0xff] }
  0x1a   : >> { %444 = vmatpush.bf16.msra.mxu1 %v1640_v11  ;;  %v1652_v28 = vld [vmem:[%s2090_s1 + $0x188] sm:$0xff]  ;;  %v1253_v36 = vld [vmem:[%s273_s22] sm:$0xf]  ;;  %v1632_v37 = vld [vmem:[%s273_s22] sm:$0x10] }
  0x1b   : >> { %528 = vmatpush.bf16.msra.mxu2 %v1656_v12  ;;  %v1668_v29 = vld [vmem:[%s2090_s1 + $0x108] sm:$0xff]  ;;  %v1651_v38 = vld [vmem:[%s2090_s1 + $0x180] sm:$0xff]  ;;  %v1698_v40 = vld [vmem:[%s2090_s1 + $0x178] sm:$0xff]  ;;  %v1952_v45 = vor.u32 %v1632_v37, %v1253_v36 }
  0x1c   : >> { %625 = vmatpush.bf16.msra.mxu3 %v1672_v13  ;;  %v1217_v34 = vld [vmem:[%s273_s22 + $0x8] sm:$0xf]  ;;  %v1633_v35 = vld [vmem:[%s273_s22 + $0x8] sm:$0x10]  ;;  %v1667_v39 = vld [vmem:[%s2090_s1 + $0x100] sm:$0xff] }
  0x1d   : >> { %378 = vmatpush.bf16.msra.mxu0 %v1647_v14  ;;  %v1690_v41 = vld [vmem:[%s2090_s1 + $0xb8] sm:$0xff]  ;;  %v1305_v42 = vld [vmem:[%s273_s22 + $0x10] sm:$0xf]  ;;  %v1634_v43 = vld [vmem:[%s273_s22 + $0x10] sm:$0x10]  ;;  %v1950_v44 = vor.u32 %v1633_v35, %v1217_v34 }
  0x1e   : >> { %445 = vmatpush.bf16.msra.mxu1 %v1639_v15  ;;  %v1665_v46 = vld [vmem:[%s2090_s1 + $0x70] sm:$0xff]  ;;  %v1960_v48 = vor.u32 %v1634_v43, %v1305_v42  ;;  %v1664_v51 = vld [vmem:[%s2090_s1 + $0x68] sm:$0xff]  ;;  %v1663_v55 = vld [vmem:[%s2090_s1 + $0x60] sm:$0xff] }
  0x1f   : >> { %529 = vmatpush.bf16.msra.mxu2 %v1655_v16  ;;  %v1681_v47 = vld [vmem:[%s2090_s1 + $0x1f0] sm:$0xff]  ;;  %v1680_v52 = vld [vmem:[%s2090_s1 + $0x1e8] sm:$0xff]  ;;  %v1679_v56 = vld [vmem:[%s2090_s1 + $0x1e0] sm:$0xff] }
  0x20   : >> { %626 = vmatpush.bf16.msra.mxu3 %v1671_v17  ;;  %v1697_v49 = vld [vmem:[%s2090_s1 + $0x170] sm:$0xff]  ;;  %v1696_v53 = vld [vmem:[%s2090_s1 + $0x168] sm:$0xff]  ;;  %v1695_v57 = vld [vmem:[%s2090_s1 + $0x160] sm:$0xff] }
  0x21   : >> { %379 = vmatpush.bf16.msra.mxu0 %v1646_v18  ;;  %v1689_v50 = vld [vmem:[%s2090_s1 + $0xb0] sm:$0xff]  ;;  %v1688_v54 = vld [vmem:[%s2090_s1 + $0xa8] sm:$0xff]  ;;  %v1687_v58 = vld [vmem:[%s2090_s1 + $0xa0] sm:$0xff] }
  0x22   : >> { %446 = vmatpush.bf16.msra.mxu1 %v1638_v19  ;;  %v1662_v59 = vld [vmem:[%s2090_s1 + $0x58] sm:$0xff]  ;;  %v1661_v63 = vld [vmem:[%s2090_s1 + $0x50] sm:$0xff]  ;;  %v1660_v5 = vld [vmem:[%s2090_s1 + $0x48] sm:$0xff] }
  0x23   : >> { %530 = vmatpush.bf16.msra.mxu2 %v1654_v20  ;;  %v1678_v60 = vld [vmem:[%s2090_s1 + $0x1d8] sm:$0xff]  ;;  %v1677_v2 = vld [vmem:[%s2090_s1 + $0x1d0] sm:$0xff]  ;;  %v1676_v6 = vld [vmem:[%s2090_s1 + $0x1c8] sm:$0xff] }
  0x24   : >> { %627 = vmatpush.bf16.msra.mxu3 %v1670_v21  ;;  %v1694_v61 = vld [vmem:[%s2090_s1 + $0x158] sm:$0xff]  ;;  %v1693_v3 = vld [vmem:[%s2090_s1 + $0x150] sm:$0xff]  ;;  %v1692_v7 = vld [vmem:[%s2090_s1 + $0x148] sm:$0xff] }
  0x25   : >> { %380 = vmatpush.bf16.msra.mxu0 %v1645_v22  ;;  %v1686_v62 = vld [vmem:[%s2090_s1 + $0x98] sm:$0xff]  ;;  %v1685_v4 = vld [vmem:[%s2090_s1 + $0x90] sm:$0xff]  ;;  %v1684_v8 = vld [vmem:[%s2090_s1 + $0x88] sm:$0xff] }
  0x26   : >> { %447 = vmatpush.bf16.msra.mxu1 %v1637_v23  ;;  %v1659_v9 = vld [vmem:[%s2090_s1 + $0x40] sm:$0xff]  ;;  %v1706_v11 = vld [vmem:[%s2090_s1 + $0x238] sm:$0xff]  ;;  %v1705_v14 = vld [vmem:[%s2090_s1 + $0x230] sm:$0xff] }
  0x27   : >> { %531 = vmatpush.bf16.msra.mxu2 %v1653_v24  ;;  %v1675_v10 = vld [vmem:[%s2090_s1 + $0x1c0] sm:$0xff]  ;;  %v1704_v15 = vld [vmem:[%s2090_s1 + $0x228] sm:$0xff]  ;;  %v1702_v17 = vld [vmem:[%s2090_s1 + $0x218] sm:$0xff] }
  0x28   : >> { %628 = vmatpush.bf16.msra.mxu3 %v1669_v25  ;;  %v1691_v12 = vld [vmem:[%s2090_s1 + $0x140] sm:$0xff]  ;;  %v1701_v18 = vld [vmem:[%s2090_s1 + $0x210] sm:$0xff]  ;;  %v1700_v19 = vld [vmem:[%s2090_s1 + $0x208] sm:$0xff] }
  0x29   : >> { %381 = vmatpush.bf16.msra.mxu0 %v1644_v26  ;;  %v1683_v13 = vld [vmem:[%s2090_s1 + $0x80] sm:$0xff] }
  0x2a   : >> { %448 = vmatpush.bf16.msra.mxu1 %v1636_v27  ;;  %v1703_v16 = vld [vmem:[%s2090_s1 + $0x220] sm:$0xff] }
  0x2b   : >> { %532 = vmatpush.bf16.msra.mxu2 %v1652_v28  ;;  %v1699_v20 = vld [vmem:[%s2090_s1 + $0x200] sm:$0xff] }
  0x2c   : >> { %629 = vmatpush.bf16.msra.mxu3 %v1668_v29 }
  0x2d   : >> { %382 = vmatpush.bf16.msra.mxu0 %v1643_v30 }
  0x2e   : >> { %449 = vmatpush.bf16.msra.mxu1 %v1635_v32 }
  0x2f   : >> { %533 = vmatpush.bf16.msra.mxu2 %v1651_v38 }
  0x30   : >> { %630 = vmatpush.bf16.msra.mxu3 %v1667_v39  ;;  %383 = vmatmul.bf16.vlgmr.msra.gmra.mxu0 %v1950_v44 }
  0x31   : >> { %685 = vmatpush.bf16.msrb.mxu0 %v1666_v31  ;;  %450 = vmatmul.bf16.vlgmr.msra.gmra.mxu1 %v1952_v45 }
  0x32   : >> { %764 = vmatpush.bf16.msrb.mxu1 %v1682_v33  ;;  %534 = vmatmul.bf16.vlgmr.msra.gmra.mxu2 %v1960_v48 }
  0x33   : >> { %870 = vmatpush.bf16.msrb.mxu2 %v1698_v40  ;;  %631 = vmatmul.bf16.vlgmr.msra.gmra.mxu3 %v1950_v44 }
  0x34   : >> { %932 = vmatpush.bf16.msrb.mxu3 %v1690_v41 }
  0x35   : >> { %686 = vmatpush.bf16.msrb.mxu0 %v1665_v46 }
  0x36   : >> { %765 = vmatpush.bf16.msrb.mxu1 %v1681_v47 }
  0x37   : >> { %871 = vmatpush.bf16.msrb.mxu2 %v1697_v49 }
  0x38   : >> { %933 = vmatpush.bf16.msrb.mxu3 %v1689_v50 }
  0x39   : >> { %687 = vmatpush.bf16.msrb.mxu0 %v1664_v51 }
  0x3a   : >> { %766 = vmatpush.bf16.msrb.mxu1 %v1680_v52 }
  0x3b   : >> { %872 = vmatpush.bf16.msrb.mxu2 %v1696_v53 }
  0x3c   : >> { %934 = vmatpush.bf16.msrb.mxu3 %v1688_v54 }
  0x3d   : >> { %688 = vmatpush.bf16.msrb.mxu0 %v1663_v55  ;;  %v1036_v55 = vperm.slane %v1818_v0, 0 }
  0x3e   : >> { %767 = vmatpush.bf16.msrb.mxu1 %v1679_v56 }
  0x3f   : >> { %873 = vmatpush.bf16.msrb.mxu2 %v1695_v57 }
  0x40   : >> { %935 = vmatpush.bf16.msrb.mxu3 %v1687_v58  ;;  %v1040_v58 = vperm.slane %v1823_v1, 0 }
  0x41   : >> { %689 = vmatpush.bf16.msrb.mxu0 %v1662_v59 }
  0x42   : >> { %768 = vmatpush.bf16.msrb.mxu1 %v1678_v60 }
  0x43   : >> { %874 = vmatpush.bf16.msrb.mxu2 %v1694_v61 }
  0x44   : >> { %936 = vmatpush.bf16.msrb.mxu3 %v1686_v62 }
  0x45   : >> { %690 = vmatpush.bf16.msrb.mxu0 %v1661_v63 }
  0x46   : >> { %769 = vmatpush.bf16.msrb.mxu1 %v1677_v2 }
  0x47   : >> { %875 = vmatpush.bf16.msrb.mxu2 %v1693_v3 }
  0x48   : >> { %937 = vmatpush.bf16.msrb.mxu3 %v1685_v4 }
  0x49   : >> { %691 = vmatpush.bf16.msrb.mxu0 %v1660_v5 }
  0x4a   : >> { %770 = vmatpush.bf16.msrb.mxu1 %v1676_v6 }
  0x4b   : >> { %876 = vmatpush.bf16.msrb.mxu2 %v1692_v7 }
  0x4c   : >> { %938 = vmatpush.bf16.msrb.mxu3 %v1684_v8 }
  0x4d   : >> { %692 = vmatpush.bf16.msrb.mxu0 %v1659_v9 }
  0x4e   : >> { %771 = vmatpush.bf16.msrb.mxu1 %v1675_v10 }
  0x4f   : >> { %877 = vmatpush.bf16.msrb.mxu2 %v1691_v12 }
  0x50   : >> { %939 = vmatpush.bf16.msrb.mxu3 %v1683_v13  ;;  %693 = vmatmul.bf16.vlgmr.msrb.gmra.mxu0 %v1952_v45 }
  0x51   : >> { %1011 = vmatpush.bf16.msra.mxu0 %v1706_v11  ;;  %772 = vmatmul.bf16.vlgmr.msrb.gmra.mxu1 %v1960_v48 }
  0x52   : >> { %878 = vmatmul.bf16.vlgmr.msrb.gmra.mxu2 %v1950_v44 }
  0x53   : >> { %940 = vmatmul.bf16.vlgmr.msrb.gmra.mxu3 %v1952_v45 }
  0x55   : >> { %1012 = vmatpush.bf16.msra.mxu0 %v1705_v14 }
  0x59   : >> { %1013 = vmatpush.bf16.msra.mxu0 %v1704_v15 }
  0x5d   : >> { %1014 = vmatpush.bf16.msra.mxu0 %v1703_v16 }
  0x61   : >> { %1015 = vmatpush.bf16.msra.mxu0 %v1702_v17 }
  0x65   : >> { %1016 = vmatpush.bf16.msra.mxu0 %v1701_v18 }
  0x69   : >> { %1017 = vmatpush.bf16.msra.mxu0 %v1700_v19 }
  0x6d   : >> { %1018 = vmatpush.bf16.msra.mxu0 %v1699_v20 }
  0x70   : >> { %1019 = vmatmul.bf16.vlgmr.msra.gmra.mxu0 %v1960_v48 }
  0xad   : >> { %v384_v21 = vpop.f32.mrf.mxu0 }
  0xae   : >> { %v451_v22 = vpop.f32.mrf.mxu1 }
  0xaf   : >> { %v452_v23 = vadd.f32 %v451_v22, %v384_v21 }
  0xb5   : >> { %v386_v24 = vpop.f32.mrf.mxu0  ;;  %v535_v26 = vpop.f32.mrf.mxu2 }
  0xb6   : >> { %v453_v25 = vpop.f32.mrf.mxu1  ;;  %v632_v28 = vpop.f32.mrf.mxu3  ;;  %v539_v51 = vadd.f32 %v535_v26, %v452_v23 }
  0xbd   : >> { %v537_v27 = vpop.f32.mrf.mxu2 }
  0xbe   : >> { %v634_v30 = vpop.f32.mrf.mxu3 }
  0xcd   : >> { %v694_v29 = vpop.f32.mrf.mxu0 }
  0xce   : >> { %v773_v31 = vpop.f32.mrf.mxu1  ;;  %v695_v35 = vadd.f32 %v694_v29, %v632_v28 }
  0xd0   : >> { %v778_v39 = vadd.f32 %v773_v31, %v695_v35 }
  0xd2   : >> { %v783_v44 = vrot.slane %v778_v39, 1 }
  0xd5   : >> { %v696_v32 = vpop.f32.mrf.mxu0  ;;  %v879_v33 = vpop.f32.mrf.mxu2 }
  0xd6   : >> { %v941_v34 = vpop.f32.mrf.mxu3  ;;  %v697_v36 = vadd.f32 %v696_v32, %v634_v30  ;;  %v775_v37 = vpop.f32.mrf.mxu1 }
  0xd7   : >> { %v942_v41 = vadd.f32 %v941_v34, %v879_v33 }
  0xd8   : >> { %v779_v40 = vadd.f32 %v775_v37, %v697_v36 }
  0xda   : >> { %v784_v45 = vrot.slane %v779_v40, 1 }
  0xdc   : >> { %v785_v49 = vsel %vm782_vm0, %v783_v44, %v784_v45 }
  0xdd   : >> { %v881_v42 = vpop.f32.mrf.mxu2  ;;  %v787_v54 = vadd.f32 %v785_v49, %v539_v51 }
  0xde   : >> { %v943_v43 = vpop.f32.mrf.mxu3 }
  0xdf   : >> { %v944_v46 = vadd.f32 %v943_v43, %v881_v42 }
  0xed   : >> { %v1020_v38 = vpop.f32.mrf.mxu0 }
  0xee   : >> { %v1025_v47 = vadd.f32 %v1020_v38, %v942_v41 }
  0xf0   : >> { %v1030_v52 = vrot.slane %v1025_v47, 2 }
  0xf5   : >> { %v1022_v48 = vpop.f32.mrf.mxu0 }
  0xf6   : >> { %v1026_v50 = vadd.f32 %v1022_v48, %v944_v46 }
  0xf8   : >> { %v1031_v53 = vrot.slane %v1026_v50, 2 }
  0xfa   : >> { %v1032_v56 = vsel %vm1029_vm1, %v1030_v52, %v1031_v53 }
  0xfb   : >> { %v1034_v57 = vadd.f32 %v1032_v56, %v787_v54 }
  0xfd   : >> { %v1038_v59 = vmul.f32 %v1036_v55, %v1034_v57 }
  0xff   : >> { %v1042_v60 = vadd.f32 %v1040_v58, %v1038_v59 }
 0x101   : >> { %v1043_v61 = vmax.f32 %v1042_v60, 0.0  ;;  %269 = sbr.rel (!%p267_p5) target bundleno = 16 (0x10), region = 94 }
 0x103   : >> { %v1044_v62 = vpack.c.bf16 %v1043_v61, %v1043_v61 }
 0x105   : >> { %1047 = vst [vmem:[%s1046_s13] sm:$0xf] %v1044_v62 }
 0x106 PF: > { %s14_s17 = sadd.s32 1, %s1766_s17   ;;  %s2094_s15 = smov %s1762_s16 }
 0x107   : > { %p11_p6 = scmp.ge.s32.totalorder %s14_s17, 4   ;;  %s2095_s16 = smov %s2097_s18 }
 0x109   :  { %13 = sbr.rel (!%p11_p6) target bundleno = 2 (0x2), region = 105 }

// kernel: _lambda_.23
= control target key start
LH: loop header
LB: loop body
LE: loop exit
PB: predicated region body
PF: predicated region fallthrough
CT: control target
= control target key end

     0   :  { %s354_s6 = smov 0   ;;  %s356_s7 = smov 0   ;;  %s410_s0 = inlined_call_operand.vmem [shape: bf16[2,4,2,256], index: 0, kind: input, shape index: {}]   ;;  %s411_s1 = inlined_call_operand.vmem [shape: bf16[2,2,2,128], index: 1, kind: output, shape index: {}]  }
   0x1   :  { %s358_s8 = smov 0   ;;  %s360_s9 = smov 0  }
   0x2   :  { %s362_s10 = smov 0  }
   0x3 LB: > { %s20_s11 = sadd.s32 1, %s334_s8  ;;  %s23_s12 = sadd.s32 1, %s338_s9  ;;  %s342_s10 = sphi %s362_s10, %s11_s10   ;;  %s338_s9 = sphi %s360_s9, %s415_s9   ;;  %s334_s8 = sphi %s358_s8, %s414_s8   ;;  %s330_s7 = sphi %s356_s7, %s413_s7   ;;  %s326_s6 = sphi %s354_s6, %s412_s6  }
   0x4   : > { %p21_p0 = scmp.ge.s32.totalorder %s20_s11, 2  ;;  %p256_p1 = scmp.ge.s32.totalorder %s342_s10, 1 }
   0x5   : > { %p108_p2 = scmp.lt.s32.totalorder %s342_s10, 5 }
   0x6   : > { %s417_s11 = smov (%p21_p0, %s20_s11), 0  ;;  %s419_s12 = smov (!%p21_p0, %s23_s12), %s338_s9 }
   0x7   : > { %p109_p3 = pnand %p256_p1, %p108_p2  ;;  %p25_p4 = scmp.ge.s32.totalorder %s419_s12, 2 }
   0x8   : > { %s257_s13 = sshll.u32 (!%p109_p3), %s326_s6, 1  ;;  %p135_p5 = scmp.lt.s32.totalorder (!%p109_p3), %s330_s7, 1 }
   0x9   : > { %s421_s12 = smov (%p25_p4, %s419_s12), 0  ;;  %112 = sbr.rel (%p109_p3) target bundleno = 42 (0x2a), region = 24 }
   0xa   : > { %p137_p6 = scmp.lt.s32.totalorder (!%p109_p3), %s257_s13, 3  ;;  %p146_p7 = scmp.lt.s32.totalorder (!%p109_p3), %s326_s6, 1 }
   0xe   : > { %s423_s7 = smov (!%p135_p5, %s330_s7), 1  ;;  %s425_s13 = smov (!%p137_p6, %s257_s13), 3 }
   0xf   : > { %s259_s14 = sshll.u32 %s423_s7, 3  ;;  %s258_s15 = sshll.u32 %s425_s13, 1 }
  0x10   : > { %s141_s16 = sadd.s32 %s259_s14, %s258_s15  ;;  %s427_s6 = smov (!%p146_p7, %s326_s6), 1 }
  0x11   : > { %s142_s19 = scalar_lea.vmem %s410_s0, %s141_s16  ;;  %s260_s20 = sshll.u32 %s423_s7, 1 }
  0x12   : > { %v151_v0 = vld [vmem:[%s142_s19] sm:$0x3]  ;;  %v261_v1 = vld [vmem:[%s142_s19 + $0x2] sm:$0x3]  ;;  %s149_s21 = sadd.s32 %s260_s20, %s427_s6 }
  0x13   : > { %v154_v2 = vunpack.c.l.bf16 %v151_v0  ;;  %v155_v3 = vunpack.c.l.bf16 %v261_v1  ;;  %s150_s24 = scalar_lea.vmem %s411_s1, %s149_s21 }
  0x15   : > { %v156_v4 = vmax.f32 %v154_v2, %v155_v3 }
  0x17   : > { %158 = vst [vmem:[#allocation1] ss:$4 sm:$0xff] %v156_v4 }
  0x1e   : > { %v159_v5 = vld.sshfl [vmem:[#allocation1] sm:$0xff pattern:$0x73625140]  ;;  %v160_v6 = vld.sshfl [vmem:[#allocation1 + $0x8] sm:$0xff pattern:$0x73625140] }
  0x1f   : > { %v163_v7 = vpack.c.bf16 %v160_v6, %v159_v5 }
  0x21   : > { %v166_v8 = vrot.slane %v163_v7, 4 }
  0x23   : > { %v168_v9 = vunpack.c.l.bf16 %v166_v8 }
  0x25   : > { %v169_v10 = vmax.f32 %v159_v5, %v168_v9 }
  0x27   : > { %v170_v11 = vpack.c.bf16 %v169_v10, %v169_v10 }
  0x29   : > { %171 = vst [vmem:[%s150_s24] sm:$0x1] %v170_v11 }
  0x2a PF: > { %s11_s10 = sadd.s32 1, %s342_s10   ;;  %s412_s6 = smov %s334_s8 }
  0x2b   : > { %p8_p8 = scmp.ge.s32.totalorder %s11_s10, 6   ;;  %s413_s7 = smov %s338_s9 }
  0x2c   : > { %s414_s8 = smov %s417_s11  ;;  %s415_s9 = smov %s421_s12 }
  0x2d   :  { %10 = sbr.rel (!%p8_p8) target bundleno = 3 (0x3), region = 55 }

// kernel: _lambda_.21
= control target key start
LH: loop header
LB: loop body
LE: loop exit
PB: predicated region body
PF: predicated region fallthrough
CT: control target
= control target key end

     0   :  { %s1738_s15 = smov 0   ;;  %s1740_s16 = smov 0   ;;  %s2030_s0 = inlined_call_operand.vmem [shape: bf16[2,6,6,128], index: 0, kind: input, shape index: {}]   ;;  %s2031_s1 = inlined_call_operand.vmem [shape: bf16[9,128,128], index: 1, kind: input, shape index: {}]   ;;  %s2032_s2 = inlined_call_operand.vmem [shape: f32[1,128], index: 2, kind: input, shape index: {}]   ;;  %s2033_s3 = inlined_call_operand.vmem [shape: f32[1,128], index: 3, kind: input, shape index: {}]   ;;  %s2034_s4 = inlined_call_operand.vmem [shape: bf16[2,4,4,128], index: 4, kind: output, shape index: {}]  }
   0x1   :  { %s1742_s17 = smov 0  }
   0x2 LB: > { %s26_s18 = sadd.s32 1, %s1703_s16  ;;  %p1147_p0 = scmp.ge.s32.totalorder %s1707_s17, 1  ;;  %s1707_s17 = sphi %s1742_s17, %s14_s17   ;;  %s1703_s16 = sphi %s1740_s16, %s2036_s16   ;;  %s1699_s15 = sphi %s1738_s15, %s2035_s15  }
   0x3   : > { %p28_p1 = scmp.ge.s32.totalorder %s26_s18, 2  ;;  %p201_p2 = scmp.lt.s32.totalorder %s1707_s17, 3 }
   0x5   : > { %s2038_s18 = smov (%p28_p1, %s26_s18), 0  ;;  %p202_p3 = pnand %p1147_p0, %p201_p2 }
   0x6   : > { %p240_p4 = scmp.lt.s32.totalorder (!%p202_p3), %s1699_s15, 1  ;;  %s1776_s5 = smov (!%p202_p3), 0  }
   0x7   : > { %205 = sbr.rel (%p202_p3) target bundleno = 253 (0xfd), region = 36 }
   0xc   : > { %v1759_v0 = vld [vmem:[%s2032_s2] sm:$0x1]  ;;  %s2040_s15 = smov (!%p240_p4, %s1699_s15), 1 }
   0xd   : > { %v1764_v1 = vld [vmem:[%s2033_s3] sm:$0x1]  ;;  %s1648_s23 = smul.u32 24, %s2040_s15  ;;  %s1575_s24 = sshll.u32 %s2040_s15, 3 }
   0xe   : > { %s1769_s27 = scalar_lea.vmem %s2034_s4, %s1575_s24 }
   0xf   : > { %s1774_s30 = scalar_lea.vmem %s2030_s0, %s1648_s23 }
  0x10 LB: >> { %v1591_v2 = vld [vmem:[%s2031_s1 + $0xf8] sm:$0xff]  ;;  %v1590_v4 = vld [vmem:[%s2031_s1 + $0xf0] sm:$0xff]  ;;  %v1589_v10 = vld [vmem:[%s2031_s1 + $0xe8] sm:$0xff]  ;;  %s1151_s25 = sshll.u32 %s1711_s5, 2  ;;  %s1572_s12 = sshll.u32 %s1711_s5, 1  ;;  %s1711_s5 = sphi %s1776_s5, %s270_s5  }
  0x11   : >> { %v1583_v3 = vld [vmem:[%s2031_s1 + $0x38] sm:$0xff]  ;;  %363 = vmatpush.bf16.msra.mxu0 %v1591_v2  ;;  %v1582_v5 = vld [vmem:[%s2031_s1 + $0x30] sm:$0xff]  ;;  %v1581_v11 = vld [vmem:[%s2031_s1 + $0x28] sm:$0xff]  ;;  %s272_s15 = scalar_lea.vmem %s1774_s30, %s1151_s25  ;;  %s1006_s13 = scalar_lea.vmem %s1769_s27, %s1572_s12 }
  0x12   : >> { %424 = vmatpush.bf16.msra.mxu1 %v1583_v3  ;;  %v1599_v6 = vld [vmem:[%s2031_s1 + $0x1b8] sm:$0xff]  ;;  %v1598_v8 = vld [vmem:[%s2031_s1 + $0x1b0] sm:$0xff]  ;;  %v1597_v12 = vld [vmem:[%s2031_s1 + $0x1a8] sm:$0xff]  ;;  %s270_s5 = sadd.s32 1, %s1711_s5  }
  0x13   : >> { %v1615_v7 = vld [vmem:[%s2031_s1 + $0x138] sm:$0xff]  ;;  %502 = vmatpush.bf16.msra.mxu2 %v1599_v6  ;;  %v1614_v9 = vld [vmem:[%s2031_s1 + $0x130] sm:$0xff]  ;;  %v1613_v13 = vld [vmem:[%s2031_s1 + $0x128] sm:$0xff]  ;;  %p267_p5 = scmp.ge.s32.totalorder %s270_s5, 4  }
  0x14   : >> { %599 = vmatpush.bf16.msra.mxu3 %v1615_v7  ;;  %v1588_v14 = vld [vmem:[%s2031_s1 + $0xe0] sm:$0xff]  ;;  %v1587_v18 = vld [vmem:[%s2031_s1 + $0xd8] sm:$0xff]  ;;  %v1586_v22 = vld [vmem:[%s2031_s1 + $0xd0] sm:$0xff] }
  0x15   : >> { %364 = vmatpush.bf16.msra.mxu0 %v1590_v4  ;;  %v1580_v15 = vld [vmem:[%s2031_s1 + $0x20] sm:$0xff]  ;;  %v1579_v19 = vld [vmem:[%s2031_s1 + $0x18] sm:$0xff]  ;;  %v1578_v23 = vld [vmem:[%s2031_s1 + $0x10] sm:$0xff] }
  0x16   : >> { %425 = vmatpush.bf16.msra.mxu1 %v1582_v5  ;;  %v1596_v16 = vld [vmem:[%s2031_s1 + $0x1a0] sm:$0xff]  ;;  %v1595_v20 = vld [vmem:[%s2031_s1 + $0x198] sm:$0xff]  ;;  %v1594_v24 = vld [vmem:[%s2031_s1 + $0x190] sm:$0xff] }
  0x17   : >> { %503 = vmatpush.bf16.msra.mxu2 %v1598_v8  ;;  %v1612_v17 = vld [vmem:[%s2031_s1 + $0x120] sm:$0xff]  ;;  %v1611_v21 = vld [vmem:[%s2031_s1 + $0x118] sm:$0xff]  ;;  %v1610_v25 = vld [vmem:[%s2031_s1 + $0x110] sm:$0xff] }
  0x18   : >> { %600 = vmatpush.bf16.msra.mxu3 %v1614_v9  ;;  %v1585_v26 = vld [vmem:[%s2031_s1 + $0xc8] sm:$0xff]  ;;  %v1584_v30 = vld [vmem:[%s2031_s1 + $0xc0] sm:$0xff]  ;;  %v1607_v32 = vld [vmem:[%s2031_s1 + $0x78] sm:$0xff] }
  0x19   : >> { %365 = vmatpush.bf16.msra.mxu0 %v1589_v10  ;;  %v1577_v27 = vld [vmem:[%s2031_s1 + $0x8] sm:$0xff]  ;;  %v1576_v31 = vld [vmem:[%s2031_s1] sm:$0xff]  ;;  %v1623_v33 = vld [vmem:[%s2031_s1 + $0x1f8] sm:$0xff] }
  0x1a   : >> { %426 = vmatpush.bf16.msra.mxu1 %v1581_v11  ;;  %v1593_v28 = vld [vmem:[%s2031_s1 + $0x188] sm:$0xff]  ;;  %v1592_v34 = vld [vmem:[%s2031_s1 + $0x180] sm:$0xff]  ;;  %v1639_v36 = vld [vmem:[%s2031_s1 + $0x178] sm:$0xff] }
  0x1b   : >> { %504 = vmatpush.bf16.msra.mxu2 %v1597_v12  ;;  %v1609_v29 = vld [vmem:[%s2031_s1 + $0x108] sm:$0xff]  ;;  %v1608_v35 = vld [vmem:[%s2031_s1 + $0x100] sm:$0xff]  ;;  %v1631_v37 = vld [vmem:[%s2031_s1 + $0xb8] sm:$0xff] }
  0x1c   : >> { %601 = vmatpush.bf16.msra.mxu3 %v1613_v13  ;;  %v1606_v38 = vld [vmem:[%s2031_s1 + $0x70] sm:$0xff]  ;;  %v1897_v40 = vld [vmem:[%s272_s15 + $0x4] sm:$0x7]  ;;  %v1899_v41 = vld [vmem:[%s272_s15] sm:$0x7] }
  0x1d   : >> { %366 = vmatpush.bf16.msra.mxu0 %v1588_v14  ;;  %v1622_v39 = vld [vmem:[%s2031_s1 + $0x1f0] sm:$0xff]  ;;  %v1907_v44 = vld [vmem:[%s272_s15 + $0x8] sm:$0x7]  ;;  %v1604_v49 = vld [vmem:[%s2031_s1 + $0x60] sm:$0xff] }
  0x1e   : >> { %427 = vmatpush.bf16.msra.mxu1 %v1580_v15  ;;  %v1638_v42 = vld [vmem:[%s2031_s1 + $0x170] sm:$0xff]  ;;  %v1605_v45 = vld [vmem:[%s2031_s1 + $0x68] sm:$0xff]  ;;  %v1620_v50 = vld [vmem:[%s2031_s1 + $0x1e0] sm:$0xff] }
  0x1f   : >> { %505 = vmatpush.bf16.msra.mxu2 %v1596_v16  ;;  %v1630_v43 = vld [vmem:[%s2031_s1 + $0xb0] sm:$0xff]  ;;  %v1621_v46 = vld [vmem:[%s2031_s1 + $0x1e8] sm:$0xff]  ;;  %v1636_v51 = vld [vmem:[%s2031_s1 + $0x160] sm:$0xff] }
  0x20   : >> { %602 = vmatpush.bf16.msra.mxu3 %v1612_v17  ;;  %v1637_v47 = vld [vmem:[%s2031_s1 + $0x168] sm:$0xff]  ;;  %v1628_v52 = vld [vmem:[%s2031_s1 + $0xa0] sm:$0xff]  ;;  %v1603_v53 = vld [vmem:[%s2031_s1 + $0x58] sm:$0xff] }
  0x21   : >> { %367 = vmatpush.bf16.msra.mxu0 %v1587_v18  ;;  %v1629_v48 = vld [vmem:[%s2031_s1 + $0xa8] sm:$0xff]  ;;  %v1619_v54 = vld [vmem:[%s2031_s1 + $0x1d8] sm:$0xff]  ;;  %v1602_v57 = vld [vmem:[%s2031_s1 + $0x50] sm:$0xff] }
  0x22   : >> { %428 = vmatpush.bf16.msra.mxu1 %v1579_v19  ;;  %v1635_v55 = vld [vmem:[%s2031_s1 + $0x158] sm:$0xff]  ;;  %v1618_v58 = vld [vmem:[%s2031_s1 + $0x1d0] sm:$0xff]  ;;  %v1601_v61 = vld [vmem:[%s2031_s1 + $0x48] sm:$0xff] }
  0x23   : >> { %506 = vmatpush.bf16.msra.mxu2 %v1595_v20  ;;  %v1627_v56 = vld [vmem:[%s2031_s1 + $0x98] sm:$0xff]  ;;  %v1634_v59 = vld [vmem:[%s2031_s1 + $0x150] sm:$0xff]  ;;  %v1617_v62 = vld [vmem:[%s2031_s1 + $0x1c8] sm:$0xff] }
  0x24   : >> { %603 = vmatpush.bf16.msra.mxu3 %v1611_v21  ;;  %v1626_v60 = vld [vmem:[%s2031_s1 + $0x90] sm:$0xff]  ;;  %v1633_v63 = vld [vmem:[%s2031_s1 + $0x148] sm:$0xff]  ;;  %v1600_v3 = vld [vmem:[%s2031_s1 + $0x40] sm:$0xff] }
  0x25   : >> { %368 = vmatpush.bf16.msra.mxu0 %v1586_v22  ;;  %v1625_v2 = vld [vmem:[%s2031_s1 + $0x88] sm:$0xff]  ;;  %v1616_v4 = vld [vmem:[%s2031_s1 + $0x1c0] sm:$0xff]  ;;  %v1647_v5 = vld [vmem:[%s2031_s1 + $0x238] sm:$0xff] }
  0x26   : >> { %429 = vmatpush.bf16.msra.mxu1 %v1578_v23  ;;  %v1632_v6 = vld [vmem:[%s2031_s1 + $0x140] sm:$0xff]  ;;  %v1646_v8 = vld [vmem:[%s2031_s1 + $0x230] sm:$0xff]  ;;  %v1645_v9 = vld [vmem:[%s2031_s1 + $0x228] sm:$0xff] }
  0x27   : >> { %507 = vmatpush.bf16.msra.mxu2 %v1594_v24  ;;  %v1624_v7 = vld [vmem:[%s2031_s1 + $0x80] sm:$0xff]  ;;  %v1643_v11 = vld [vmem:[%s2031_s1 + $0x218] sm:$0xff]  ;;  %v1642_v12 = vld [vmem:[%s2031_s1 + $0x210] sm:$0xff] }
  0x28   : >> { %604 = vmatpush.bf16.msra.mxu3 %v1610_v25  ;;  %v1644_v10 = vld [vmem:[%s2031_s1 + $0x220] sm:$0xff]  ;;  %v1641_v13 = vld [vmem:[%s2031_s1 + $0x208] sm:$0xff] }
  0x29   : >> { %369 = vmatpush.bf16.msra.mxu0 %v1585_v26  ;;  %v1640_v14 = vld [vmem:[%s2031_s1 + $0x200] sm:$0xff] }
  0x2a   : >> { %430 = vmatpush.bf16.msra.mxu1 %v1577_v27 }
  0x2b   : >> { %508 = vmatpush.bf16.msra.mxu2 %v1593_v28 }
  0x2c   : >> { %605 = vmatpush.bf16.msra.mxu3 %v1609_v29 }
  0x2d   : >> { %370 = vmatpush.bf16.msra.mxu0 %v1584_v30 }
  0x2e   : >> { %431 = vmatpush.bf16.msra.mxu1 %v1576_v31 }
  0x2f   : >> { %509 = vmatpush.bf16.msra.mxu2 %v1592_v34 }
  0x30   : >> { %606 = vmatpush.bf16.msra.mxu3 %v1608_v35  ;;  %371 = vmatmul.bf16.vlgmr.msra.gmra.mxu0 %v1897_v40 }
  0x31   : >> { %660 = vmatpush.bf16.msrb.mxu0 %v1607_v32  ;;  %432 = vmatmul.bf16.vlgmr.msra.gmra.mxu1 %v1899_v41 }
  0x32   : >> { %738 = vmatpush.bf16.msrb.mxu1 %v1623_v33  ;;  %510 = vmatmul.bf16.vlgmr.msra.gmra.mxu2 %v1907_v44 }
  0x33   : >> { %838 = vmatpush.bf16.msrb.mxu2 %v1639_v36  ;;  %607 = vmatmul.bf16.vlgmr.msra.gmra.mxu3 %v1897_v40 }
  0x34   : >> { %899 = vmatpush.bf16.msrb.mxu3 %v1631_v37 }
  0x35   : >> { %661 = vmatpush.bf16.msrb.mxu0 %v1606_v38 }
  0x36   : >> { %739 = vmatpush.bf16.msrb.mxu1 %v1622_v39 }
  0x37   : >> { %839 = vmatpush.bf16.msrb.mxu2 %v1638_v42 }
  0x38   : >> { %900 = vmatpush.bf16.msrb.mxu3 %v1630_v43  ;;  %v1000_v43 = vperm.slane %v1764_v1, 0 }
  0x39   : >> { %662 = vmatpush.bf16.msrb.mxu0 %v1605_v45 }
  0x3a   : >> { %740 = vmatpush.bf16.msrb.mxu1 %v1621_v46 }
  0x3b   : >> { %840 = vmatpush.bf16.msrb.mxu2 %v1637_v47 }
  0x3c   : >> { %901 = vmatpush.bf16.msrb.mxu3 %v1629_v48 }
  0x3d   : >> { %663 = vmatpush.bf16.msrb.mxu0 %v1604_v49 }
  0x3e   : >> { %741 = vmatpush.bf16.msrb.mxu1 %v1620_v50 }
  0x3f   : >> { %841 = vmatpush.bf16.msrb.mxu2 %v1636_v51 }
  0x40   : >> { %902 = vmatpush.bf16.msrb.mxu3 %v1628_v52 }
  0x41   : >> { %664 = vmatpush.bf16.msrb.mxu0 %v1603_v53 }
  0x42   : >> { %742 = vmatpush.bf16.msrb.mxu1 %v1619_v54 }
  0x43   : >> { %842 = vmatpush.bf16.msrb.mxu2 %v1635_v55 }
  0x44   : >> { %903 = vmatpush.bf16.msrb.mxu3 %v1627_v56 }
  0x45   : >> { %665 = vmatpush.bf16.msrb.mxu0 %v1602_v57 }
  0x46   : >> { %743 = vmatpush.bf16.msrb.mxu1 %v1618_v58 }
  0x47   : >> { %843 = vmatpush.bf16.msrb.mxu2 %v1634_v59 }
  0x48   : >> { %904 = vmatpush.bf16.msrb.mxu3 %v1626_v60 }
  0x49   : >> { %666 = vmatpush.bf16.msrb.mxu0 %v1601_v61 }
  0x4a   : >> { %744 = vmatpush.bf16.msrb.mxu1 %v1617_v62 }
  0x4b   : >> { %844 = vmatpush.bf16.msrb.mxu2 %v1633_v63 }
  0x4c   : >> { %905 = vmatpush.bf16.msrb.mxu3 %v1625_v2 }
  0x4d   : >> { %667 = vmatpush.bf16.msrb.mxu0 %v1600_v3 }
  0x4e   : >> { %745 = vmatpush.bf16.msrb.mxu1 %v1616_v4 }
  0x4f   : >> { %845 = vmatpush.bf16.msrb.mxu2 %v1632_v6 }
  0x50   : >> { %906 = vmatpush.bf16.msrb.mxu3 %v1624_v7  ;;  %668 = vmatmul.bf16.vlgmr.msrb.gmra.mxu0 %v1899_v41 }
  0x51   : >> { %977 = vmatpush.bf16.msra.mxu0 %v1647_v5  ;;  %746 = vmatmul.bf16.vlgmr.msrb.gmra.mxu1 %v1907_v44 }
  0x52   : >> { %846 = vmatmul.bf16.vlgmr.msrb.gmra.mxu2 %v1897_v40 }
  0x53   : >> { %907 = vmatmul.bf16.vlgmr.msrb.gmra.mxu3 %v1899_v41  ;;  %v996_v41 = vperm.slane %v1759_v0, 0 }
  0x55   : >> { %978 = vmatpush.bf16.msra.mxu0 %v1646_v8 }
  0x59   : >> { %979 = vmatpush.bf16.msra.mxu0 %v1645_v9 }
  0x5d   : >> { %980 = vmatpush.bf16.msra.mxu0 %v1644_v10 }
  0x61   : >> { %981 = vmatpush.bf16.msra.mxu0 %v1643_v11 }
  0x65   : >> { %982 = vmatpush.bf16.msra.mxu0 %v1642_v12 }
  0x69   : >> { %983 = vmatpush.bf16.msra.mxu0 %v1641_v13 }
  0x6d   : >> { %984 = vmatpush.bf16.msra.mxu0 %v1640_v14 }
  0x70   : >> { %985 = vmatmul.bf16.vlgmr.msra.gmra.mxu0 %v1907_v44 }
  0xad   : >> { %v372_v15 = vpop.f32.mrf.mxu0 }
  0xae   : >> { %v433_v16 = vpop.f32.mrf.mxu1 }
  0xaf   : >> { %v434_v33 = vadd.f32 %v433_v16, %v372_v15 }
  0xb5   : >> { %v374_v17 = vpop.f32.mrf.mxu0  ;;  %v511_v19 = vpop.f32.mrf.mxu2 }
  0xb6   : >> { %v435_v18 = vpop.f32.mrf.mxu1  ;;  %v608_v20 = vpop.f32.mrf.mxu3  ;;  %v515_v37 = vadd.f32 %v511_v19, %v434_v33 }
  0xbd   : >> { %v513_v21 = vpop.f32.mrf.mxu2 }
  0xbe   : >> { %v610_v22 = vpop.f32.mrf.mxu3 }
  0xcd   : >> { %v669_v23 = vpop.f32.mrf.mxu0 }
  0xce   : >> { %v747_v24 = vpop.f32.mrf.mxu1  ;;  %v670_v31 = vadd.f32 %v669_v23, %v608_v20 }
  0xd0   : >> { %v751_v32 = vadd.f32 %v747_v24, %v670_v31 }
  0xd2   : >> { %v753_v35 = vrot.slane %v751_v32, 1 }
  0xd4   : >> { %v755_v39 = vadd.f32 %v753_v35, %v515_v37 }
  0xd5   : >> { %v671_v25 = vpop.f32.mrf.mxu0  ;;  %v847_v26 = vpop.f32.mrf.mxu2 }
  0xd6   : >> { %v908_v27 = vpop.f32.mrf.mxu3  ;;  %v749_v28 = vpop.f32.mrf.mxu1 }
  0xd7   : >> { %v909_v34 = vadd.f32 %v908_v27, %v847_v26 }
  0xdd   : >> { %v849_v29 = vpop.f32.mrf.mxu2 }
  0xde   : >> { %v910_v30 = vpop.f32.mrf.mxu3 }
  0xed   : >> { %v986_v36 = vpop.f32.mrf.mxu0 }
  0xee   : >> { %v990_v38 = vadd.f32 %v986_v36, %v909_v34 }
  0xf0   : >> { %v992_v40 = vrot.slane %v990_v38, 2 }
  0xf2   : >> { %v994_v42 = vadd.f32 %v992_v40, %v755_v39 }
  0xf4   : >> { %v998_v44 = vmul.f32 %v996_v41, %v994_v42 }
  0xf5   : >> { %v988_v45 = vpop.f32.mrf.mxu0 }
  0xf6   : >> { %v1002_v46 = vadd.f32 %v1000_v43, %v998_v44 }
  0xf8   : >> { %v1003_v47 = vmax.f32 %v1002_v46, 0.0  ;;  %269 = sbr.rel (!%p267_p5) target bundleno = 16 (0x10), region = 94 }
  0xfa   : >> { %v1004_v48 = vpack.c.bf16 %v1003_v47, %v1003_v47 }
  0xfc   : >> { %1007 = vst [vmem:[%s1006_s13] sm:$0x3] %v1004_v48 }
  0xfd PF: > { %s14_s17 = sadd.s32 1, %s1707_s17   ;;  %s2035_s15 = smov %s1703_s16 }
  0xfe   : > { %p11_p6 = scmp.ge.s32.totalorder %s14_s17, 4   ;;  %s2036_s16 = smov %s2038_s18 }
 0x100   :  { %13 = sbr.rel (!%p11_p6) target bundleno = 2 (0x2), region = 105 }

// kernel: _lambda_.26
= control target key start
LH: loop header
LB: loop body
LE: loop exit
PB: predicated region body
PF: predicated region fallthrough
CT: control target
= control target key end

     0   :  { %s312_s6 = smov 0   ;;  %s314_s7 = smov 0   ;;  %s345_s0 = inlined_call_operand.vmem [shape: bf16[2,2,1,256], index: 0, kind: input, shape index: {}]   ;;  %s346_s1 = inlined_call_operand.vmem [shape: bf16[2,1,1,128], index: 1, kind: output, shape index: {}]  }
   0x1   :  { %s316_s8 = smov 0  }
   0x2 LB: > { %s23_s9 = sadd.s32 1, %s296_s7  ;;  %p249_p0 = scmp.ge.s32.totalorder %s300_s8, 1  ;;  %s300_s8 = sphi %s316_s8, %s11_s8   ;;  %s296_s7 = sphi %s314_s7, %s348_s7   ;;  %s292_s6 = sphi %s312_s6, %s347_s6  }
   0x3   : > { %p25_p1 = scmp.ge.s32.totalorder %s23_s9, 2  ;;  %p108_p2 = scmp.lt.s32.totalorder %s300_s8, 3 }
   0x5   : > { %s350_s9 = smov (%p25_p1, %s23_s9), 0  ;;  %p109_p3 = pnand %p249_p0, %p108_p2 }
   0x6   : > { %p134_p4 = scmp.lt.s32.totalorder (!%p109_p3), %s292_s6, 1 }
   0x7   : > { %112 = sbr.rel (%p109_p3) target bundleno = 34 (0x22), region = 24 }
   0xc   : > { %s352_s6 = smov (!%p134_p4, %s292_s6), 1  ;;  %vm168_vm0 = vcmask 1040384   ;;  %vm169_vm1 = vsmask.f32 256 }
   0xd   : > { %s250_s10 = sshll.u32 %s352_s6, 2  ;;  %s148_s16 = scalar_lea.vmem %s346_s1, %s352_s6  ;;  %vm170_vm2 = vmand %vm168_vm0, %vm169_vm1 }
   0xe   : > { %s141_s13 = scalar_lea.vmem %s345_s0, %s250_s10  ;;  %v171_v11 = vld [vmem:[%s148_s16] sm:$0x1] }
   0xf   : > { %v149_v0 = vld [vmem:[%s141_s13] sm:$0x3]  ;;  %v251_v1 = vld [vmem:[%s141_s13 + $0x2] sm:$0x3] }
  0x10   : > { %v152_v2 = vunpack.c.l.bf16 %v149_v0  ;;  %v153_v3 = vunpack.c.l.bf16 %v251_v1 }
  0x12   : > { %v154_v4 = vmax.f32 %v152_v2, %v153_v3 }
  0x14   : > { %v156_v5 = vperm.slane %v154_v4, 0  ;;  %v157_v6 = vperm.slane %v154_v4, 2 }
  0x16   : > { %v160_v7 = vpack.c.bf16 %v157_v6, %v156_v5 }
  0x18   : > { %v163_v8 = vrot.slane %v160_v7, 4 }
  0x1a   : > { %v165_v9 = vunpack.c.l.bf16 %v163_v8 }
  0x1c   : > { %v166_v10 = vmax.f32 %v156_v5, %v165_v9 }
  0x1e   : > { %v167_v12 = vpack.c.bf16 %v166_v10, %v166_v10 }
  0x20   : > { %v172_v13 = vsel %vm170_vm2, %v167_v12, %v171_v11 }
  0x21   : > { %173 = vst [vmem:[%s148_s16] sm:$0x1] %v172_v13 }
  0x22 PF: > { %s11_s8 = sadd.s32 1, %s300_s8   ;;  %s347_s6 = smov %s296_s7 }
  0x23   : > { %p8_p5 = scmp.ge.s32.totalorder %s11_s8, 4   ;;  %s348_s7 = smov %s350_s9 }
  0x25   :  { %10 = sbr.rel (!%p8_p5) target bundleno = 2 (0x2), region = 55 }

// kernel: _lambda_.27
= control target key start
LH: loop header
LB: loop body
LE: loop exit
PB: predicated region body
PF: predicated region fallthrough
CT: control target
= control target key end

     0   :  { %s529_s1 = inlined_call_operand.vmem [shape: bf16[128,128], index: 1, kind: input, shape index: {}]   ;;  %s530_s3 = inlined_call_operand.vmem [shape: bf16[128,128], index: 3, kind: input, shape index: {}]   ;;  %s531_s2 = inlined_call_operand.vmem [shape: f32[1,128], index: 2, kind: input, shape index: {}]   ;;  %s532_s0 = inlined_call_operand.vmem [shape: bf16[8,128], index: 0, kind: input, shape index: {}]   ;;  %s533_s4 = inlined_call_operand.vmem [shape: f32[1,128], index: 4, kind: input, shape index: {}]   ;;  %s534_s5 = inlined_call_operand.vmem [shape: bf16[128,128], index: 5, kind: input, shape index: {}]   ;;  %s535_s6 = inlined_call_operand.vmem [shape: f32[1,128], index: 6, kind: input, shape index: {}]   ;;  %s536_s7 = inlined_call_operand.vmem [shape: f32[8,128], index: 7, kind: output, shape index: {}]  }
   0x1   :  { %v382_v0 = vld [vmem:[%s529_s1 + $0x38] sm:$0xff]  ;;  %v381_v1 = vld [vmem:[%s529_s1 + $0x30] sm:$0xff]  ;;  %v380_v4 = vld [vmem:[%s529_s1 + $0x28] sm:$0xff] }
   0x2   :  { %95 = vmatpush.bf16.msra.mxu0 %v382_v0  ;;  %v390_v2 = vld [vmem:[%s530_s3 + $0x38] sm:$0xff]  ;;  %v389_v3 = vld [vmem:[%s530_s3 + $0x30] sm:$0xff]  ;;  %v388_v5 = vld [vmem:[%s530_s3 + $0x28] sm:$0xff] }
   0x3   :  { %178 = vmatpush.bf16.msra.mxu1 %v390_v2  ;;  %v379_v6 = vld [vmem:[%s529_s1 + $0x20] sm:$0xff]  ;;  %v378_v8 = vld [vmem:[%s529_s1 + $0x18] sm:$0xff]  ;;  %v377_v10 = vld [vmem:[%s529_s1 + $0x10] sm:$0xff] }
   0x4   :  { %v387_v7 = vld [vmem:[%s530_s3 + $0x20] sm:$0xff]  ;;  %v386_v9 = vld [vmem:[%s530_s3 + $0x18] sm:$0xff]  ;;  %v385_v11 = vld [vmem:[%s530_s3 + $0x10] sm:$0xff] }
   0x5   :  { %v376_v12 = vld [vmem:[%s529_s1 + $0x8] sm:$0xff]  ;;  %v375_v13 = vld [vmem:[%s529_s1] sm:$0xff]  ;;  %v398_v17 = vld [vmem:[%s534_s5 + $0x38] sm:$0xff] }
   0x6   :  { %96 = vmatpush.bf16.msra.mxu0 %v381_v1  ;;  %v26_v14 = vld [vmem:[%s532_s0] sm:$0xf]  ;;  %v384_v15 = vld [vmem:[%s530_s3 + $0x8] sm:$0xff]  ;;  %261 = vmatpush.bf16.msra.mxu2 %v398_v17  ;;  %v397_v18 = vld [vmem:[%s534_s5 + $0x30] sm:$0xff] }
   0x7   :  { %179 = vmatpush.bf16.msra.mxu1 %v389_v3  ;;  %v383_v16 = vld [vmem:[%s530_s3] sm:$0xff]  ;;  %v396_v19 = vld [vmem:[%s534_s5 + $0x28] sm:$0xff]  ;;  %v394_v21 = vld [vmem:[%s534_s5 + $0x18] sm:$0xff] }
   0x8   :  { %v395_v20 = vld [vmem:[%s534_s5 + $0x20] sm:$0xff]  ;;  %v393_v22 = vld [vmem:[%s534_s5 + $0x10] sm:$0xff]  ;;  %v392_v29 = vld [vmem:[%s534_s5 + $0x8] sm:$0xff] }
   0x9   :  { %v399_v23 = vld [vmem:[%s531_s2] ss:$0 sm:$0xff] }
   0xa   :  { %97 = vmatpush.bf16.msra.mxu0 %v380_v4  ;;  %262 = vmatpush.bf16.msra.mxu2 %v397_v18  ;;  %v391_v30 = vld [vmem:[%s534_s5] sm:$0xff] }
   0xb   :  { %180 = vmatpush.bf16.msra.mxu1 %v388_v5  ;;  %v400_v31 = vld [vmem:[%s533_s4] ss:$0 sm:$0xff] }
   0xc   :  { %v401_v37 = vld [vmem:[%s535_s6] ss:$0 sm:$0xff] }
   0xe   :  { %98 = vmatpush.bf16.msra.mxu0 %v379_v6  ;;  %263 = vmatpush.bf16.msra.mxu2 %v396_v19 }
   0xf   :  { %181 = vmatpush.bf16.msra.mxu1 %v387_v7 }
  0x12   :  { %99 = vmatpush.bf16.msra.mxu0 %v378_v8  ;;  %264 = vmatpush.bf16.msra.mxu2 %v395_v20 }
  0x13   :  { %182 = vmatpush.bf16.msra.mxu1 %v386_v9 }
  0x16   :  { %100 = vmatpush.bf16.msra.mxu0 %v377_v10  ;;  %265 = vmatpush.bf16.msra.mxu2 %v394_v21 }
  0x17   :  { %183 = vmatpush.bf16.msra.mxu1 %v385_v11 }
  0x1a   :  { %101 = vmatpush.bf16.msra.mxu0 %v376_v12  ;;  %266 = vmatpush.bf16.msra.mxu2 %v393_v22 }
  0x1b   :  { %184 = vmatpush.bf16.msra.mxu1 %v384_v15 }
  0x1e   :  { %102 = vmatpush.bf16.msra.mxu0 %v375_v13  ;;  %267 = vmatpush.bf16.msra.mxu2 %v392_v29 }
  0x1f   :  { %185 = vmatpush.bf16.msra.mxu1 %v383_v16 }
  0x21   :  { %103 = vmatmul.bf16.vlgmr.msra.gmra.mxu0 %v26_v14 }
  0x22   :  { %268 = vmatpush.bf16.msra.mxu2 %v391_v30 }
  0x9e   :  { %v104_v24 = vpop.f32.mrf.mxu0 }
  0x9f   :  { %v105_v25 = vadd.f32 %v399_v23, %v104_v24 }
  0xa1   :  { %v108_v26 = vmax.f32 %v105_v25, 0.0 }
  0xa3   :  { %v109_v27 = vpack.c.bf16 %v108_v26, %v108_v26 }
  0xa5   :  { %186 = vmatmul.bf16.vlgmr.msra.gmra.mxu1 %v109_v27 }
  0xa6   :  { %v106_v28 = vpop.f32.mrf.mxu0 }
 0x122   :  { %v187_v32 = vpop.f32.mrf.mxu1 }
 0x123   :  { %v188_v33 = vadd.f32 %v400_v31, %v187_v32 }
 0x125   :  { %v191_v34 = vmax.f32 %v188_v33, 0.0 }
 0x127   :  { %v192_v35 = vpack.c.bf16 %v191_v34, %v191_v34 }
 0x129   :  { %269 = vmatmul.bf16.vlgmr.msra.gmra.mxu2 %v192_v35 }
 0x12a   :  { %v189_v36 = vpop.f32.mrf.mxu1 }
 0x1ac   :  { %v270_v38 = vpop.f32.mrf.mxu2 }
 0x1ad   :  { %v271_v39 = vadd.f32 %v401_v37, %v270_v38 }
 0x1af   :  { %274 = vst [vmem:[%s536_s7] sm:$0xff] %v271_v39 }
 0x1b4   :  { %v272_v40 = vpop.f32.mrf.mxu2 }

// kernel: _lambda_.24
= control target key start
LH: loop header
LB: loop body
LE: loop exit
PB: predicated region body
PF: predicated region fallthrough
CT: control target
= control target key end

     0   :  { %s1726_s15 = smov 0   ;;  %s1728_s16 = smov 0   ;;  %s2018_s0 = inlined_call_operand.vmem [shape: bf16[2,4,4,128], index: 0, kind: input, shape index: {}]   ;;  %s2019_s1 = inlined_call_operand.vmem [shape: bf16[9,128,128], index: 1, kind: input, shape index: {}]   ;;  %s2020_s2 = inlined_call_operand.vmem [shape: f32[1,128], index: 2, kind: input, shape index: {}]   ;;  %s2021_s3 = inlined_call_operand.vmem [shape: f32[1,128], index: 3, kind: input, shape index: {}]   ;;  %s2022_s4 = inlined_call_operand.vmem [shape: bf16[2,2,2,128], index: 4, kind: output, shape index: {}]  }
   0x1   :  { %s1730_s17 = smov 0  }
   0x2 LB: > { %s26_s18 = sadd.s32 1, %s1691_s16  ;;  %p1137_p0 = scmp.ge.s32.totalorder %s1695_s17, 1  ;;  %s1695_s17 = sphi %s1730_s17, %s14_s17   ;;  %s1691_s16 = sphi %s1728_s16, %s2024_s16   ;;  %s1687_s15 = sphi %s1726_s15, %s2023_s15  }
   0x3   : > { %p28_p1 = scmp.ge.s32.totalorder %s26_s18, 2  ;;  %p201_p2 = scmp.lt.s32.totalorder %s1695_s17, 3 }
   0x5   : > { %s2026_s18 = smov (%p28_p1, %s26_s18), 0  ;;  %p202_p3 = pnand %p1137_p0, %p201_p2 }
   0x6   : > { %p239_p4 = scmp.lt.s32.totalorder (!%p202_p3), %s1687_s15, 1  ;;  %s1764_s5 = smov (!%p202_p3), 0  }
   0x7   : > { %205 = sbr.rel (%p202_p3) target bundleno = 252 (0xfc), region = 36 }
   0xc   : > { %v1747_v0 = vld [vmem:[%s2020_s2] sm:$0x1]  ;;  %s2028_s15 = smov (!%p239_p4, %s1687_s15), 1 }
   0xd   : > { %v1752_v1 = vld [vmem:[%s2021_s3] sm:$0x1]  ;;  %s1564_s23 = sshll.u32 %s2028_s15, 3  ;;  %s1140_s24 = sshll.u32 %s2028_s15, 1 }
   0xe   : > { %s1757_s27 = scalar_lea.vmem %s2018_s0, %s1564_s23  ;;  %s1762_s30 = scalar_lea.vmem %s2022_s4, %s1140_s24 }
   0xf LB: >> { %v1580_v2 = vld [vmem:[%s2019_s1 + $0xf8] sm:$0xff]  ;;  %v1579_v4 = vld [vmem:[%s2019_s1 + $0xf0] sm:$0xff]  ;;  %v1578_v10 = vld [vmem:[%s2019_s1 + $0xe8] sm:$0xff]  ;;  %s1141_s25 = sshll.u32 %s1699_s5, 1  ;;  %s1003_s12 = scalar_lea.vmem %s1762_s30, %s1699_s5  ;;  %s1699_s5 = sphi %s1764_s5, %s268_s5  }
  0x10   : >> { %v1572_v3 = vld [vmem:[%s2019_s1 + $0x38] sm:$0xff]  ;;  %361 = vmatpush.bf16.msra.mxu0 %v1580_v2  ;;  %v1571_v5 = vld [vmem:[%s2019_s1 + $0x30] sm:$0xff]  ;;  %v1570_v11 = vld [vmem:[%s2019_s1 + $0x28] sm:$0xff]  ;;  %s270_s15 = scalar_lea.vmem %s1757_s27, %s1141_s25  ;;  %s268_s5 = sadd.s32 1, %s1699_s5  }
  0x11   : >> { %422 = vmatpush.bf16.msra.mxu1 %v1572_v3  ;;  %v1588_v6 = vld [vmem:[%s2019_s1 + $0x1b8] sm:$0xff]  ;;  %v1587_v8 = vld [vmem:[%s2019_s1 + $0x1b0] sm:$0xff]  ;;  %v1586_v12 = vld [vmem:[%s2019_s1 + $0x1a8] sm:$0xff]  ;;  %p265_p5 = scmp.ge.s32.totalorder %s268_s5, 2  }
  0x12   : >> { %v1604_v7 = vld [vmem:[%s2019_s1 + $0x138] sm:$0xff]  ;;  %500 = vmatpush.bf16.msra.mxu2 %v1588_v6  ;;  %v1603_v9 = vld [vmem:[%s2019_s1 + $0x130] sm:$0xff]  ;;  %v1602_v13 = vld [vmem:[%s2019_s1 + $0x128] sm:$0xff] }
  0x13   : >> { %597 = vmatpush.bf16.msra.mxu3 %v1604_v7  ;;  %v1577_v14 = vld [vmem:[%s2019_s1 + $0xe0] sm:$0xff]  ;;  %v1576_v18 = vld [vmem:[%s2019_s1 + $0xd8] sm:$0xff]  ;;  %v1575_v22 = vld [vmem:[%s2019_s1 + $0xd0] sm:$0xff] }
  0x14   : >> { %362 = vmatpush.bf16.msra.mxu0 %v1579_v4  ;;  %v1569_v15 = vld [vmem:[%s2019_s1 + $0x20] sm:$0xff]  ;;  %v1568_v19 = vld [vmem:[%s2019_s1 + $0x18] sm:$0xff]  ;;  %v1567_v23 = vld [vmem:[%s2019_s1 + $0x10] sm:$0xff] }
  0x15   : >> { %423 = vmatpush.bf16.msra.mxu1 %v1571_v5  ;;  %v1585_v16 = vld [vmem:[%s2019_s1 + $0x1a0] sm:$0xff]  ;;  %v1584_v20 = vld [vmem:[%s2019_s1 + $0x198] sm:$0xff]  ;;  %v1583_v24 = vld [vmem:[%s2019_s1 + $0x190] sm:$0xff] }
  0x16   : >> { %501 = vmatpush.bf16.msra.mxu2 %v1587_v8  ;;  %v1601_v17 = vld [vmem:[%s2019_s1 + $0x120] sm:$0xff]  ;;  %v1600_v21 = vld [vmem:[%s2019_s1 + $0x118] sm:$0xff]  ;;  %v1599_v25 = vld [vmem:[%s2019_s1 + $0x110] sm:$0xff] }
  0x17   : >> { %598 = vmatpush.bf16.msra.mxu3 %v1603_v9  ;;  %v1574_v26 = vld [vmem:[%s2019_s1 + $0xc8] sm:$0xff]  ;;  %v1573_v30 = vld [vmem:[%s2019_s1 + $0xc0] sm:$0xff]  ;;  %v1596_v32 = vld [vmem:[%s2019_s1 + $0x78] sm:$0xff] }
  0x18   : >> { %363 = vmatpush.bf16.msra.mxu0 %v1578_v10  ;;  %v1566_v27 = vld [vmem:[%s2019_s1 + $0x8] sm:$0xff]  ;;  %v1565_v31 = vld [vmem:[%s2019_s1] sm:$0xff]  ;;  %v1612_v33 = vld [vmem:[%s2019_s1 + $0x1f8] sm:$0xff] }
  0x19   : >> { %424 = vmatpush.bf16.msra.mxu1 %v1570_v11  ;;  %v1582_v28 = vld [vmem:[%s2019_s1 + $0x188] sm:$0xff]  ;;  %v1581_v34 = vld [vmem:[%s2019_s1 + $0x180] sm:$0xff]  ;;  %v1628_v36 = vld [vmem:[%s2019_s1 + $0x178] sm:$0xff] }
  0x1a   : >> { %502 = vmatpush.bf16.msra.mxu2 %v1586_v12  ;;  %v1598_v29 = vld [vmem:[%s2019_s1 + $0x108] sm:$0xff]  ;;  %v1597_v35 = vld [vmem:[%s2019_s1 + $0x100] sm:$0xff]  ;;  %v1620_v37 = vld [vmem:[%s2019_s1 + $0xb8] sm:$0xff] }
  0x1b   : >> { %599 = vmatpush.bf16.msra.mxu3 %v1602_v13  ;;  %v1595_v38 = vld [vmem:[%s2019_s1 + $0x70] sm:$0xff]  ;;  %v1885_v40 = vld [vmem:[%s270_s15 + $0x2] sm:$0x3]  ;;  %v1887_v41 = vld [vmem:[%s270_s15] sm:$0x3] }
  0x1c   : >> { %364 = vmatpush.bf16.msra.mxu0 %v1577_v14  ;;  %v1611_v39 = vld [vmem:[%s2019_s1 + $0x1f0] sm:$0xff]  ;;  %v1895_v44 = vld [vmem:[%s270_s15 + $0x4] sm:$0x3]  ;;  %v1594_v45 = vld [vmem:[%s2019_s1 + $0x68] sm:$0xff] }
  0x1d   : >> { %425 = vmatpush.bf16.msra.mxu1 %v1569_v15  ;;  %v1627_v42 = vld [vmem:[%s2019_s1 + $0x170] sm:$0xff]  ;;  %v1610_v46 = vld [vmem:[%s2019_s1 + $0x1e8] sm:$0xff]  ;;  %v1593_v49 = vld [vmem:[%s2019_s1 + $0x60] sm:$0xff] }
  0x1e   : >> { %503 = vmatpush.bf16.msra.mxu2 %v1585_v16  ;;  %v1619_v43 = vld [vmem:[%s2019_s1 + $0xb0] sm:$0xff]  ;;  %v1626_v47 = vld [vmem:[%s2019_s1 + $0x168] sm:$0xff]  ;;  %v1609_v50 = vld [vmem:[%s2019_s1 + $0x1e0] sm:$0xff] }
  0x1f   : >> { %600 = vmatpush.bf16.msra.mxu3 %v1601_v17  ;;  %v1618_v48 = vld [vmem:[%s2019_s1 + $0xa8] sm:$0xff]  ;;  %v1625_v51 = vld [vmem:[%s2019_s1 + $0x160] sm:$0xff]  ;;  %v1592_v53 = vld [vmem:[%s2019_s1 + $0x58] sm:$0xff] }
  0x20   : >> { %365 = vmatpush.bf16.msra.mxu0 %v1576_v18  ;;  %v1617_v52 = vld [vmem:[%s2019_s1 + $0xa0] sm:$0xff]  ;;  %v1608_v54 = vld [vmem:[%s2019_s1 + $0x1d8] sm:$0xff]  ;;  %v1591_v57 = vld [vmem:[%s2019_s1 + $0x50] sm:$0xff] }
  0x21   : >> { %426 = vmatpush.bf16.msra.mxu1 %v1568_v19  ;;  %v1624_v55 = vld [vmem:[%s2019_s1 + $0x158] sm:$0xff]  ;;  %v1607_v58 = vld [vmem:[%s2019_s1 + $0x1d0] sm:$0xff]  ;;  %v1590_v61 = vld [vmem:[%s2019_s1 + $0x48] sm:$0xff] }
  0x22   : >> { %504 = vmatpush.bf16.msra.mxu2 %v1584_v20  ;;  %v1616_v56 = vld [vmem:[%s2019_s1 + $0x98] sm:$0xff]  ;;  %v1623_v59 = vld [vmem:[%s2019_s1 + $0x150] sm:$0xff]  ;;  %v1606_v62 = vld [vmem:[%s2019_s1 + $0x1c8] sm:$0xff] }
  0x23   : >> { %601 = vmatpush.bf16.msra.mxu3 %v1600_v21  ;;  %v1615_v60 = vld [vmem:[%s2019_s1 + $0x90] sm:$0xff]  ;;  %v1622_v63 = vld [vmem:[%s2019_s1 + $0x148] sm:$0xff]  ;;  %v1589_v3 = vld [vmem:[%s2019_s1 + $0x40] sm:$0xff] }
  0x24   : >> { %366 = vmatpush.bf16.msra.mxu0 %v1575_v22  ;;  %v1614_v2 = vld [vmem:[%s2019_s1 + $0x88] sm:$0xff]  ;;  %v1605_v4 = vld [vmem:[%s2019_s1 + $0x1c0] sm:$0xff]  ;;  %v1636_v5 = vld [vmem:[%s2019_s1 + $0x238] sm:$0xff] }
  0x25   : >> { %427 = vmatpush.bf16.msra.mxu1 %v1567_v23  ;;  %v1621_v6 = vld [vmem:[%s2019_s1 + $0x140] sm:$0xff]  ;;  %v1635_v8 = vld [vmem:[%s2019_s1 + $0x230] sm:$0xff]  ;;  %v1634_v9 = vld [vmem:[%s2019_s1 + $0x228] sm:$0xff] }
  0x26   : >> { %505 = vmatpush.bf16.msra.mxu2 %v1583_v24  ;;  %v1613_v7 = vld [vmem:[%s2019_s1 + $0x80] sm:$0xff]  ;;  %v1632_v11 = vld [vmem:[%s2019_s1 + $0x218] sm:$0xff]  ;;  %v1631_v12 = vld [vmem:[%s2019_s1 + $0x210] sm:$0xff] }
  0x27   : >> { %602 = vmatpush.bf16.msra.mxu3 %v1599_v25  ;;  %v1633_v10 = vld [vmem:[%s2019_s1 + $0x220] sm:$0xff]  ;;  %v1630_v13 = vld [vmem:[%s2019_s1 + $0x208] sm:$0xff] }
  0x28   : >> { %367 = vmatpush.bf16.msra.mxu0 %v1574_v26  ;;  %v1629_v14 = vld [vmem:[%s2019_s1 + $0x200] sm:$0xff] }
  0x29   : >> { %428 = vmatpush.bf16.msra.mxu1 %v1566_v27 }
  0x2a   : >> { %506 = vmatpush.bf16.msra.mxu2 %v1582_v28 }
  0x2b   : >> { %603 = vmatpush.bf16.msra.mxu3 %v1598_v29 }
  0x2c   : >> { %368 = vmatpush.bf16.msra.mxu0 %v1573_v30 }
  0x2d   : >> { %429 = vmatpush.bf16.msra.mxu1 %v1565_v31 }
  0x2e   : >> { %507 = vmatpush.bf16.msra.mxu2 %v1581_v34 }
  0x2f   : >> { %604 = vmatpush.bf16.msra.mxu3 %v1597_v35  ;;  %369 = vmatmul.bf16.vlgmr.msra.gmra.mxu0 %v1885_v40 }
  0x30   : >> { %658 = vmatpush.bf16.msrb.mxu0 %v1596_v32  ;;  %430 = vmatmul.bf16.vlgmr.msra.gmra.mxu1 %v1887_v41 }
  0x31   : >> { %736 = vmatpush.bf16.msrb.mxu1 %v1612_v33  ;;  %508 = vmatmul.bf16.vlgmr.msra.gmra.mxu2 %v1895_v44 }
  0x32   : >> { %836 = vmatpush.bf16.msrb.mxu2 %v1628_v36  ;;  %605 = vmatmul.bf16.vlgmr.msra.gmra.mxu3 %v1885_v40 }
  0x33   : >> { %897 = vmatpush.bf16.msrb.mxu3 %v1620_v37 }
  0x34   : >> { %659 = vmatpush.bf16.msrb.mxu0 %v1595_v38 }
  0x35   : >> { %737 = vmatpush.bf16.msrb.mxu1 %v1611_v39 }
  0x36   : >> { %837 = vmatpush.bf16.msrb.mxu2 %v1627_v42 }
  0x37   : >> { %898 = vmatpush.bf16.msrb.mxu3 %v1619_v43  ;;  %v998_v43 = vperm.slane %v1752_v1, 0 }
  0x38   : >> { %660 = vmatpush.bf16.msrb.mxu0 %v1594_v45 }
  0x39   : >> { %738 = vmatpush.bf16.msrb.mxu1 %v1610_v46 }
  0x3a   : >> { %838 = vmatpush.bf16.msrb.mxu2 %v1626_v47 }
  0x3b   : >> { %899 = vmatpush.bf16.msrb.mxu3 %v1618_v48 }
  0x3c   : >> { %661 = vmatpush.bf16.msrb.mxu0 %v1593_v49 }
  0x3d   : >> { %739 = vmatpush.bf16.msrb.mxu1 %v1609_v50 }
  0x3e   : >> { %839 = vmatpush.bf16.msrb.mxu2 %v1625_v51 }
  0x3f   : >> { %900 = vmatpush.bf16.msrb.mxu3 %v1617_v52 }
  0x40   : >> { %662 = vmatpush.bf16.msrb.mxu0 %v1592_v53 }
  0x41   : >> { %740 = vmatpush.bf16.msrb.mxu1 %v1608_v54 }
  0x42   : >> { %840 = vmatpush.bf16.msrb.mxu2 %v1624_v55 }
  0x43   : >> { %901 = vmatpush.bf16.msrb.mxu3 %v1616_v56 }
  0x44   : >> { %663 = vmatpush.bf16.msrb.mxu0 %v1591_v57 }
  0x45   : >> { %741 = vmatpush.bf16.msrb.mxu1 %v1607_v58 }
  0x46   : >> { %841 = vmatpush.bf16.msrb.mxu2 %v1623_v59 }
  0x47   : >> { %902 = vmatpush.bf16.msrb.mxu3 %v1615_v60 }
  0x48   : >> { %664 = vmatpush.bf16.msrb.mxu0 %v1590_v61 }
  0x49   : >> { %742 = vmatpush.bf16.msrb.mxu1 %v1606_v62 }
  0x4a   : >> { %842 = vmatpush.bf16.msrb.mxu2 %v1622_v63 }
  0x4b   : >> { %903 = vmatpush.bf16.msrb.mxu3 %v1614_v2 }
  0x4c   : >> { %665 = vmatpush.bf16.msrb.mxu0 %v1589_v3 }
  0x4d   : >> { %743 = vmatpush.bf16.msrb.mxu1 %v1605_v4 }
  0x4e   : >> { %843 = vmatpush.bf16.msrb.mxu2 %v1621_v6 }
  0x4f   : >> { %904 = vmatpush.bf16.msrb.mxu3 %v1613_v7  ;;  %666 = vmatmul.bf16.vlgmr.msrb.gmra.mxu0 %v1887_v41 }
  0x50   : >> { %975 = vmatpush.bf16.msra.mxu0 %v1636_v5  ;;  %744 = vmatmul.bf16.vlgmr.msrb.gmra.mxu1 %v1895_v44 }
  0x51   : >> { %844 = vmatmul.bf16.vlgmr.msrb.gmra.mxu2 %v1885_v40 }
  0x52   : >> { %905 = vmatmul.bf16.vlgmr.msrb.gmra.mxu3 %v1887_v41  ;;  %v994_v41 = vperm.slane %v1747_v0, 0 }
  0x54   : >> { %976 = vmatpush.bf16.msra.mxu0 %v1635_v8 }
  0x58   : >> { %977 = vmatpush.bf16.msra.mxu0 %v1634_v9 }
  0x5c   : >> { %978 = vmatpush.bf16.msra.mxu0 %v1633_v10 }
  0x60   : >> { %979 = vmatpush.bf16.msra.mxu0 %v1632_v11 }
  0x64   : >> { %980 = vmatpush.bf16.msra.mxu0 %v1631_v12 }
  0x68   : >> { %981 = vmatpush.bf16.msra.mxu0 %v1630_v13 }
  0x6c   : >> { %982 = vmatpush.bf16.msra.mxu0 %v1629_v14 }
  0x6f   : >> { %983 = vmatmul.bf16.vlgmr.msra.gmra.mxu0 %v1895_v44 }
  0xac   : >> { %v370_v15 = vpop.f32.mrf.mxu0 }
  0xad   : >> { %v431_v16 = vpop.f32.mrf.mxu1 }
  0xae   : >> { %v432_v33 = vadd.f32 %v431_v16, %v370_v15 }
  0xb4   : >> { %v372_v17 = vpop.f32.mrf.mxu0  ;;  %v509_v19 = vpop.f32.mrf.mxu2 }
  0xb5   : >> { %v433_v18 = vpop.f32.mrf.mxu1  ;;  %v606_v20 = vpop.f32.mrf.mxu3  ;;  %v513_v37 = vadd.f32 %v509_v19, %v432_v33 }
  0xbc   : >> { %v511_v21 = vpop.f32.mrf.mxu2 }
  0xbd   : >> { %v608_v22 = vpop.f32.mrf.mxu3 }
  0xcc   : >> { %v667_v23 = vpop.f32.mrf.mxu0 }
  0xcd   : >> { %v745_v24 = vpop.f32.mrf.mxu1  ;;  %v668_v31 = vadd.f32 %v667_v23, %v606_v20 }
  0xcf   : >> { %v749_v32 = vadd.f32 %v745_v24, %v668_v31 }
  0xd1   : >> { %v751_v35 = vrot.slane %v749_v32, 1 }
  0xd3   : >> { %v753_v39 = vadd.f32 %v751_v35, %v513_v37 }
  0xd4   : >> { %v669_v25 = vpop.f32.mrf.mxu0  ;;  %v845_v26 = vpop.f32.mrf.mxu2 }
  0xd5   : >> { %v906_v27 = vpop.f32.mrf.mxu3  ;;  %v747_v28 = vpop.f32.mrf.mxu1 }
  0xd6   : >> { %v907_v34 = vadd.f32 %v906_v27, %v845_v26 }
  0xdc   : >> { %v847_v29 = vpop.f32.mrf.mxu2 }
  0xdd   : >> { %v908_v30 = vpop.f32.mrf.mxu3 }
  0xec   : >> { %v984_v36 = vpop.f32.mrf.mxu0 }
  0xed   : >> { %v988_v38 = vadd.f32 %v984_v36, %v907_v34 }
  0xef   : >> { %v990_v40 = vrot.slane %v988_v38, 2 }
  0xf1   : >> { %v992_v42 = vadd.f32 %v990_v40, %v753_v39 }
  0xf3   : >> { %v996_v44 = vmul.f32 %v994_v41, %v992_v42 }
  0xf4   : >> { %v986_v45 = vpop.f32.mrf.mxu0 }
  0xf5   : >> { %v1000_v46 = vadd.f32 %v998_v43, %v996_v44 }
  0xf7   : >> { %v1001_v47 = vmax.f32 %v1000_v46, 0.0  ;;  %267 = sbr.rel (!%p265_p5) target bundleno = 15 (0xf), region = 94 }
  0xf9   : >> { %v1002_v48 = vpack.c.bf16 %v1001_v47, %v1001_v47 }
  0xfb   : >> { %1004 = vst [vmem:[%s1003_s12] sm:$0x1] %v1002_v48 }
  0xfc PF: > { %s14_s17 = sadd.s32 1, %s1695_s17   ;;  %s2023_s15 = smov %s1691_s16 }
  0xfd   : > { %p11_p6 = scmp.ge.s32.totalorder %s14_s17, 4   ;;  %s2024_s16 = smov %s2026_s18 }
  0xff   :  { %13 = sbr.rel (!%p11_p6) target bundleno = 2 (0x2), region = 105 }

</bundles_post_ra>
